<compile_context>
chip_gen: v6e
topology: v6e:2x2x1
jax: 0.10.0
libtpu: 0.0.40
codegen_flags: <defaults>
</compile_context>

<pallas_src>
import math
import functools

import jax
import jax.numpy as jnp
from jax.experimental import pallas as pl
from jax.experimental.pallas import tpu as pltpu


# Order in which the stacked per-layer parameters are passed to the kernel.
_PARAM_ORDER = (
    "wqkv", "bqkv", "wo_s", "bo_s", "ln1_g", "ln1_b",
    "wq_c", "bq_c", "wkv_c", "bkv_c", "wo_c", "bo_c", "ln2_g", "ln2_b",
    "w1", "b1", "w2", "b2", "ln3_g", "ln3_b",
)
_MATRIX_PARAMS = ("wqkv", "wo_s", "wq_c", "wkv_c", "wo_c", "w1", "w2")


# ------------------------------ Pallas kernel -------------------------------

def _decoder_kernel(x_ref, mem_ref,
                    wqkv_ref, bqkv_ref, wo_s_ref, bo_s_ref, ln1g_ref, ln1b_ref,
                    wq_c_ref, bq_c_ref, wkv_c_ref, bkv_c_ref, wo_c_ref, bo_c_ref,
                    ln2g_ref, ln2b_ref,
                    w1_ref, b1_ref, w2_ref, b2_ref, ln3g_ref, ln3b_ref,
                    o_ref, carry_ref, *, n_heads, eps, resident_weights):
    """One (batch-block b, layer l) grid step of the fused decoder stack.

    The f32 scratch `carry_ref` (resident across the layer axis) holds the
    residual stream; at l == 0 it is seeded from the decoder input and at the
    last layer the result is written to the HBM output block.
    """
    l_idx = pl.program_id(1)
    n_layers = pl.num_programs(1)
    B, L, D = x_ref.shape
    S = mem_ref.shape[1]
    H = n_heads
    Dh = D // H

    def wsel(ref):
        # Resident: ref holds all layers -> dynamic leading-dim index.
        # Streaming: ref holds exactly this layer's (1, ...) block.
        return ref[l_idx] if resident_weights else ref[0]

    @pl.when(l_idx == 0)
    def _():
        carry_ref[...] = x_ref[...].reshape(B * L, D).astype(jnp.float32)

    x = carry_ref[...]                                 # (B*L, D) f32 residual
    mem = mem_ref[...].reshape(B * S, D)               # (B*S, D)

    def matmul(a, w_ref, b_ref, relu=False):
        # Weights are already bf16 in VMEM; only the activation is cast.
        acc = jnp.dot(a.astype(jnp.bfloat16), wsel(w_ref),
                      preferred_element_type=jnp.float32)
        acc = acc + wsel(b_ref).astype(jnp.float32)
        if relu:
            acc = jnp.maximum(acc, 0.0)
        return acc

    def add_layernorm(res, y, g_ref, b_ref):
        z = res + y                                     # f32 residual add
        mu = jnp.mean(z, axis=-1, keepdims=True)
        var = jnp.mean(jnp.square(z - mu), axis=-1, keepdims=True)
        zn = (z - mu) * jax.lax.rsqrt(var + eps)
        return zn * wsel(g_ref).astype(jnp.float32) + wsel(b_ref).astype(jnp.float32)

    def split_heads(a, T):
        # (B*T, D) -> (H*B, T, Dh) head-major batch dim, using only static
        # lane slices + a leading-dim concat (no transposes).
        a3 = a.reshape(B, T, D)
        return jnp.concatenate(
            [a3[:, :, h * Dh:(h + 1) * Dh] for h in range(H)], axis=0)

    def mha(q, k, v, wo_ref, bo_ref, T_kv):
        # Batched multi-head softmax attention.  The 1/sqrt(Dh) scale is
        # already folded into the Q projection weights.
        qh = split_heads(q, L).astype(jnp.bfloat16)        # (H*B, L, Dh)
        kh = split_heads(k, T_kv).astype(jnp.bfloat16)     # (H*B, T, Dh)
        vh = split_heads(v, T_kv).astype(jnp.bfloat16)     # (H*B, T, Dh)
        s = jnp.einsum("bld,bsd->bls", qh, kh,
                       preferred_element_type=jnp.float32)  # (H*B, L, T)
        m = jnp.max(s, axis=-1, keepdims=True)
        p = jnp.exp(s - m)
        denom = jnp.sum(p, axis=-1, keepdims=True)
        p = p * pl.reciprocal(denom, approx=True)            # EUP, not VALU
        o = jnp.einsum("bls,bsd->bld", p.astype(jnp.bfloat16), vh,
                       preferred_element_type=jnp.float32)   # (H*B, L, Dh)
        # Merge heads back along lanes -> (B*L, D), then ONE full-width
        # output projection (no per-head accumulation chain).
        oc = jnp.concatenate([o[h * B:(h + 1) * B] for h in range(H)], axis=-1)
        oc = oc.reshape(B * L, D)
        return (jnp.dot(oc.astype(jnp.bfloat16), wsel(wo_ref),
                        preferred_element_type=jnp.float32)
                + wsel(bo_ref).astype(jnp.float32))

    # ---- self attention + add & norm (fused QKV projection) ----
    qkv = matmul(x, wqkv_ref, bqkv_ref)                    # (B*L, 3D)
    sa = mha(qkv[:, :D], qkv[:, D:2 * D], qkv[:, 2 * D:], wo_s_ref, bo_s_ref, L)
    x = add_layernorm(x, sa, ln1g_ref, ln1b_ref)

    # ---- cross attention + add & norm (fused KV projection of memory) ----
    qc = matmul(x, wq_c_ref, bq_c_ref)                     # (B*L, D)
    kvc = matmul(mem, wkv_c_ref, bkv_c_ref)                # (B*S, 2D)
    ca = mha(qc, kvc[:, :D], kvc[:, D:], wo_c_ref, bo_c_ref, S)
    x = add_layernorm(x, ca, ln2g_ref, ln2b_ref)

    # ---- feed forward + add & norm ----
    y = matmul(x, w1_ref, b1_ref, relu=True)               # (B*L, F)
    y = matmul(y, w2_ref, b2_ref)                          # (B*L, D)
    x = add_layernorm(x, y, ln3g_ref, ln3b_ref)

    carry_ref[...] = x

    @pl.when(l_idx == n_layers - 1)
    def _():
        o_ref[...] = x.reshape(B, L, D).astype(o_ref.dtype)


# ------------------------------ Python wrapper -------------------------------

def _pick_batch_block(N, L, target_rows=256):
    """Largest divisor of N with B*L <= target_rows, keeping >= 2 grid blocks
    along the parallel axis when possible (two TensorCores on v7x)."""
    best = 1
    for b in range(1, N + 1):
        if N % b == 0 and b * L <= target_rows:
            best = b
    if N // best < 2:
        for b in range(best - 1, 0, -1):
            if N % b == 0 and N // b >= 2:
                return b
    return best


def decoder_forward(params, Q, Kmem, n_heads, eps=1e-5, batch_block=None,
                    vmem_limit_bytes=48 * 1024 * 1024):
    """Full decoder stack in a single pallas_call. Q: (N,L,D), Kmem: (N,S,D).

    `params` should come from `prepare_params` (bf16 matrices, Q-scale folded).
    """
    N, L, D = Q.shape
    Nk, S, Dk = Kmem.shape
    assert Nk == N and Dk == D and D % n_heads == 0
    weights = [params[name] for name in _PARAM_ORDER]
    n_layers = weights[0].shape[0]

    if batch_block is None:
        batch_block = _pick_batch_block(N, L)
    assert N % batch_block == 0
    B_blk = batch_block

    # Keep all layers' weights VMEM-resident when (double-buffered) they fit
    # comfortably; v7x has only 64 MiB physical VMEM per TensorCore.
    w_bytes = sum(int(w.size) * w.dtype.itemsize for w in weights)
    resident = 2 * w_bytes <= 40 * 1024 * 1024

    if resident:
        def weight_spec(arr):
            # Whole tensor as one block, constant index_map -> DMA'd once,
            # resident across both grid axes.
            return pl.BlockSpec(arr.shape, lambda b, l: (0, 0, 0))
    else:
        # TODO(synk): consider pl.Buffered(3) on the large matrices here.
        def weight_spec(arr):
            block = (1,) + arr.shape[1:]
            return pl.BlockSpec(block, lambda b, l: (l, 0, 0))

    grid = (N // B_blk, n_layers)               # batch outer, layer innermost

    return pl.pallas_call(
        functools.partial(_decoder_kernel, n_heads=n_heads, eps=eps,
                          resident_weights=resident),
        out_shape=jax.ShapeDtypeStruct((N, L, D), Q.dtype),
        grid=grid,
        in_specs=[
            pl.BlockSpec((B_blk, L, D), lambda b, l: (b, 0, 0)),   # Q (l==0 seed)
            pl.BlockSpec((B_blk, S, D), lambda b, l: (b, 0, 0)),   # memory
        ] + [weight_spec(w) for w in weights],
        out_specs=pl.BlockSpec((B_blk, L, D), lambda b, l: (b, 0, 0)),
        scratch_shapes=[pltpu.VMEM((B_blk * L, D), jnp.float32)],  # f32 carry
        compiler_params=pltpu.CompilerParams(
            dimension_semantics=("parallel", "arbitrary"),
            vmem_limit_bytes=vmem_limit_bytes,
        ),
    )(Q, Kmem, *weights)


# --------------------------- Parameter construction --------------------------

def init_params(key, n_layers, d_model, d_ff):
    D, F = d_model, d_ff
    shapes = dict(
        wqkv=(n_layers, D, 3 * D), bqkv=(n_layers, 1, 3 * D),
        wo_s=(n_layers, D, D), bo_s=(n_layers, 1, D),
        wq_c=(n_layers, D, D), bq_c=(n_layers, 1, D),
        wkv_c=(n_layers, D, 2 * D), bkv_c=(n_layers, 1, 2 * D),
        wo_c=(n_layers, D, D), bo_c=(n_layers, 1, D),
        w1=(n_layers, D, F), b1=(n_layers, 1, F),
        w2=(n_layers, F, D), b2=(n_layers, 1, D),
    )
    params = {}
    keys = jax.random.split(key, len(shapes))
    for (name, shape), k in zip(shapes.items(), keys):
        params[name] = 0.05 * jax.random.normal(k, shape, jnp.float32)
    for i in (1, 2, 3):
        params[f"ln{i}_g"] = jnp.ones((n_layers, 1, D), jnp.float32)
        params[f"ln{i}_b"] = jnp.zeros((n_layers, 1, D), jnp.float32)
    return params


def prepare_params(params, n_heads):
    """Kernel-ready params: fold 1/sqrt(Dh) into the Q projections and store
    all matmul weight matrices as bf16 (done once, offline)."""
    p = dict(params)
    D = p["wo_s"].shape[-1]
    scale = 1.0 / math.sqrt(D // n_heads)
    p["wqkv"] = p["wqkv"].at[:, :, :D].multiply(scale)
    p["bqkv"] = p["bqkv"].at[:, :, :D].multiply(scale)
    p["wq_c"] = p["wq_c"] * scale
    p["bq_c"] = p["bq_c"] * scale
    for name in _MATRIX_PARAMS:
        p[name] = p[name].astype(jnp.bfloat16)
    return p


# ------------------------------ Pure-JAX reference ---------------------------

def _reference_forward(params, Q, Kmem, n_heads, eps=1e-5):
    """f32 reference of the fast-transformers decoder stack (for sanity check)."""
    def ln(z, g, b):
        mu = jnp.mean(z, axis=-1, keepdims=True)
        var = jnp.mean(jnp.square(z - mu), axis=-1, keepdims=True)
        return (z - mu) / jnp.sqrt(var + eps) * g + b

    def mha(xq, xkv, wq, bq, wk, bk, wv, bv, wo, bo):
        N, L, D = xq.shape
        S = xkv.shape[1]
        H, Dh = n_heads, D // n_heads
        q = (xq @ wq + bq).reshape(N, L, H, Dh)
        k = (xkv @ wk + bk).reshape(N, S, H, Dh)
        v = (xkv @ wv + bv).reshape(N, S, H, Dh)
        s = jnp.einsum("nlhd,nshd->nhls", q, k) / math.sqrt(Dh)
        a = jax.nn.softmax(s, axis=-1)
        o = jnp.einsum("nhls,nshd->nlhd", a, v).reshape(N, L, D)
        return o @ wo + bo

    D = Q.shape[-1]
    x = Q
    n_layers = params["wqkv"].shape[0]
    for i in range(n_layers):
        wqkv, bqkv = params["wqkv"][i], params["bqkv"][i][0]
        sa = mha(x, x,
                 wqkv[:, :D], bqkv[:D],
                 wqkv[:, D:2 * D], bqkv[D:2 * D],
                 wqkv[:, 2 * D:], bqkv[2 * D:],
                 params["wo_s"][i], params["bo_s"][i][0])
        x = ln(x + sa, params["ln1_g"][i][0], params["ln1_b"][i][0])

        wkv, bkv = params["wkv_c"][i], params["bkv_c"][i][0]
        ca = mha(x, Kmem,
                 params["wq_c"][i], params["bq_c"][i][0],
                 wkv[:, :D], bkv[:D], wkv[:, D:], bkv[D:],
                 params["wo_c"][i], params["bo_c"][i][0])
        x = ln(x + ca, params["ln2_g"][i][0], params["ln2_b"][i][0])

        y = jnp.maximum(x @ params["w1"][i] + params["b1"][i][0], 0.0)
        y = y @ params["w2"][i] + params["b2"][i][0]
        x = ln(x + y, params["ln3_g"][i][0], params["ln3_b"][i][0])
    return x


# ----------------------------------- Main ------------------------------------

if __name__ == "__main__":
    # Small shapes consistent with the module (d_model divisible by n_heads).
    N, L, S = 4, 8, 8
    n_layers, n_dim, n_heads, d_ff = 2, 128, 8, 256

    key = jax.random.PRNGKey(0)
    kq, kk, kp = jax.random.split(key, 3)
    Q = jax.random.normal(kq, (N, L, n_dim), jnp.float32)
    K = jax.random.normal(kk, (N, S, n_dim), jnp.float32)
    params = init_params(kp, n_layers, n_dim, d_ff)
    kparams = prepare_params(params, n_heads)      # bf16 weights, scale folded

    fwd = jax.jit(functools.partial(decoder_forward, n_heads=n_heads))
    out = jax.block_until_ready(fwd(kparams, Q, K))

    assert out.shape == (N, L, n_dim), out.shape
    assert bool(jnp.all(jnp.isfinite(out)))

    # Sanity check against the f32 pure-JAX reference (loose tolerance since
    # the kernel uses bf16 weights / MXU operands and approx softmax recip).
    ref = _reference_forward(params, Q, K, n_heads)
    err = float(jnp.max(jnp.abs(out - ref)))
    assert err < 0.15, err

    print("KERNEL_OK")
</pallas_src>

<mosaic_0001>
module attributes {stable_mosaic.version = 11 : i64} {
  func.func @_decoder_kernel(%arg0: i32, %arg1: i32, %arg2: memref<2x8x128xf32, #tpu.memory_space<vmem>>, %arg3: memref<2x8x128xf32, #tpu.memory_space<vmem>>, %arg4: memref<2x128x384xbf16, #tpu.memory_space<vmem>>, %arg5: memref<2x1x384xf32, #tpu.memory_space<vmem>>, %arg6: memref<2x128x128xbf16, #tpu.memory_space<vmem>>, %arg7: memref<2x1x128xf32, #tpu.memory_space<vmem>>, %arg8: memref<2x1x128xf32, #tpu.memory_space<vmem>>, %arg9: memref<2x1x128xf32, #tpu.memory_space<vmem>>, %arg10: memref<2x128x128xbf16, #tpu.memory_space<vmem>>, %arg11: memref<2x1x128xf32, #tpu.memory_space<vmem>>, %arg12: memref<2x128x256xbf16, #tpu.memory_space<vmem>>, %arg13: memref<2x1x256xf32, #tpu.memory_space<vmem>>, %arg14: memref<2x128x128xbf16, #tpu.memory_space<vmem>>, %arg15: memref<2x1x128xf32, #tpu.memory_space<vmem>>, %arg16: memref<2x1x128xf32, #tpu.memory_space<vmem>>, %arg17: memref<2x1x128xf32, #tpu.memory_space<vmem>>, %arg18: memref<2x128x256xbf16, #tpu.memory_space<vmem>>, %arg19: memref<2x1x256xf32, #tpu.memory_space<vmem>>, %arg20: memref<2x256x128xbf16, #tpu.memory_space<vmem>>, %arg21: memref<2x1x128xf32, #tpu.memory_space<vmem>>, %arg22: memref<2x1x128xf32, #tpu.memory_space<vmem>>, %arg23: memref<2x1x128xf32, #tpu.memory_space<vmem>>, %arg24: memref<2x8x128xf32, #tpu.memory_space<vmem>>, %arg25: memref<16x128xf32, #tpu.memory_space<vmem>>) attributes {dimension_semantics = [#tpu.dimension_semantics<parallel>, #tpu.dimension_semantics<arbitrary>], iteration_bounds = array<i64: 2, 2>, scalar_prefetch = 0 : i64, scratch_operands = 1 : i64, tpu.core_type = #tpu.core_type<tc>, window_params = [{transform_indices = @transform_0, window_bounds = array<i64: 2, 8, 128>}, {transform_indices = @transform_1, window_bounds = array<i64: 2, 8, 128>}, {pipeline_mode = #tpu.pipeline_mode<synchronous>, transform_indices = @transform_2, window_bounds = array<i64: 2, 128, 384>}, {pipeline_mode = #tpu.pipeline_mode<synchronous>, transform_indices = @transform_3, window_bounds = array<i64: 2, 1, 384>}, {pipeline_mode = #tpu.pipeline_mode<synchronous>, transform_indices = @transform_4, window_bounds = array<i64: 2, 128, 128>}, {pipeline_mode = #tpu.pipeline_mode<synchronous>, transform_indices = @transform_5, window_bounds = array<i64: 2, 1, 128>}, {pipeline_mode = #tpu.pipeline_mode<synchronous>, transform_indices = @transform_6, window_bounds = array<i64: 2, 1, 128>}, {pipeline_mode = #tpu.pipeline_mode<synchronous>, transform_indices = @transform_7, window_bounds = array<i64: 2, 1, 128>}, {pipeline_mode = #tpu.pipeline_mode<synchronous>, transform_indices = @transform_8, window_bounds = array<i64: 2, 128, 128>}, {pipeline_mode = #tpu.pipeline_mode<synchronous>, transform_indices = @transform_9, window_bounds = array<i64: 2, 1, 128>}, {pipeline_mode = #tpu.pipeline_mode<synchronous>, transform_indices = @transform_10, window_bounds = array<i64: 2, 128, 256>}, {pipeline_mode = #tpu.pipeline_mode<synchronous>, transform_indices = @transform_11, window_bounds = array<i64: 2, 1, 256>}, {pipeline_mode = #tpu.pipeline_mode<synchronous>, transform_indices = @transform_12, window_bounds = array<i64: 2, 128, 128>}, {pipeline_mode = #tpu.pipeline_mode<synchronous>, transform_indices = @transform_13, window_bounds = array<i64: 2, 1, 128>}, {pipeline_mode = #tpu.pipeline_mode<synchronous>, transform_indices = @transform_14, window_bounds = array<i64: 2, 1, 128>}, {pipeline_mode = #tpu.pipeline_mode<synchronous>, transform_indices = @transform_15, window_bounds = array<i64: 2, 1, 128>}, {pipeline_mode = #tpu.pipeline_mode<synchronous>, transform_indices = @transform_16, window_bounds = array<i64: 2, 128, 256>}, {pipeline_mode = #tpu.pipeline_mode<synchronous>, transform_indices = @transform_17, window_bounds = array<i64: 2, 1, 256>}, {pipeline_mode = #tpu.pipeline_mode<synchronous>, transform_indices = @transform_18, window_bounds = array<i64: 2, 256, 128>}, {pipeline_mode = #tpu.pipeline_mode<synchronous>, transform_indices = @transform_19, window_bounds = array<i64: 2, 1, 128>}, {pipeline_mode = #tpu.pipeline_mode<synchronous>, transform_indices = @transform_20, window_bounds = array<i64: 2, 1, 128>}, {pipeline_mode = #tpu.pipeline_mode<synchronous>, transform_indices = @transform_21, window_bounds = array<i64: 2, 1, 128>}, {transform_indices = @transform_22, window_bounds = array<i64: 2, 8, 128>}]} {
    %c0_i32 = arith.constant 0 : i32
    %0 = arith.cmpi eq, %arg1, %c0_i32 : i32
    %1 = arith.extui %0 : i1 to i32
    %c0_i32_0 = arith.constant 0 : i32
    %2 = arith.cmpi ne, %1, %c0_i32_0 : i32
    scf.if %2 {
      %c0_78 = arith.constant 0 : index
      %c0_79 = arith.constant 0 : index
      %c0_80 = arith.constant 0 : index
      %286 = vector.load %arg2[%c0_78, %c0_79, %c0_80] : memref<2x8x128xf32, #tpu.memory_space<vmem>>, vector<2x8x128xf32>
      %287 = vector.shape_cast %286 : vector<2x8x128xf32> to vector<16x128xf32>
      %c0_81 = arith.constant 0 : index
      %c0_82 = arith.constant 0 : index
      %288 = vector.load %arg25[%c0_81, %c0_82] : memref<16x128xf32, #tpu.memory_space<vmem>>, vector<16x128xf32>
      tpu.vector_store %arg25[%c0_81, %c0_82], %287 {strides = array<i32>} : memref<16x128xf32, #tpu.memory_space<vmem>>, vector<16x128xf32>,
    } else {
    }
    %c0 = arith.constant 0 : index
    %c0_1 = arith.constant 0 : index
    %3 = vector.load %arg25[%c0, %c0_1] : memref<16x128xf32, #tpu.memory_space<vmem>>, vector<16x128xf32>
    %c0_2 = arith.constant 0 : index
    %c0_3 = arith.constant 0 : index
    %c0_4 = arith.constant 0 : index
    %4 = vector.load %arg3[%c0_2, %c0_3, %c0_4] : memref<2x8x128xf32, #tpu.memory_space<vmem>>, vector<2x8x128xf32>
    %5 = vector.shape_cast %4 : vector<2x8x128xf32> to vector<16x128xf32>
    %6 = arith.truncf %3 : vector<16x128xf32> to vector<16x128xbf16>
    %7 = arith.index_cast %arg1 : i32 to index
    %c0_5 = arith.constant 0 : index
    %c0_6 = arith.constant 0 : index
    %8 = vector.load %arg4[%7, %c0_5, %c0_6] : memref<2x128x384xbf16, #tpu.memory_space<vmem>>, vector<1x128x384xbf16>
    %9 = vector.shape_cast %8 : vector<1x128x384xbf16> to vector<128x384xbf16>
    %cst = arith.constant dense<0.000000e+00> : vector<16x384xf32>
    %10 = tpu.matmul %6, %9, %cst {dimension_numbers = #tpu.dot_dimension_numbers<[1], [0], [0], [1], [0, 0, 1, 1], [], []>} : vector<16x128xbf16>, vector<128x384xbf16>, vector<16x384xf32> -> vector<16x384xf32>
    %11 = arith.index_cast %arg1 : i32 to index
    %c0_7 = arith.constant 0 : index
    %c0_8 = arith.constant 0 : index
    %12 = vector.load %arg5[%11, %c0_7, %c0_8] : memref<2x1x384xf32, #tpu.memory_space<vmem>>, vector<1x1x384xf32>
    %13 = vector.shape_cast %12 : vector<1x1x384xf32> to vector<1x384xf32>
    %14 = vector.broadcast %13 : vector<1x384xf32> to vector<16x384xf32>
    %15 = arith.addf %10, %14 : vector<16x384xf32>
    %16 = vector.extract_strided_slice %15 {offsets = [0, 0], sizes = [16, 128], strides = [1, 1]} : vector<16x384xf32> to vector<16x128xf32>
    %17 = vector.extract_strided_slice %15 {offsets = [0, 128], sizes = [16, 128], strides = [1, 1]} : vector<16x384xf32> to vector<16x128xf32>
    %18 = vector.extract_strided_slice %15 {offsets = [0, 256], sizes = [16, 128], strides = [1, 1]} : vector<16x384xf32> to vector<16x128xf32>
    %19 = vector.shape_cast %16 : vector<16x128xf32> to vector<2x8x128xf32>
    %20 = vector.extract_strided_slice %19 {offsets = [0, 0, 0], sizes = [2, 8, 16], strides = [1, 1, 1]} : vector<2x8x128xf32> to vector<2x8x16xf32>
    %21 = vector.extract_strided_slice %19 {offsets = [0, 0, 16], sizes = [2, 8, 16], strides = [1, 1, 1]} : vector<2x8x128xf32> to vector<2x8x16xf32>
    %22 = vector.extract_strided_slice %19 {offsets = [0, 0, 32], sizes = [2, 8, 16], strides = [1, 1, 1]} : vector<2x8x128xf32> to vector<2x8x16xf32>
    %23 = vector.extract_strided_slice %19 {offsets = [0, 0, 48], sizes = [2, 8, 16], strides = [1, 1, 1]} : vector<2x8x128xf32> to vector<2x8x16xf32>
    %24 = vector.extract_strided_slice %19 {offsets = [0, 0, 64], sizes = [2, 8, 16], strides = [1, 1, 1]} : vector<2x8x128xf32> to vector<2x8x16xf32>
    %25 = vector.extract_strided_slice %19 {offsets = [0, 0, 80], sizes = [2, 8, 16], strides = [1, 1, 1]} : vector<2x8x128xf32> to vector<2x8x16xf32>
    %26 = vector.extract_strided_slice %19 {offsets = [0, 0, 96], sizes = [2, 8, 16], strides = [1, 1, 1]} : vector<2x8x128xf32> to vector<2x8x16xf32>
    %27 = vector.extract_strided_slice %19 {offsets = [0, 0, 112], sizes = [2, 8, 16], strides = [1, 1, 1]} : vector<2x8x128xf32> to vector<2x8x16xf32>
    %28 = tpu.concatenate %20, %21, %22, %23, %24, %25, %26, %27 in 0 : vector<2x8x16xf32>, vector<2x8x16xf32>, vector<2x8x16xf32>, vector<2x8x16xf32>, vector<2x8x16xf32>, vector<2x8x16xf32>, vector<2x8x16xf32>, vector<2x8x16xf32> -> vector<16x8x16xf32>
    %29 = arith.truncf %28 : vector<16x8x16xf32> to vector<16x8x16xbf16>
    %30 = vector.shape_cast %17 : vector<16x128xf32> to vector<2x8x128xf32>
    %31 = vector.extract_strided_slice %30 {offsets = [0, 0, 0], sizes = [2, 8, 16], strides = [1, 1, 1]} : vector<2x8x128xf32> to vector<2x8x16xf32>
    %32 = vector.extract_strided_slice %30 {offsets = [0, 0, 16], sizes = [2, 8, 16], strides = [1, 1, 1]} : vector<2x8x128xf32> to vector<2x8x16xf32>
    %33 = vector.extract_strided_slice %30 {offsets = [0, 0, 32], sizes = [2, 8, 16], strides = [1, 1, 1]} : vector<2x8x128xf32> to vector<2x8x16xf32>
    %34 = vector.extract_strided_slice %30 {offsets = [0, 0, 48], sizes = [2, 8, 16], strides = [1, 1, 1]} : vector<2x8x128xf32> to vector<2x8x16xf32>
    %35 = vector.extract_strided_slice %30 {offsets = [0, 0, 64], sizes = [2, 8, 16], strides = [1, 1, 1]} : vector<2x8x128xf32> to vector<2x8x16xf32>
    %36 = vector.extract_strided_slice %30 {offsets = [0, 0, 80], sizes = [2, 8, 16], strides = [1, 1, 1]} : vector<2x8x128xf32> to vector<2x8x16xf32>
    %37 = vector.extract_strided_slice %30 {offsets = [0, 0, 96], sizes = [2, 8, 16], strides = [1, 1, 1]} : vector<2x8x128xf32> to vector<2x8x16xf32>
    %38 = vector.extract_strided_slice %30 {offsets = [0, 0, 112], sizes = [2, 8, 16], strides = [1, 1, 1]} : vector<2x8x128xf32> to vector<2x8x16xf32>
    %39 = tpu.concatenate %31, %32, %33, %34, %35, %36, %37, %38 in 0 : vector<2x8x16xf32>, vector<2x8x16xf32>, vector<2x8x16xf32>, vector<2x8x16xf32>, vector<2x8x16xf32>, vector<2x8x16xf32>, vector<2x8x16xf32>, vector<2x8x16xf32> -> vector<16x8x16xf32>
    %40 = arith.truncf %39 : vector<16x8x16xf32> to vector<16x8x16xbf16>
    %41 = vector.shape_cast %18 : vector<16x128xf32> to vector<2x8x128xf32>
    %42 = vector.extract_strided_slice %41 {offsets = [0, 0, 0], sizes = [2, 8, 16], strides = [1, 1, 1]} : vector<2x8x128xf32> to vector<2x8x16xf32>
    %43 = vector.extract_strided_slice %41 {offsets = [0, 0, 16], sizes = [2, 8, 16], strides = [1, 1, 1]} : vector<2x8x128xf32> to vector<2x8x16xf32>
    %44 = vector.extract_strided_slice %41 {offsets = [0, 0, 32], sizes = [2, 8, 16], strides = [1, 1, 1]} : vector<2x8x128xf32> to vector<2x8x16xf32>
    %45 = vector.extract_strided_slice %41 {offsets = [0, 0, 48], sizes = [2, 8, 16], strides = [1, 1, 1]} : vector<2x8x128xf32> to vector<2x8x16xf32>
    %46 = vector.extract_strided_slice %41 {offsets = [0, 0, 64], sizes = [2, 8, 16], strides = [1, 1, 1]} : vector<2x8x128xf32> to vector<2x8x16xf32>
    %47 = vector.extract_strided_slice %41 {offsets = [0, 0, 80], sizes = [2, 8, 16], strides = [1, 1, 1]} : vector<2x8x128xf32> to vector<2x8x16xf32>
    %48 = vector.extract_strided_slice %41 {offsets = [0, 0, 96], sizes = [2, 8, 16], strides = [1, 1, 1]} : vector<2x8x128xf32> to vector<2x8x16xf32>
    %49 = vector.extract_strided_slice %41 {offsets = [0, 0, 112], sizes = [2, 8, 16], strides = [1, 1, 1]} : vector<2x8x128xf32> to vector<2x8x16xf32>
    %50 = tpu.concatenate %42, %43, %44, %45, %46, %47, %48, %49 in 0 : vector<2x8x16xf32>, vector<2x8x16xf32>, vector<2x8x16xf32>, vector<2x8x16xf32>, vector<2x8x16xf32>, vector<2x8x16xf32>, vector<2x8x16xf32>, vector<2x8x16xf32> -> vector<16x8x16xf32>
    %51 = arith.truncf %50 : vector<16x8x16xf32> to vector<16x8x16xbf16>
    "tpu.trace_start"() <{level = 10 : i32, message = "bld,bsd->bls"}> : () -> ()
    %cst_9 = arith.constant dense<0.000000e+00> : vector<16x8x8xf32>
    %52 = tpu.matmul %29, %40, %cst_9 {dimension_numbers = #tpu.dot_dimension_numbers<[2], [2], [1], [1], [0, 0, 0, 1, 1, 1], [0], [0]>} : vector<16x8x16xbf16>, vector<16x8x16xbf16>, vector<16x8x8xf32> -> vector<16x8x8xf32>
    "tpu.trace_stop"() : () -> ()
    %cst_10 = arith.constant dense<0xFF800000> : vector<16x8xf32>
    %53 = vector.multi_reduction <maximumf>, %52, %cst_10 [2] : vector<16x8x8xf32> to vector<16x8xf32>
    %54 = vector.shape_cast %53 : vector<16x8xf32> to vector<16x8x1xf32>
    %55 = vector.broadcast %54 : vector<16x8x1xf32> to vector<16x8x8xf32>
    %56 = arith.subf %52, %55 : vector<16x8x8xf32>
    %57 = math.exp %56 : vector<16x8x8xf32>
    %cst_11 = arith.constant dense<0.000000e+00> : vector<16x8xf32>
    %58 = vector.multi_reduction <add>, %57, %cst_11 [2] : vector<16x8x8xf32> to vector<16x8xf32>
    %59 = vector.shape_cast %58 : vector<16x8xf32> to vector<16x8x1xf32>
    %60 = tpu.reciprocal %59 {approx = true} : vector<16x8x1xf32> -> vector<16x8x1xf32>
    %61 = vector.broadcast %60 : vector<16x8x1xf32> to vector<16x8x8xf32>
    %62 = arith.mulf %57, %61 : vector<16x8x8xf32>
    %63 = arith.truncf %62 : vector<16x8x8xf32> to vector<16x8x8xbf16>
    "tpu.trace_start"() <{level = 10 : i32, message = "bls,bsd->bld"}> : () -> ()
    %cst_12 = arith.constant dense<0.000000e+00> : vector<16x8x16xf32>
    %64 = tpu.matmul %63, %51, %cst_12 {dimension_numbers = #tpu.dot_dimension_numbers<[2], [1], [1], [2], [0, 0, 0, 1, 1, 2], [0], [0]>} : vector<16x8x8xbf16>, vector<16x8x16xbf16>, vector<16x8x16xf32> -> vector<16x8x16xf32>
    "tpu.trace_stop"() : () -> ()
    %65 = vector.extract_strided_slice %64 {offsets = [0, 0, 0], sizes = [2, 8, 16], strides = [1, 1, 1]} : vector<16x8x16xf32> to vector<2x8x16xf32>
    %66 = vector.extract_strided_slice %64 {offsets = [2, 0, 0], sizes = [2, 8, 16], strides = [1, 1, 1]} : vector<16x8x16xf32> to vector<2x8x16xf32>
    %67 = vector.extract_strided_slice %64 {offsets = [4, 0, 0], sizes = [2, 8, 16], strides = [1, 1, 1]} : vector<16x8x16xf32> to vector<2x8x16xf32>
    %68 = vector.extract_strided_slice %64 {offsets = [6, 0, 0], sizes = [2, 8, 16], strides = [1, 1, 1]} : vector<16x8x16xf32> to vector<2x8x16xf32>
    %69 = vector.extract_strided_slice %64 {offsets = [8, 0, 0], sizes = [2, 8, 16], strides = [1, 1, 1]} : vector<16x8x16xf32> to vector<2x8x16xf32>
    %70 = vector.extract_strided_slice %64 {offsets = [10, 0, 0], sizes = [2, 8, 16], strides = [1, 1, 1]} : vector<16x8x16xf32> to vector<2x8x16xf32>
    %71 = vector.extract_strided_slice %64 {offsets = [12, 0, 0], sizes = [2, 8, 16], strides = [1, 1, 1]} : vector<16x8x16xf32> to vector<2x8x16xf32>
    %72 = vector.extract_strided_slice %64 {offsets = [14, 0, 0], sizes = [2, 8, 16], strides = [1, 1, 1]} : vector<16x8x16xf32> to vector<2x8x16xf32>
    %73 = tpu.concatenate %65, %66, %67, %68, %69, %70, %71, %72 in 2 : vector<2x8x16xf32>, vector<2x8x16xf32>, vector<2x8x16xf32>, vector<2x8x16xf32>, vector<2x8x16xf32>, vector<2x8x16xf32>, vector<2x8x16xf32>, vector<2x8x16xf32> -> vector<2x8x128xf32>
    %74 = vector.shape_cast %73 : vector<2x8x128xf32> to vector<16x128xf32>
    %75 = arith.truncf %74 : vector<16x128xf32> to vector<16x128xbf16>
    %76 = arith.index_cast %arg1 : i32 to index
    %c0_13 = arith.constant 0 : index
    %c0_14 = arith.constant 0 : index
    %77 = vector.load %arg6[%76, %c0_13, %c0_14] : memref<2x128x128xbf16, #tpu.memory_space<vmem>>, vector<1x128x128xbf16>
    %78 = vector.shape_cast %77 : vector<1x128x128xbf16> to vector<128x128xbf16>
    %cst_15 = arith.constant dense<0.000000e+00> : vector<16x128xf32>
    %79 = tpu.matmul %75, %78, %cst_15 {dimension_numbers = #tpu.dot_dimension_numbers<[1], [0], [0], [1], [0, 0, 1, 1], [], []>} : vector<16x128xbf16>, vector<128x128xbf16>, vector<16x128xf32> -> vector<16x128xf32>
    %80 = arith.index_cast %arg1 : i32 to index
    %c0_16 = arith.constant 0 : index
    %c0_17 = arith.constant 0 : index
    %81 = vector.load %arg7[%80, %c0_16, %c0_17] : memref<2x1x128xf32, #tpu.memory_space<vmem>>, vector<1x1x128xf32>
    %82 = vector.shape_cast %81 : vector<1x1x128xf32> to vector<1x128xf32>
    %83 = vector.broadcast %82 : vector<1x128xf32> to vector<16x128xf32>
    %84 = arith.addf %79, %83 : vector<16x128xf32>
    %85 = arith.addf %3, %84 : vector<16x128xf32>
    %cst_18 = arith.constant dense<0.000000e+00> : vector<16xf32>
    %86 = vector.multi_reduction <add>, %85, %cst_18 [1] : vector<16x128xf32> to vector<16xf32>
    %87 = vector.shape_cast %86 : vector<16xf32> to vector<16x1xf32>
    %cst_19 = arith.constant 1.280000e+02 : f32
    %88 = vector.broadcast %cst_19 : f32 to vector<16x1xf32>
    %89 = arith.divf %87, %88 : vector<16x1xf32>
    %90 = vector.broadcast %89 : vector<16x1xf32> to vector<16x128xf32>
    %91 = arith.subf %85, %90 : vector<16x128xf32>
    %92 = arith.mulf %91, %91 : vector<16x128xf32>
    %cst_20 = arith.constant dense<0.000000e+00> : vector<16xf32>
    %93 = vector.multi_reduction <add>, %92, %cst_20 [1] : vector<16x128xf32> to vector<16xf32>
    %94 = vector.shape_cast %93 : vector<16xf32> to vector<16x1xf32>
    %cst_21 = arith.constant 1.280000e+02 : f32
    %95 = vector.broadcast %cst_21 : f32 to vector<16x1xf32>
    %96 = arith.divf %94, %95 : vector<16x1xf32>
    %97 = vector.broadcast %89 : vector<16x1xf32> to vector<16x128xf32>
    %98 = arith.subf %85, %97 : vector<16x128xf32>
    %cst_22 = arith.constant 9.99999974E-6 : f32
    %99 = vector.broadcast %cst_22 : f32 to vector<16x1xf32>
    %100 = arith.addf %96, %99 : vector<16x1xf32>
    %101 = math.rsqrt %100 : vector<16x1xf32>
    %102 = vector.broadcast %101 : vector<16x1xf32> to vector<16x128xf32>
    %103 = arith.mulf %98, %102 : vector<16x128xf32>
    %104 = arith.index_cast %arg1 : i32 to index
    %c0_23 = arith.constant 0 : index
    %c0_24 = arith.constant 0 : index
    %105 = vector.load %arg8[%104, %c0_23, %c0_24] : memref<2x1x128xf32, #tpu.memory_space<vmem>>, vector<1x1x128xf32>
    %106 = vector.shape_cast %105 : vector<1x1x128xf32> to vector<1x128xf32>
    %107 = vector.broadcast %106 : vector<1x128xf32> to vector<16x128xf32>
    %108 = arith.mulf %103, %107 : vector<16x128xf32>
    %109 = arith.index_cast %arg1 : i32 to index
    %c0_25 = arith.constant 0 : index
    %c0_26 = arith.constant 0 : index
    %110 = vector.load %arg9[%109, %c0_25, %c0_26] : memref<2x1x128xf32, #tpu.memory_space<vmem>>, vector<1x1x128xf32>
    %111 = vector.shape_cast %110 : vector<1x1x128xf32> to vector<1x128xf32>
    %112 = vector.broadcast %111 : vector<1x128xf32> to vector<16x128xf32>
    %113 = arith.addf %108, %112 : vector<16x128xf32>
    %114 = arith.truncf %113 : vector<16x128xf32> to vector<16x128xbf16>
    %115 = arith.index_cast %arg1 : i32 to index
    %c0_27 = arith.constant 0 : index
    %c0_28 = arith.constant 0 : index
    %116 = vector.load %arg10[%115, %c0_27, %c0_28] : memref<2x128x128xbf16, #tpu.memory_space<vmem>>, vector<1x128x128xbf16>
    %117 = vector.shape_cast %116 : vector<1x128x128xbf16> to vector<128x128xbf16>
    %cst_29 = arith.constant dense<0.000000e+00> : vector<16x128xf32>
    %118 = tpu.matmul %114, %117, %cst_29 {dimension_numbers = #tpu.dot_dimension_numbers<[1], [0], [0], [1], [0, 0, 1, 1], [], []>} : vector<16x128xbf16>, vector<128x128xbf16>, vector<16x128xf32> -> vector<16x128xf32>
    %119 = arith.index_cast %arg1 : i32 to index
    %c0_30 = arith.constant 0 : index
    %c0_31 = arith.constant 0 : index
    %120 = vector.load %arg11[%119, %c0_30, %c0_31] : memref<2x1x128xf32, #tpu.memory_space<vmem>>, vector<1x1x128xf32>
    %121 = vector.shape_cast %120 : vector<1x1x128xf32> to vector<1x128xf32>
    %122 = vector.broadcast %121 : vector<1x128xf32> to vector<16x128xf32>
    %123 = arith.addf %118, %122 : vector<16x128xf32>
    %124 = arith.truncf %5 : vector<16x128xf32> to vector<16x128xbf16>
    %125 = arith.index_cast %arg1 : i32 to index
    %c0_32 = arith.constant 0 : index
    %c0_33 = arith.constant 0 : index
    %126 = vector.load %arg12[%125, %c0_32, %c0_33] : memref<2x128x256xbf16, #tpu.memory_space<vmem>>, vector<1x128x256xbf16>
    %127 = vector.shape_cast %126 : vector<1x128x256xbf16> to vector<128x256xbf16>
    %cst_34 = arith.constant dense<0.000000e+00> : vector<16x256xf32>
    %128 = tpu.matmul %124, %127, %cst_34 {dimension_numbers = #tpu.dot_dimension_numbers<[1], [0], [0], [1], [0, 0, 1, 1], [], []>} : vector<16x128xbf16>, vector<128x256xbf16>, vector<16x256xf32> -> vector<16x256xf32>
    %129 = arith.index_cast %arg1 : i32 to index
    %c0_35 = arith.constant 0 : index
    %c0_36 = arith.constant 0 : index
    %130 = vector.load %arg13[%129, %c0_35, %c0_36] : memref<2x1x256xf32, #tpu.memory_space<vmem>>, vector<1x1x256xf32>
    %131 = vector.shape_cast %130 : vector<1x1x256xf32> to vector<1x256xf32>
    %132 = vector.broadcast %131 : vector<1x256xf32> to vector<16x256xf32>
    %133 = arith.addf %128, %132 : vector<16x256xf32>
    %134 = vector.extract_strided_slice %133 {offsets = [0, 0], sizes = [16, 128], strides = [1, 1]} : vector<16x256xf32> to vector<16x128xf32>
    %135 = vector.extract_strided_slice %133 {offsets = [0, 128], sizes = [16, 128], strides = [1, 1]} : vector<16x256xf32> to vector<16x128xf32>
    %136 = vector.shape_cast %123 : vector<16x128xf32> to vector<2x8x128xf32>
    %137 = vector.extract_strided_slice %136 {offsets = [0, 0, 0], sizes = [2, 8, 16], strides = [1, 1, 1]} : vector<2x8x128xf32> to vector<2x8x16xf32>
    %138 = vector.extract_strided_slice %136 {offsets = [0, 0, 16], sizes = [2, 8, 16], strides = [1, 1, 1]} : vector<2x8x128xf32> to vector<2x8x16xf32>
    %139 = vector.extract_strided_slice %136 {offsets = [0, 0, 32], sizes = [2, 8, 16], strides = [1, 1, 1]} : vector<2x8x128xf32> to vector<2x8x16xf32>
    %140 = vector.extract_strided_slice %136 {offsets = [0, 0, 48], sizes = [2, 8, 16], strides = [1, 1, 1]} : vector<2x8x128xf32> to vector<2x8x16xf32>
    %141 = vector.extract_strided_slice %136 {offsets = [0, 0, 64], sizes = [2, 8, 16], strides = [1, 1, 1]} : vector<2x8x128xf32> to vector<2x8x16xf32>
    %142 = vector.extract_strided_slice %136 {offsets = [0, 0, 80], sizes = [2, 8, 16], strides = [1, 1, 1]} : vector<2x8x128xf32> to vector<2x8x16xf32>
    %143 = vector.extract_strided_slice %136 {offsets = [0, 0, 96], sizes = [2, 8, 16], strides = [1, 1, 1]} : vector<2x8x128xf32> to vector<2x8x16xf32>
    %144 = vector.extract_strided_slice %136 {offsets = [0, 0, 112], sizes = [2, 8, 16], strides = [1, 1, 1]} : vector<2x8x128xf32> to vector<2x8x16xf32>
    %145 = tpu.concatenate %137, %138, %139, %140, %141, %142, %143, %144 in 0 : vector<2x8x16xf32>, vector<2x8x16xf32>, vector<2x8x16xf32>, vector<2x8x16xf32>, vector<2x8x16xf32>, vector<2x8x16xf32>, vector<2x8x16xf32>, vector<2x8x16xf32> -> vector<16x8x16xf32>
    %146 = arith.truncf %145 : vector<16x8x16xf32> to vector<16x8x16xbf16>
    %147 = vector.shape_cast %134 : vector<16x128xf32> to vector<2x8x128xf32>
    %148 = vector.extract_strided_slice %147 {offsets = [0, 0, 0], sizes = [2, 8, 16], strides = [1, 1, 1]} : vector<2x8x128xf32> to vector<2x8x16xf32>
    %149 = vector.extract_strided_slice %147 {offsets = [0, 0, 16], sizes = [2, 8, 16], strides = [1, 1, 1]} : vector<2x8x128xf32> to vector<2x8x16xf32>
    %150 = vector.extract_strided_slice %147 {offsets = [0, 0, 32], sizes = [2, 8, 16], strides = [1, 1, 1]} : vector<2x8x128xf32> to vector<2x8x16xf32>
    %151 = vector.extract_strided_slice %147 {offsets = [0, 0, 48], sizes = [2, 8, 16], strides = [1, 1, 1]} : vector<2x8x128xf32> to vector<2x8x16xf32>
    %152 = vector.extract_strided_slice %147 {offsets = [0, 0, 64], sizes = [2, 8, 16], strides = [1, 1, 1]} : vector<2x8x128xf32> to vector<2x8x16xf32>
    %153 = vector.extract_strided_slice %147 {offsets = [0, 0, 80], sizes = [2, 8, 16], strides = [1, 1, 1]} : vector<2x8x128xf32> to vector<2x8x16xf32>
    %154 = vector.extract_strided_slice %147 {offsets = [0, 0, 96], sizes = [2, 8, 16], strides = [1, 1, 1]} : vector<2x8x128xf32> to vector<2x8x16xf32>
    %155 = vector.extract_strided_slice %147 {offsets = [0, 0, 112], sizes = [2, 8, 16], strides = [1, 1, 1]} : vector<2x8x128xf32> to vector<2x8x16xf32>
    %156 = tpu.concatenate %148, %149, %150, %151, %152, %153, %154, %155 in 0 : vector<2x8x16xf32>, vector<2x8x16xf32>, vector<2x8x16xf32>, vector<2x8x16xf32>, vector<2x8x16xf32>, vector<2x8x16xf32>, vector<2x8x16xf32>, vector<2x8x16xf32> -> vector<16x8x16xf32>
    %157 = arith.truncf %156 : vector<16x8x16xf32> to vector<16x8x16xbf16>
    %158 = vector.shape_cast %135 : vector<16x128xf32> to vector<2x8x128xf32>
    %159 = vector.extract_strided_slice %158 {offsets = [0, 0, 0], sizes = [2, 8, 16], strides = [1, 1, 1]} : vector<2x8x128xf32> to vector<2x8x16xf32>
    %160 = vector.extract_strided_slice %158 {offsets = [0, 0, 16], sizes = [2, 8, 16], strides = [1, 1, 1]} : vector<2x8x128xf32> to vector<2x8x16xf32>
    %161 = vector.extract_strided_slice %158 {offsets = [0, 0, 32], sizes = [2, 8, 16], strides = [1, 1, 1]} : vector<2x8x128xf32> to vector<2x8x16xf32>
    %162 = vector.extract_strided_slice %158 {offsets = [0, 0, 48], sizes = [2, 8, 16], strides = [1, 1, 1]} : vector<2x8x128xf32> to vector<2x8x16xf32>
    %163 = vector.extract_strided_slice %158 {offsets = [0, 0, 64], sizes = [2, 8, 16], strides = [1, 1, 1]} : vector<2x8x128xf32> to vector<2x8x16xf32>
    %164 = vector.extract_strided_slice %158 {offsets = [0, 0, 80], sizes = [2, 8, 16], strides = [1, 1, 1]} : vector<2x8x128xf32> to vector<2x8x16xf32>
    %165 = vector.extract_strided_slice %158 {offsets = [0, 0, 96], sizes = [2, 8, 16], strides = [1, 1, 1]} : vector<2x8x128xf32> to vector<2x8x16xf32>
    %166 = vector.extract_strided_slice %158 {offsets = [0, 0, 112], sizes = [2, 8, 16], strides = [1, 1, 1]} : vector<2x8x128xf32> to vector<2x8x16xf32>
    %167 = tpu.concatenate %159, %160, %161, %162, %163, %164, %165, %166 in 0 : vector<2x8x16xf32>, vector<2x8x16xf32>, vector<2x8x16xf32>, vector<2x8x16xf32>, vector<2x8x16xf32>, vector<2x8x16xf32>, vector<2x8x16xf32>, vector<2x8x16xf32> -> vector<16x8x16xf32>
    %168 = arith.truncf %167 : vector<16x8x16xf32> to vector<16x8x16xbf16>
    "tpu.trace_start"() <{level = 10 : i32, message = "bld,bsd->bls"}> : () -> ()
    %cst_37 = arith.constant dense<0.000000e+00> : vector<16x8x8xf32>
    %169 = tpu.matmul %146, %157, %cst_37 {dimension_numbers = #tpu.dot_dimension_numbers<[2], [2], [1], [1], [0, 0, 0, 1, 1, 1], [0], [0]>} : vector<16x8x16xbf16>, vector<16x8x16xbf16>, vector<16x8x8xf32> -> vector<16x8x8xf32>
    "tpu.trace_stop"() : () -> ()
    %cst_38 = arith.constant dense<0xFF800000> : vector<16x8xf32>
    %170 = vector.multi_reduction <maximumf>, %169, %cst_38 [2] : vector<16x8x8xf32> to vector<16x8xf32>
    %171 = vector.shape_cast %170 : vector<16x8xf32> to vector<16x8x1xf32>
    %172 = vector.broadcast %171 : vector<16x8x1xf32> to vector<16x8x8xf32>
    %173 = arith.subf %169, %172 : vector<16x8x8xf32>
    %174 = math.exp %173 : vector<16x8x8xf32>
    %cst_39 = arith.constant dense<0.000000e+00> : vector<16x8xf32>
    %175 = vector.multi_reduction <add>, %174, %cst_39 [2] : vector<16x8x8xf32> to vector<16x8xf32>
    %176 = vector.shape_cast %175 : vector<16x8xf32> to vector<16x8x1xf32>
    %177 = tpu.reciprocal %176 {approx = true} : vector<16x8x1xf32> -> vector<16x8x1xf32>
    %178 = vector.broadcast %177 : vector<16x8x1xf32> to vector<16x8x8xf32>
    %179 = arith.mulf %174, %178 : vector<16x8x8xf32>
    %180 = arith.truncf %179 : vector<16x8x8xf32> to vector<16x8x8xbf16>
    "tpu.trace_start"() <{level = 10 : i32, message = "bls,bsd->bld"}> : () -> ()
    %cst_40 = arith.constant dense<0.000000e+00> : vector<16x8x16xf32>
    %181 = tpu.matmul %180, %168, %cst_40 {dimension_numbers = #tpu.dot_dimension_numbers<[2], [1], [1], [2], [0, 0, 0, 1, 1, 2], [0], [0]>} : vector<16x8x8xbf16>, vector<16x8x16xbf16>, vector<16x8x16xf32> -> vector<16x8x16xf32>
    "tpu.trace_stop"() : () -> ()
    %182 = vector.extract_strided_slice %181 {offsets = [0, 0, 0], sizes = [2, 8, 16], strides = [1, 1, 1]} : vector<16x8x16xf32> to vector<2x8x16xf32>
    %183 = vector.extract_strided_slice %181 {offsets = [2, 0, 0], sizes = [2, 8, 16], strides = [1, 1, 1]} : vector<16x8x16xf32> to vector<2x8x16xf32>
    %184 = vector.extract_strided_slice %181 {offsets = [4, 0, 0], sizes = [2, 8, 16], strides = [1, 1, 1]} : vector<16x8x16xf32> to vector<2x8x16xf32>
    %185 = vector.extract_strided_slice %181 {offsets = [6, 0, 0], sizes = [2, 8, 16], strides = [1, 1, 1]} : vector<16x8x16xf32> to vector<2x8x16xf32>
    %186 = vector.extract_strided_slice %181 {offsets = [8, 0, 0], sizes = [2, 8, 16], strides = [1, 1, 1]} : vector<16x8x16xf32> to vector<2x8x16xf32>
    %187 = vector.extract_strided_slice %181 {offsets = [10, 0, 0], sizes = [2, 8, 16], strides = [1, 1, 1]} : vector<16x8x16xf32> to vector<2x8x16xf32>
    %188 = vector.extract_strided_slice %181 {offsets = [12, 0, 0], sizes = [2, 8, 16], strides = [1, 1, 1]} : vector<16x8x16xf32> to vector<2x8x16xf32>
    %189 = vector.extract_strided_slice %181 {offsets = [14, 0, 0], sizes = [2, 8, 16], strides = [1, 1, 1]} : vector<16x8x16xf32> to vector<2x8x16xf32>
    %190 = tpu.concatenate %182, %183, %184, %185, %186, %187, %188, %189 in 2 : vector<2x8x16xf32>, vector<2x8x16xf32>, vector<2x8x16xf32>, vector<2x8x16xf32>, vector<2x8x16xf32>, vector<2x8x16xf32>, vector<2x8x16xf32>, vector<2x8x16xf32> -> vector<2x8x128xf32>
    %191 = vector.shape_cast %190 : vector<2x8x128xf32> to vector<16x128xf32>
    %192 = arith.truncf %191 : vector<16x128xf32> to vector<16x128xbf16>
    %193 = arith.index_cast %arg1 : i32 to index
    %c0_41 = arith.constant 0 : index
    %c0_42 = arith.constant 0 : index
    %194 = vector.load %arg14[%193, %c0_41, %c0_42] : memref<2x128x128xbf16, #tpu.memory_space<vmem>>, vector<1x128x128xbf16>
    %195 = vector.shape_cast %194 : vector<1x128x128xbf16> to vector<128x128xbf16>
    %cst_43 = arith.constant dense<0.000000e+00> : vector<16x128xf32>
    %196 = tpu.matmul %192, %195, %cst_43 {dimension_numbers = #tpu.dot_dimension_numbers<[1], [0], [0], [1], [0, 0, 1, 1], [], []>} : vector<16x128xbf16>, vector<128x128xbf16>, vector<16x128xf32> -> vector<16x128xf32>
    %197 = arith.index_cast %arg1 : i32 to index
    %c0_44 = arith.constant 0 : index
    %c0_45 = arith.constant 0 : index
    %198 = vector.load %arg15[%197, %c0_44, %c0_45] : memref<2x1x128xf32, #tpu.memory_space<vmem>>, vector<1x1x128xf32>
    %199 = vector.shape_cast %198 : vector<1x1x128xf32> to vector<1x128xf32>
    %200 = vector.broadcast %199 : vector<1x128xf32> to vector<16x128xf32>
    %201 = arith.addf %196, %200 : vector<16x128xf32>
    %202 = arith.addf %113, %201 : vector<16x128xf32>
    %cst_46 = arith.constant dense<0.000000e+00> : vector<16xf32>
    %203 = vector.multi_reduction <add>, %202, %cst_46 [1] : vector<16x128xf32> to vector<16xf32>
    %204 = vector.shape_cast %203 : vector<16xf32> to vector<16x1xf32>
    %cst_47 = arith.constant 1.280000e+02 : f32
    %205 = vector.broadcast %cst_47 : f32 to vector<16x1xf32>
    %206 = arith.divf %204, %205 : vector<16x1xf32>
    %207 = vector.broadcast %206 : vector<16x1xf32> to vector<16x128xf32>
    %208 = arith.subf %202, %207 : vector<16x128xf32>
    %209 = arith.mulf %208, %208 : vector<16x128xf32>
    %cst_48 = arith.constant dense<0.000000e+00> : vector<16xf32>
    %210 = vector.multi_reduction <add>, %209, %cst_48 [1] : vector<16x128xf32> to vector<16xf32>
    %211 = vector.shape_cast %210 : vector<16xf32> to vector<16x1xf32>
    %cst_49 = arith.constant 1.280000e+02 : f32
    %212 = vector.broadcast %cst_49 : f32 to vector<16x1xf32>
    %213 = arith.divf %211, %212 : vector<16x1xf32>
    %214 = vector.broadcast %206 : vector<16x1xf32> to vector<16x128xf32>
    %215 = arith.subf %202, %214 : vector<16x128xf32>
    %cst_50 = arith.constant 9.99999974E-6 : f32
    %216 = vector.broadcast %cst_50 : f32 to vector<16x1xf32>
    %217 = arith.addf %213, %216 : vector<16x1xf32>
    %218 = math.rsqrt %217 : vector<16x1xf32>
    %219 = vector.broadcast %218 : vector<16x1xf32> to vector<16x128xf32>
    %220 = arith.mulf %215, %219 : vector<16x128xf32>
    %221 = arith.index_cast %arg1 : i32 to index
    %c0_51 = arith.constant 0 : index
    %c0_52 = arith.constant 0 : index
    %222 = vector.load %arg16[%221, %c0_51, %c0_52] : memref<2x1x128xf32, #tpu.memory_space<vmem>>, vector<1x1x128xf32>
    %223 = vector.shape_cast %222 : vector<1x1x128xf32> to vector<1x128xf32>
    %224 = vector.broadcast %223 : vector<1x128xf32> to vector<16x128xf32>
    %225 = arith.mulf %220, %224 : vector<16x128xf32>
    %226 = arith.index_cast %arg1 : i32 to index
    %c0_53 = arith.constant 0 : index
    %c0_54 = arith.constant 0 : index
    %227 = vector.load %arg17[%226, %c0_53, %c0_54] : memref<2x1x128xf32, #tpu.memory_space<vmem>>, vector<1x1x128xf32>
    %228 = vector.shape_cast %227 : vector<1x1x128xf32> to vector<1x128xf32>
    %229 = vector.broadcast %228 : vector<1x128xf32> to vector<16x128xf32>
    %230 = arith.addf %225, %229 : vector<16x128xf32>
    %231 = arith.truncf %230 : vector<16x128xf32> to vector<16x128xbf16>
    %232 = arith.index_cast %arg1 : i32 to index
    %c0_55 = arith.constant 0 : index
    %c0_56 = arith.constant 0 : index
    %233 = vector.load %arg18[%232, %c0_55, %c0_56] : memref<2x128x256xbf16, #tpu.memory_space<vmem>>, vector<1x128x256xbf16>
    %234 = vector.shape_cast %233 : vector<1x128x256xbf16> to vector<128x256xbf16>
    %cst_57 = arith.constant dense<0.000000e+00> : vector<16x256xf32>
    %235 = tpu.matmul %231, %234, %cst_57 {dimension_numbers = #tpu.dot_dimension_numbers<[1], [0], [0], [1], [0, 0, 1, 1], [], []>} : vector<16x128xbf16>, vector<128x256xbf16>, vector<16x256xf32> -> vector<16x256xf32>
    %236 = arith.index_cast %arg1 : i32 to index
    %c0_58 = arith.constant 0 : index
    %c0_59 = arith.constant 0 : index
    %237 = vector.load %arg19[%236, %c0_58, %c0_59] : memref<2x1x256xf32, #tpu.memory_space<vmem>>, vector<1x1x256xf32>
    %238 = vector.shape_cast %237 : vector<1x1x256xf32> to vector<1x256xf32>
    %239 = vector.broadcast %238 : vector<1x256xf32> to vector<16x256xf32>
    %240 = arith.addf %235, %239 : vector<16x256xf32>
    %cst_60 = arith.constant 0.000000e+00 : f32
    %241 = vector.broadcast %cst_60 : f32 to vector<16x256xf32>
    %242 = arith.maximumf %240, %241 : vector<16x256xf32>
    %243 = arith.truncf %242 : vector<16x256xf32> to vector<16x256xbf16>
    %244 = arith.index_cast %arg1 : i32 to index
    %c0_61 = arith.constant 0 : index
    %c0_62 = arith.constant 0 : index
    %245 = vector.load %arg20[%244, %c0_61, %c0_62] : memref<2x256x128xbf16, #tpu.memory_space<vmem>>, vector<1x256x128xbf16>
    %246 = vector.shape_cast %245 : vector<1x256x128xbf16> to vector<256x128xbf16>
    %cst_63 = arith.constant dense<0.000000e+00> : vector<16x128xf32>
    %247 = tpu.matmul %243, %246, %cst_63 {dimension_numbers = #tpu.dot_dimension_numbers<[1], [0], [0], [1], [0, 0, 1, 1], [], []>} : vector<16x256xbf16>, vector<256x128xbf16>, vector<16x128xf32> -> vector<16x128xf32>
    %248 = arith.index_cast %arg1 : i32 to index
    %c0_64 = arith.constant 0 : index
    %c0_65 = arith.constant 0 : index
    %249 = vector.load %arg21[%248, %c0_64, %c0_65] : memref<2x1x128xf32, #tpu.memory_space<vmem>>, vector<1x1x128xf32>
    %250 = vector.shape_cast %249 : vector<1x1x128xf32> to vector<1x128xf32>
    %251 = vector.broadcast %250 : vector<1x128xf32> to vector<16x128xf32>
    %252 = arith.addf %247, %251 : vector<16x128xf32>
    %253 = arith.addf %230, %252 : vector<16x128xf32>
    %cst_66 = arith.constant dense<0.000000e+00> : vector<16xf32>
    %254 = vector.multi_reduction <add>, %253, %cst_66 [1] : vector<16x128xf32> to vector<16xf32>
    %255 = vector.shape_cast %254 : vector<16xf32> to vector<16x1xf32>
    %cst_67 = arith.constant 1.280000e+02 : f32
    %256 = vector.broadcast %cst_67 : f32 to vector<16x1xf32>
    %257 = arith.divf %255, %256 : vector<16x1xf32>
    %258 = vector.broadcast %257 : vector<16x1xf32> to vector<16x128xf32>
    %259 = arith.subf %253, %258 : vector<16x128xf32>
    %260 = arith.mulf %259, %259 : vector<16x128xf32>
    %cst_68 = arith.constant dense<0.000000e+00> : vector<16xf32>
    %261 = vector.multi_reduction <add>, %260, %cst_68 [1] : vector<16x128xf32> to vector<16xf32>
    %262 = vector.shape_cast %261 : vector<16xf32> to vector<16x1xf32>
    %cst_69 = arith.constant 1.280000e+02 : f32
    %263 = vector.broadcast %cst_69 : f32 to vector<16x1xf32>
    %264 = arith.divf %262, %263 : vector<16x1xf32>
    %265 = vector.broadcast %257 : vector<16x1xf32> to vector<16x128xf32>
    %266 = arith.subf %253, %265 : vector<16x128xf32>
    %cst_70 = arith.constant 9.99999974E-6 : f32
    %267 = vector.broadcast %cst_70 : f32 to vector<16x1xf32>
    %268 = arith.addf %264, %267 : vector<16x1xf32>
    %269 = math.rsqrt %268 : vector<16x1xf32>
    %270 = vector.broadcast %269 : vector<16x1xf32> to vector<16x128xf32>
    %271 = arith.mulf %266, %270 : vector<16x128xf32>
    %272 = arith.index_cast %arg1 : i32 to index
    %c0_71 = arith.constant 0 : index
    %c0_72 = arith.constant 0 : index
    %273 = vector.load %arg22[%272, %c0_71, %c0_72] : memref<2x1x128xf32, #tpu.memory_space<vmem>>, vector<1x1x128xf32>
    %274 = vector.shape_cast %273 : vector<1x1x128xf32> to vector<1x128xf32>
    %275 = vector.broadcast %274 : vector<1x128xf32> to vector<16x128xf32>
    %276 = arith.mulf %271, %275 : vector<16x128xf32>
    %277 = arith.index_cast %arg1 : i32 to index
    %c0_73 = arith.constant 0 : index
    %c0_74 = arith.constant 0 : index
    %278 = vector.load %arg23[%277, %c0_73, %c0_74] : memref<2x1x128xf32, #tpu.memory_space<vmem>>, vector<1x1x128xf32>
    %279 = vector.shape_cast %278 : vector<1x1x128xf32> to vector<1x128xf32>
    %280 = vector.broadcast %279 : vector<1x128xf32> to vector<16x128xf32>
    %281 = arith.addf %276, %280 : vector<16x128xf32>
    %c0_75 = arith.constant 0 : index
    %c0_76 = arith.constant 0 : index
    %282 = vector.load %arg25[%c0_75, %c0_76] : memref<16x128xf32, #tpu.memory_space<vmem>>, vector<16x128xf32>
    tpu.vector_store %arg25[%c0_75, %c0_76], %281 {strides = array<i32>} : memref<16x128xf32, #tpu.memory_space<vmem>>, vector<16x128xf32>,
    %c1_i32 = arith.constant 1 : i32
    %283 = arith.cmpi eq, %arg1, %c1_i32 : i32
    %284 = arith.extui %283 : i1 to i32
    %c0_i32_77 = arith.constant 0 : i32
    %285 = arith.cmpi ne, %284, %c0_i32_77 : i32
    scf.if %285 {
      %286 = vector.shape_cast %281 : vector<16x128xf32> to vector<2x8x128xf32>
      %c0_78 = arith.constant 0 : index
      %c0_79 = arith.constant 0 : index
      %c0_80 = arith.constant 0 : index
      %287 = vector.load %arg24[%c0_78, %c0_79, %c0_80] : memref<2x8x128xf32, #tpu.memory_space<vmem>>, vector<2x8x128xf32>
      tpu.vector_store %arg24[%c0_78, %c0_79, %c0_80], %286 {strides = array<i32>} : memref<2x8x128xf32, #tpu.memory_space<vmem>>, vector<2x8x128xf32>,
    } else {
    }
    return
  }
  func.func @transform_0(%arg0: i32, %arg1: i32) -> (i32, i32, i32) {
    %c0_i32 = arith.constant 0 : i32
    %c0_i32_0 = arith.constant 0 : i32
    %c0_i32_1 = arith.constant 0 : i32
    return %arg0, %c0_i32, %c0_i32_0 : i32, i32, i32
  }
  func.func @transform_1(%arg0: i32, %arg1: i32) -> (i32, i32, i32) {
    %c0_i32 = arith.constant 0 : i32
    %c0_i32_0 = arith.constant 0 : i32
    %c0_i32_1 = arith.constant 0 : i32
    return %arg0, %c0_i32, %c0_i32_0 : i32, i32, i32
  }
  func.func @transform_2(%arg0: i32, %arg1: i32) -> (i32, i32, i32) {
    %c0_i32 = arith.constant 0 : i32
    %c0_i32_0 = arith.constant 0 : i32
    %c0_i32_1 = arith.constant 0 : i32
    %c0_i32_2 = arith.constant 0 : i32
    return %c0_i32, %c0_i32_0, %c0_i32_1 : i32, i32, i32
  }
  func.func @transform_3(%arg0: i32, %arg1: i32) -> (i32, i32, i32) {
    %c0_i32 = arith.constant 0 : i32
    %c0_i32_0 = arith.constant 0 : i32
    %c0_i32_1 = arith.constant 0 : i32
    %c0_i32_2 = arith.constant 0 : i32
    return %c0_i32, %c0_i32_0, %c0_i32_1 : i32, i32, i32
  }
  func.func @transform_4(%arg0: i32, %arg1: i32) -> (i32, i32, i32) {
    %c0_i32 = arith.constant 0 : i32
    %c0_i32_0 = arith.constant 0 : i32
    %c0_i32_1 = arith.constant 0 : i32
    %c0_i32_2 = arith.constant 0 : i32
    return %c0_i32, %c0_i32_0, %c0_i32_1 : i32, i32, i32
  }
  func.func @transform_5(%arg0: i32, %arg1: i32) -> (i32, i32, i32) {
    %c0_i32 = arith.constant 0 : i32
    %c0_i32_0 = arith.constant 0 : i32
    %c0_i32_1 = arith.constant 0 : i32
    %c0_i32_2 = arith.constant 0 : i32
    return %c0_i32, %c0_i32_0, %c0_i32_1 : i32, i32, i32
  }
  func.func @transform_6(%arg0: i32, %arg1: i32) -> (i32, i32, i32) {
    %c0_i32 = arith.constant 0 : i32
    %c0_i32_0 = arith.constant 0 : i32
    %c0_i32_1 = arith.constant 0 : i32
    %c0_i32_2 = arith.constant 0 : i32
    return %c0_i32, %c0_i32_0, %c0_i32_1 : i32, i32, i32
  }
  func.func @transform_7(%arg0: i32, %arg1: i32) -> (i32, i32, i32) {
    %c0_i32 = arith.constant 0 : i32
    %c0_i32_0 = arith.constant 0 : i32
    %c0_i32_1 = arith.constant 0 : i32
    %c0_i32_2 = arith.constant 0 : i32
    return %c0_i32, %c0_i32_0, %c0_i32_1 : i32, i32, i32
  }
  func.func @transform_8(%arg0: i32, %arg1: i32) -> (i32, i32, i32) {
    %c0_i32 = arith.constant 0 : i32
    %c0_i32_0 = arith.constant 0 : i32
    %c0_i32_1 = arith.constant 0 : i32
    %c0_i32_2 = arith.constant 0 : i32
    return %c0_i32, %c0_i32_0, %c0_i32_1 : i32, i32, i32
  }
  func.func @transform_9(%arg0: i32, %arg1: i32) -> (i32, i32, i32) {
    %c0_i32 = arith.constant 0 : i32
    %c0_i32_0 = arith.constant 0 : i32
    %c0_i32_1 = arith.constant 0 : i32
    %c0_i32_2 = arith.constant 0 : i32
    return %c0_i32, %c0_i32_0, %c0_i32_1 : i32, i32, i32
  }
  func.func @transform_10(%arg0: i32, %arg1: i32) -> (i32, i32, i32) {
    %c0_i32 = arith.constant 0 : i32
    %c0_i32_0 = arith.constant 0 : i32
    %c0_i32_1 = arith.constant 0 : i32
    %c0_i32_2 = arith.constant 0 : i32
    return %c0_i32, %c0_i32_0, %c0_i32_1 : i32, i32, i32
  }
  func.func @transform_11(%arg0: i32, %arg1: i32) -> (i32, i32, i32) {
    %c0_i32 = arith.constant 0 : i32
    %c0_i32_0 = arith.constant 0 : i32
    %c0_i32_1 = arith.constant 0 : i32
    %c0_i32_2 = arith.constant 0 : i32
    return %c0_i32, %c0_i32_0, %c0_i32_1 : i32, i32, i32
  }
  func.func @transform_12(%arg0: i32, %arg1: i32) -> (i32, i32, i32) {
    %c0_i32 = arith.constant 0 : i32
    %c0_i32_0 = arith.constant 0 : i32
    %c0_i32_1 = arith.constant 0 : i32
    %c0_i32_2 = arith.constant 0 : i32
    return %c0_i32, %c0_i32_0, %c0_i32_1 : i32, i32, i32
  }
  func.func @transform_13(%arg0: i32, %arg1: i32) -> (i32, i32, i32) {
    %c0_i32 = arith.constant 0 : i32
    %c0_i32_0 = arith.constant 0 : i32
    %c0_i32_1 = arith.constant 0 : i32
    %c0_i32_2 = arith.constant 0 : i32
    return %c0_i32, %c0_i32_0, %c0_i32_1 : i32, i32, i32
  }
  func.func @transform_14(%arg0: i32, %arg1: i32) -> (i32, i32, i32) {
    %c0_i32 = arith.constant 0 : i32
    %c0_i32_0 = arith.constant 0 : i32
    %c0_i32_1 = arith.constant 0 : i32
    %c0_i32_2 = arith.constant 0 : i32
    return %c0_i32, %c0_i32_0, %c0_i32_1 : i32, i32, i32
  }
  func.func @transform_15(%arg0: i32, %arg1: i32) -> (i32, i32, i32) {
    %c0_i32 = arith.constant 0 : i32
    %c0_i32_0 = arith.constant 0 : i32
    %c0_i32_1 = arith.constant 0 : i32
    %c0_i32_2 = arith.constant 0 : i32
    return %c0_i32, %c0_i32_0, %c0_i32_1 : i32, i32, i32
  }
  func.func @transform_16(%arg0: i32, %arg1: i32) -> (i32, i32, i32) {
    %c0_i32 = arith.constant 0 : i32
    %c0_i32_0 = arith.constant 0 : i32
    %c0_i32_1 = arith.constant 0 : i32
    %c0_i32_2 = arith.constant 0 : i32
    return %c0_i32, %c0_i32_0, %c0_i32_1 : i32, i32, i32
  }
  func.func @transform_17(%arg0: i32, %arg1: i32) -> (i32, i32, i32) {
    %c0_i32 = arith.constant 0 : i32
    %c0_i32_0 = arith.constant 0 : i32
    %c0_i32_1 = arith.constant 0 : i32
    %c0_i32_2 = arith.constant 0 : i32
    return %c0_i32, %c0_i32_0, %c0_i32_1 : i32, i32, i32
  }
  func.func @transform_18(%arg0: i32, %arg1: i32) -> (i32, i32, i32) {
    %c0_i32 = arith.constant 0 : i32
    %c0_i32_0 = arith.constant 0 : i32
    %c0_i32_1 = arith.constant 0 : i32
    %c0_i32_2 = arith.constant 0 : i32
    return %c0_i32, %c0_i32_0, %c0_i32_1 : i32, i32, i32
  }
  func.func @transform_19(%arg0: i32, %arg1: i32) -> (i32, i32, i32) {
    %c0_i32 = arith.constant 0 : i32
    %c0_i32_0 = arith.constant 0 : i32
    %c0_i32_1 = arith.constant 0 : i32
    %c0_i32_2 = arith.constant 0 : i32
    return %c0_i32, %c0_i32_0, %c0_i32_1 : i32, i32, i32
  }
  func.func @transform_20(%arg0: i32, %arg1: i32) -> (i32, i32, i32) {
    %c0_i32 = arith.constant 0 : i32
    %c0_i32_0 = arith.constant 0 : i32
    %c0_i32_1 = arith.constant 0 : i32
    %c0_i32_2 = arith.constant 0 : i32
    return %c0_i32, %c0_i32_0, %c0_i32_1 : i32, i32, i32
  }
  func.func @transform_21(%arg0: i32, %arg1: i32) -> (i32, i32, i32) {
    %c0_i32 = arith.constant 0 : i32
    %c0_i32_0 = arith.constant 0 : i32
    %c0_i32_1 = arith.constant 0 : i32
    %c0_i32_2 = arith.constant 0 : i32
    return %c0_i32, %c0_i32_0, %c0_i32_1 : i32, i32, i32
  }
  func.func @transform_22(%arg0: i32, %arg1: i32) -> (i32, i32, i32) {
    %c0_i32 = arith.constant 0 : i32
    %c0_i32_0 = arith.constant 0 : i32
    %c0_i32_1 = arith.constant 0 : i32
    return %arg0, %c0_i32, %c0_i32_0 : i32, i32, i32
  }
}

</mosaic_0001>

<bundles_post_ra>
// kernel: decoder_forward.1
= control target key start
LH: loop header
LB: loop body
LE: loop exit
PB: predicated region body
PF: predicated region fallthrough
CT: control target
= control target key end

     0   :  { %s10340_s0 = inlined_call_operand.vmem [shape: f32[4,8,128], index: 0, kind: input, shape index: {}]   ;;  %s10341_s1 = inlined_call_operand.hbm [shape: f32[4,8,128], index: 1, kind: input, shape index: {}]   ;;  %s10342_s2 = inlined_call_operand.hbm [shape: bf16[2,128,384], index: 2, kind: input, shape index: {}]   ;;  %s10343_s3 = inlined_call_operand.hbm [shape: f32[2,1,384], index: 3, kind: input, shape index: {}]   ;;  %s10344_s4 = inlined_call_operand.hbm [shape: bf16[2,128,128], index: 4, kind: input, shape index: {}]   ;;  %s10345_s5 = inlined_call_operand.vmem [shape: f32[2,1,128], index: 5, kind: input, shape index: {}]   ;;  %s10346_s6 = inlined_call_operand.vmem [shape: f32[2,1,128], index: 6, kind: input, shape index: {}]   ;;  %s10347_s7 = inlined_call_operand.hbm [shape: f32[2,1,128], index: 7, kind: input, shape index: {}]   ;;  %s10348_s8 = inlined_call_operand.hbm [shape: bf16[2,128,128], index: 8, kind: input, shape index: {}]   ;;  %s10349_s9 = inlined_call_operand.hbm [shape: f32[2,1,128], index: 9, kind: input, shape index: {}]   ;;  %s10350_s10 = inlined_call_operand.hbm [shape: bf16[2,128,256], index: 10, kind: input, shape index: {}]   ;;  %s10351_s11 = inlined_call_operand.hbm [shape: f32[2,1,256], index: 11, kind: input, shape index: {}]   ;;  %s10352_s12 = inlined_call_operand.hbm [shape: bf16[2,128,128], index: 12, kind: input, shape index: {}]   ;;  %s10353_s13 = inlined_call_operand.hbm [shape: f32[2,1,128], index: 13, kind: input, shape index: {}]   ;;  %s10354_s14 = inlined_call_operand.hbm [shape: f32[2,1,128], index: 14, kind: input, shape index: {}]   ;;  %s10355_s15 = inlined_call_operand.hbm [shape: f32[2,1,128], index: 15, kind: input, shape index: {}]   ;;  %s10356_s16 = inlined_call_operand.hbm [shape: bf16[2,128,256], index: 16, kind: input, shape index: {}]   ;;  %s10357_s17 = inlined_call_operand.hbm [shape: f32[2,1,256], index: 17, kind: input, shape index: {}]   ;;  %s10358_s18 = inlined_call_operand.hbm [shape: bf16[2,256,128], index: 18, kind: input, shape index: {}]   ;;  %s10359_s19 = inlined_call_operand.hbm [shape: f32[2,1,128], index: 19, kind: input, shape index: {}]   ;;  %s10360_s20 = inlined_call_operand.hbm [shape: f32[2,1,128], index: 20, kind: input, shape index: {}]   ;;  %s10361_s21 = inlined_call_operand.hbm [shape: f32[2,1,128], index: 21, kind: input, shape index: {}]   ;;  %s10362_s22 = inlined_call_operand.hbm [shape: f32[4,8,128], index: 22, kind: output, shape index: {}]  }
   0x1   :  { %10382 = sst [smem:[#allocation52_spill]] %s10340_s0 }
   0x2   :  { %10383 = sst [smem:[#allocation53_spill]] %s10341_s1 }
   0x3   :  { %10384 = sst [smem:[#allocation54_spill]] %s10342_s2 }
   0x4   :  { %10385 = sst [smem:[#allocation55_spill]] %s10343_s3 }
   0x5   :  { %10386 = sst [smem:[#allocation56_spill]] %s10344_s4 }
   0x6   :  { %10387 = sst [smem:[#allocation57_spill]] %s10345_s5 }
   0x7   :  { %10388 = sst [smem:[#allocation58_spill]] %s10346_s6 }
   0x8   :  { %10389 = sst [smem:[#allocation59_spill]] %s10347_s7 }
   0x9   :  { %10390 = sst [smem:[#allocation60_spill]] %s10348_s8 }
   0xa   :  { %10391 = sst [smem:[#allocation61_spill]] %s10349_s9 }
   0xb   :  { %10392 = sst [smem:[#allocation62_spill]] %s10350_s10 }
   0xc   :  { %10393 = sst [smem:[#allocation63_spill]] %s10351_s11 }
   0xd   :  { %10394 = sst [smem:[#allocation64_spill]] %s10352_s12 }
   0xe   :  { %10395 = sst [smem:[#allocation65_spill]] %s10353_s13 }
   0xf   :  { %10396 = sst [smem:[#allocation66_spill]] %s10354_s14 }
  0x10   :  { %10397 = sst [smem:[#allocation67_spill]] %s10355_s15 }
  0x11   :  { %10398 = sst [smem:[#allocation68_spill]] %s10356_s16 }
  0x12   :  { %10399 = sst [smem:[#allocation69_spill]] %s10362_s22 }
  0x13   :  { %27 = vsyncpa [#allocation4], 0 }
  0x14   :  { %29 = vsyncpa [#allocation4 + $0x1], 0 }
  0x15   :  { %30 = vsyncpa [#allocation7], 0 }
  0x16   :  { %31 = vsyncpa [#allocation10], 0 }
  0x17   :  { %32 = vsyncpa [#allocation13], 0 }
  0x18   :  { %33 = vsyncpa [#allocation16], 0 }
  0x19   :  { %34 = vsyncpa [#allocation19], 0 }
  0x1a   :  { %35 = vsyncpa [#allocation22], 0 }
  0x1b   :  { %36 = vsyncpa [#allocation25], 0 }
  0x1c   :  { %37 = vsyncpa [#allocation28], 0 }
  0x1d   :  { %38 = vsyncpa [#allocation31], 0 }
  0x1e   :  { %39 = vsyncpa [#allocation5], 0 }
  0x1f   :  { %41 = vsyncpa [#allocation5 + $0x1], 0  ;;  %s8912_s3 = smov 0   ;;  %s8914_s28 = smov 0  }
  0x20   :  { %s8916_s29 = smov 0   ;;  %s8918_s30 = smov 0  }
  0x21   :  { %s8920_s4 = smov 0   ;;  %s8922_s0 = smov 0  }
  0x22   :  { %s8924_s23 = smov 0   ;;  %s8926_s1 = smov 0  }
  0x23 LB: > { %10400 = sst [smem:[#allocation45_spill]] %s8723_s3  ;;  %s10363_s5 = sadd.s32 4294967295, %s8751_s1   ;;  %s8751_s1 = sphi %s8926_s1, %s47_s1   ;;  %s8747_s23 = sphi %s8924_s23, %s10460_s23   ;;  %s8743_s0 = sphi %s8922_s0, %s10459_s0   ;;  %s8739_s4 = sphi %s8920_s4, %s10458_s4   ;;  %s8735_s30 = sphi %s8918_s30, %s10457_s30   ;;  %s8731_s29 = sphi %s8916_s29, %s10456_s29   ;;  %s8727_s28 = sphi %s8914_s28, %s10455_s28   ;;  %s8723_s3 = sphi %s8912_s3, %s10454_s3  }
  0x24   : > { %10401 = sst [smem:[#allocation46_spill]] %s8727_s28  ;;  %p6416_p0 = scmp.ge.s32.totalorder %s8751_s1, 1 }
  0x25   : > { %10402 = sst [smem:[#allocation47_spill]] %s8731_s29  ;;  %p8956_p1 = scmp.eq.s32.totalorder %s10363_s5, 0 }
  0x26   : > { %10403 = sst [smem:[#allocation48_spill]] %s8735_s30  ;;  %p562_p2 = scmp.lt.s32.totalorder %s8751_s1, 5 }
  0x27   : > { %10404 = sst [smem:[#allocation49_spill]] %s8739_s4  ;;  %s8753_s25 = smov [#allocation6]  }
  0x28   : > { %s10405_s24 = scalar_select %p8956_p1, 1, 0 }
  0x29   : > { %p8961_p3 = pnand %p6416_p0, %p562_p2  ;;  %s574_s26 = sshll.u32 %s8753_s25, 4  ;;  %s575_s26 = int_to_ptr.vmem [resolvable:$true] %s574_s26 }
  0x2a   : > { %10406 = sst [smem:[#allocation50_spill]] %s10405_s24  ;;  %s8754_s27 = smov [#allocation9]  }
  0x2b   : > { %s10407_s6 = scalar_select %p8961_p3, 1, 0 }
  0x2c   : > { %p7384_p4 = pneg %p8961_p3  ;;  %s600_s5 = sshll.u32 %s8754_s27, 4  ;;  %s601_s5 = int_to_ptr.vmem [resolvable:$true] %s600_s5 }
  0x2d   : > { %10408 = sst [smem:[#allocation51_spill]] %s10407_s6  ;;  %s8134_s30 = scalar_lea.vmem %s575_s26, 6144 }
  0x2e   : > { %p8969_p5 = pnand %p7384_p4, %p8956_p1  ;;  %p8135_p7 = scmp.ne.s32.totalorder %s575_s26, %s8134_s30 }
  0x2f   : > { %p8142_p10 = scmp.lt.s32.totalorder %s575_s26, %s575_s26  ;;  %p8143_p11 = scmp.lt.s32.totalorder %s8134_s30, %s8134_s30 }
  0x30   : > { %p8975_p6 = pneg %p8969_p5 }
  0x31   : > { %p8144_p12 = por %p8143_p11, %p8142_p10 }
  0x32   : > { %p8137_p8 = pnand %p8135_p7, %p8975_p6 }
  0x34   : > { %p8138_p9 = pneg %p8137_p8 }
  0x36   : > { %p8145_p13 = pnand %p8144_p12, %p8138_p9 }
  0x38   : > { %8148 = shalt.err (!%p8145_p13)
}
  0x39   : > { %s8755_s25 = smov 192   ;;  %s8756_s27 = smov 12  }
  0x3a   : > { %s10411_s24 = sld [smem:[#allocation54_spill]]  ;;  %s8160_s3 = scalar_lea.vmem %s601_s5, 2048 }
  0x3b   : > { %p8161_p0 = scmp.ne.s32.totalorder %s601_s5, %s8160_s3  ;;  %p8168_p7 = scmp.lt.s32.totalorder %s601_s5, %s601_s5 }
  0x3c   : > { %p8169_p8 = scmp.lt.s32.totalorder %s8160_s3, %s8160_s3 }
  0x3d   : > { %p8163_p2 = pnand %p8161_p0, %p8975_p6 }
  0x3e   : > { %p8170_p3 = por %p8169_p8, %p8168_p7 }
  0x3f   : > { %p8164_p4 = pneg %p8163_p2 }
  0x40   : > { %7387 = dma.hbm_to_vmem [thread:$0]  (!%p8969_p5), %s10411_s24, 6144, %s575_s26, [#allocation7], %s8755_s25, %s8755_s25, %s8756_s27  }
  0x41   : > { %p8171_p10 = pnand %p8170_p3, %p8164_p4 }
  0x43   : > { %8174 = shalt.err (!%p8171_p10)
}
  0x44   : > { %s10376_s30 = smov 64   ;;  %s10377_s28 = smov 4  }
  0x45   : > { %s10412_s6 = sld [smem:[#allocation56_spill]]  ;;  %s8759_s26 = smov [#allocation12]  }
  0x46   : > { %s632_s25 = sshll.u32 %s8759_s26, 4  ;;  %s8760_s27 = smov [#allocation15]   ;;  %s633_s25 = int_to_ptr.vmem [resolvable:$true] %s632_s25 }
  0x47   : > { %s658_s29 = sshll.u32 %s8760_s27, 4  ;;  %s8186_s3 = scalar_lea.vmem %s633_s25, 2048  ;;  %s659_s29 = int_to_ptr.vmem [resolvable:$true] %s658_s29 }
  0x48   : > { %p8187_p3 = scmp.ne.s32.totalorder %s633_s25, %s8186_s3  ;;  %p8194_p12 = scmp.lt.s32.totalorder %s633_s25, %s633_s25 }
  0x49   : > { %p8195_p13 = scmp.lt.s32.totalorder %s8186_s3, %s8186_s3 }
  0x4a   : > { %p8189_p9 = pnand %p8187_p3, %p8975_p6 }
  0x4b   : > { %7393 = dma.hbm_to_vmem [thread:$0]  (!%p8969_p5), %s10412_s6, 2048, %s601_s5, [#allocation10], %s10376_s30, %s10376_s30, %s10377_s28  }
  0x4c   : > { %p8190_p11 = pneg %p8189_p9  ;;  %p8196_p0 = por %p8195_p13, %p8194_p12 }
  0x4e   : > { %p8197_p2 = pnand %p8196_p0, %p8190_p11 }
  0x50   : > { %8200 = shalt.err (!%p8197_p2)
}
  0x51   : > { %s10413_s8 = sld [smem:[#allocation60_spill]]  ;;  %s8212_s24 = scalar_lea.vmem %s659_s29, 4096 }
  0x52   : > { %p8213_p4 = scmp.ne.s32.totalorder %s659_s29, %s8212_s24  ;;  %p8220_p10 = scmp.lt.s32.totalorder %s659_s29, %s659_s29 }
  0x53   : > { %p8221_p3 = scmp.lt.s32.totalorder %s8212_s24, %s8212_s24 }
  0x54   : > { %p8215_p7 = pnand %p8213_p4, %p8975_p6 }
  0x55   : > { %p8222_p9 = por %p8221_p3, %p8220_p10 }
  0x56   : > { %p8216_p8 = pneg %p8215_p7 }
  0x57   : > { %7399 = dma.hbm_to_vmem [thread:$0]  (!%p8969_p5), %s10413_s8, 2048, %s633_s25, [#allocation13], %s10376_s30, %s10376_s30, %s10377_s28  }
  0x58   : > { %p8223_p11 = pnand %p8222_p9, %p8216_p8 }
  0x5a   : > { %8226 = shalt.err (!%p8223_p11)
}
  0x5b   : > { %s10372_s6 = smov 128   ;;  %s10374_s26 = smov 8  }
  0x5c   : > { %s10414_s10 = sld [smem:[#allocation62_spill]]  ;;  %s8763_s3 = smov [#allocation18]  }
  0x5d   : > { %s684_s5 = sshll.u32 %s8763_s3, 4  ;;  %s685_s5 = int_to_ptr.vmem [resolvable:$true] %s684_s5 }
  0x5e   : > { %s8238_s4 = scalar_lea.vmem %s685_s5, 2048  ;;  %p8246_p2 = scmp.lt.s32.totalorder %s685_s5, %s685_s5 }
  0x5f   : > { %p8239_p12 = scmp.ne.s32.totalorder %s685_s5, %s8238_s4  ;;  %p8247_p4 = scmp.lt.s32.totalorder %s8238_s4, %s8238_s4 }
  0x61   : > { %p8241_p13 = pnand %p8239_p12, %p8975_p6  ;;  %p8248_p7 = por %p8247_p4, %p8246_p2 }
  0x62   : > { %7405 = dma.hbm_to_vmem [thread:$0]  (!%p8969_p5), %s10414_s10, 4096, %s659_s29, [#allocation16], %s10372_s6, %s10372_s6, %s10374_s26  }
  0x63   : > { %p8242_p0 = pneg %p8241_p13 }
  0x65   : > { %p8249_p8 = pnand %p8248_p7, %p8242_p0 }
  0x67   : > { %8252 = shalt.err (!%p8249_p8)
}
  0x68   : > { %s10415_s12 = sld [smem:[#allocation64_spill]]  ;;  %s8764_s27 = smov [#allocation21]  }
  0x69   : > { %s710_s25 = sshll.u32 %s8764_s27, 4  ;;  %s8765_s3 = smov [#allocation24]   ;;  %s711_s25 = int_to_ptr.vmem [resolvable:$true] %s710_s25 }
  0x6a   : > { %s736_s6 = sshll.u32 %s8765_s3, 4  ;;  %s8264_s26 = scalar_lea.vmem %s711_s25, 32  ;;  %s737_s6 = int_to_ptr.vmem [resolvable:$true] %s736_s6 }
  0x6b   : > { %p8265_p10 = scmp.ne.s32.totalorder %s711_s25, %s8264_s26  ;;  %p8272_p11 = scmp.lt.s32.totalorder %s711_s25, %s711_s25 }
  0x6c   : > { %p8273_p12 = scmp.lt.s32.totalorder %s8264_s26, %s8264_s26 }
  0x6d   : > { %p8267_p3 = pnand %p8265_p10, %p8975_p6 }
  0x6e   : > { %7411 = dma.hbm_to_vmem [thread:$0]  (!%p8969_p5), %s10415_s12, 2048, %s685_s5, [#allocation19], %s10376_s30, %s10376_s30, %s10377_s28  }
  0x6f   : > { %p8268_p9 = pneg %p8267_p3  ;;  %p8274_p13 = por %p8273_p12, %p8272_p11 }
  0x71   : > { %p8275_p0 = pnand %p8274_p13, %p8268_p9 }
  0x73   : > { %8278 = shalt.err (!%p8275_p0)
}
  0x74   : > { %s10378_s4 = smov 16   ;;  %s10380_s24 = smov 1  }
  0x75   : > { %s10416_s14 = sld [smem:[#allocation66_spill]]  ;;  %s8290_s27 = scalar_lea.vmem %s737_s6, 4096 }
  0x76   : > { %p8291_p2 = scmp.ne.s32.totalorder %s737_s6, %s8290_s27  ;;  %p8298_p8 = scmp.lt.s32.totalorder %s737_s6, %s737_s6 }
  0x77   : > { %p8299_p10 = scmp.lt.s32.totalorder %s8290_s27, %s8290_s27 }
  0x78   : > { %p8293_p4 = pnand %p8291_p2, %p8975_p6 }
  0x79   : > { %p8300_p3 = por %p8299_p10, %p8298_p8 }
  0x7a   : > { %p8294_p7 = pneg %p8293_p4 }
  0x7b   : > { %7417 = dma.hbm_to_vmem [thread:$0]  (!%p8969_p5), %s10416_s14, 32, %s711_s25, [#allocation22], %s10378_s4, %s10378_s4, %s10380_s24  }
  0x7c   : > { %p8301_p9 = pnand %p8300_p3, %p8294_p7 }
  0x7e   : > { %8304 = shalt.err (!%p8301_p9)
}
  0x7f   : > { %s10417_s26 = smov 8   ;;  %s10418_s3 = smov 128  }
  0x80   : > { %s10419_s16 = sld [smem:[#allocation68_spill]]  ;;  %s8768_s25 = smov [#allocation27]  }
  0x81   : > { %s762_s5 = sshll.u32 %s8768_s25, 4  ;;  %s8769_s29 = smov [#allocation30]   ;;  %s763_s5 = int_to_ptr.vmem [resolvable:$true] %s762_s5 }
  0x82   : > { %s788_s4 = sshll.u32 %s8769_s29, 4  ;;  %s8316_s24 = scalar_lea.vmem %s763_s5, 4096  ;;  %s789_s4 = int_to_ptr.vmem [resolvable:$true] %s788_s4 }
  0x83   : > { %p8317_p11 = scmp.ne.s32.totalorder %s763_s5, %s8316_s24  ;;  %p8324_p0 = scmp.lt.s32.totalorder %s763_s5, %s763_s5 }
  0x84   : > { %p8325_p2 = scmp.lt.s32.totalorder %s8316_s24, %s8316_s24 }
  0x85   : > { %p8319_p12 = pnand %p8317_p11, %p8975_p6 }
  0x86   : > { %7423 = dma.hbm_to_vmem [thread:$0]  (!%p8969_p5), %s10419_s16, 4096, %s737_s6, [#allocation25], %s10418_s3, %s10418_s3, %s10417_s26  }
  0x87   : > { %p8320_p13 = pneg %p8319_p12  ;;  %p8326_p4 = por %p8325_p2, %p8324_p0 }
  0x89   : > { %p8327_p7 = pnand %p8326_p4, %p8320_p13 }
  0x8b   : > { %8330 = shalt.err (!%p8327_p7)
}
  0x8c   : > { %s10420_s28 = smov 4   ;;  %s10421_s30 = smov 64  }
  0x8d   : > { %7429 = dma.hbm_to_vmem [thread:$0]  (!%p8969_p5), %s10358_s18, 4096, %s763_s5, [#allocation28], %s10421_s30, %s10421_s30, %s10420_s28  }
  0x8e   : > { %s8342_s25 = scalar_lea.vmem %s789_s4, 32  ;;  %p8350_p9 = scmp.lt.s32.totalorder %s789_s4, %s789_s4 }
  0x8f   : > { %p8343_p8 = scmp.ne.s32.totalorder %s789_s4, %s8342_s25  ;;  %p8351_p11 = scmp.lt.s32.totalorder %s8342_s25, %s8342_s25 }
  0x91   : > { %p8345_p10 = pnand %p8343_p8, %p8975_p6  ;;  %p8352_p12 = por %p8351_p11, %p8350_p9 }
  0x93   : > { %p8346_p3 = pneg %p8345_p10 }
  0x95   : > { %p8353_p13 = pnand %p8352_p12, %p8346_p3 }
  0x97   : > { %8356 = shalt.err (!%p8353_p13)
}
  0x98   : > { %s10422_s24 = smov 1   ;;  %s10423_s29 = smov 16  }
  0x99   : > { %7435 = dma.hbm_to_vmem [thread:$0]  (!%p8969_p5), %s10360_s20, 32, %s789_s4, [#allocation31], %s10423_s29, %s10423_s29, %s10422_s24  }
  0x9a   : > { %s8770_s5 = smov [#allocation8]  }
  0x9b   : > { %s587_s28 = sshll.u32 %s8770_s5, 4  ;;  %s588_s28 = int_to_ptr.vmem [resolvable:$true] %s587_s28 }
  0x9c   : > { %s8368_s30 = scalar_lea.vmem %s588_s28, 96  ;;  %p8376_p7 = scmp.lt.s32.totalorder %s588_s28, %s588_s28 }
  0x9d   : > { %p8369_p0 = scmp.ne.s32.totalorder %s588_s28, %s8368_s30  ;;  %p8377_p8 = scmp.lt.s32.totalorder %s8368_s30, %s8368_s30 }
  0x9f   : > { %p8371_p2 = pnand %p8369_p0, %p8975_p6  ;;  %p8378_p10 = por %p8377_p8, %p8376_p7 }
  0xa1   : > { %p8372_p4 = pneg %p8371_p2 }
  0xa3   : > { %p8379_p3 = pnand %p8378_p10, %p8372_p4 }
  0xa5   : > { %8382 = shalt.err (!%p8379_p3)
}
  0xa6   : > { %s8771_s27 = smov 48   ;;  %s8772_s25 = smov 3  }
  0xa7   : > { %s10424_s6 = sld [smem:[#allocation55_spill]]  ;;  %s8773_s5 = smov [#allocation11]  }
  0xa8   : > { %s619_s10 = sshll.u32 %s8773_s5, 4  ;;  %s8774_s12 = smov [#allocation14]   ;;  %s620_s10 = int_to_ptr.vmem [resolvable:$true] %s619_s10 }
  0xa9   : > { %s645_s14 = sshll.u32 %s8774_s12, 4  ;;  %s8394_s16 = scalar_lea.vmem %s620_s10, 32  ;;  %s646_s14 = int_to_ptr.vmem [resolvable:$true] %s645_s14 }
  0xaa   : > { %p8395_p9 = scmp.ne.s32.totalorder %s620_s10, %s8394_s16  ;;  %p8402_p13 = scmp.lt.s32.totalorder %s620_s10, %s620_s10 }
  0xab   : > { %p8403_p0 = scmp.lt.s32.totalorder %s8394_s16, %s8394_s16 }
  0xac   : > { %p8397_p11 = pnand %p8395_p9, %p8975_p6 }
  0xad   : > { %7390 = dma.hbm_to_vmem [thread:$0]  (!%p8969_p5), %s10424_s6, 96, %s588_s28, [#allocation7], %s8771_s27, %s8771_s27, %s8772_s25  }
  0xae   : > { %p8398_p12 = pneg %p8397_p11  ;;  %p8404_p2 = por %p8403_p0, %p8402_p13 }
  0xb0   : > { %p8405_p4 = pnand %p8404_p2, %p8398_p12 }
  0xb2   : > { %8408 = shalt.err (!%p8405_p4)
}
  0xb3   : > { %s10425_s7 = sld [smem:[#allocation59_spill]]  ;;  %s8420_s12 = scalar_lea.vmem %s646_s14, 32 }
  0xb4   : > { %p8421_p7 = scmp.ne.s32.totalorder %s646_s14, %s8420_s12  ;;  %p8428_p3 = scmp.lt.s32.totalorder %s646_s14, %s646_s14 }
  0xb5   : > { %p8429_p9 = scmp.lt.s32.totalorder %s8420_s12, %s8420_s12 }
  0xb6   : > { %p8423_p8 = pnand %p8421_p7, %p8975_p6 }
  0xb7   : > { %p8430_p11 = por %p8429_p9, %p8428_p3 }
  0xb8   : > { %p8424_p10 = pneg %p8423_p8 }
  0xb9   : > { %7396 = dma.hbm_to_vmem [thread:$0]  (!%p8969_p5), %s10425_s7, 32, %s620_s10, [#allocation10], %s10423_s29, %s10423_s29, %s10422_s24  }
  0xba   : > { %p8431_p12 = pnand %p8430_p11, %p8424_p10 }
  0xbc   : > { %8434 = shalt.err (!%p8431_p12)
}
  0xbd   : > { %s10426_s9 = sld [smem:[#allocation61_spill]]  ;;  %s8775_s10 = smov [#allocation17]  }
  0xbe   : > { %s671_s25 = sshll.u32 %s8775_s10, 4  ;;  %s672_s25 = int_to_ptr.vmem [resolvable:$true] %s671_s25 }
  0xbf   : > { %s8446_s8 = scalar_lea.vmem %s672_s25, 64  ;;  %p8454_p4 = scmp.lt.s32.totalorder %s672_s25, %s672_s25 }
  0xc0   : > { %p8447_p13 = scmp.ne.s32.totalorder %s672_s25, %s8446_s8  ;;  %p8455_p7 = scmp.lt.s32.totalorder %s8446_s8, %s8446_s8 }
  0xc2   : > { %p8449_p0 = pnand %p8447_p13, %p8975_p6  ;;  %p8456_p8 = por %p8455_p7, %p8454_p4 }
  0xc3   : > { %7402 = dma.hbm_to_vmem [thread:$0]  (!%p8969_p5), %s10426_s9, 32, %s646_s14, [#allocation13], %s10423_s29, %s10423_s29, %s10422_s24  }
  0xc4   : > { %p8450_p2 = pneg %p8449_p0 }
  0xc6   : > { %p8457_p10 = pnand %p8456_p8, %p8450_p2 }
  0xc8   : > { %8460 = shalt.err (!%p8457_p10)
}
  0xc9   : > { %s8776_s4 = smov 32   ;;  %s8777_s6 = smov 2  }
  0xca   : > { %s10427_s11 = sld [smem:[#allocation63_spill]]  ;;  %s8778_s28 = smov [#allocation20]  }
  0xcb   : > { %s697_s30 = sshll.u32 %s8778_s28, 4  ;;  %s8779_s12 = smov [#allocation23]   ;;  %s698_s30 = int_to_ptr.vmem [resolvable:$true] %s697_s30 }
  0xcc   : > { %s723_s16 = sshll.u32 %s8779_s12, 4  ;;  %s8472_s27 = scalar_lea.vmem %s698_s30, 32  ;;  %s724_s16 = int_to_ptr.vmem [resolvable:$true] %s723_s16 }
  0xcd   : > { %p8473_p3 = scmp.ne.s32.totalorder %s698_s30, %s8472_s27  ;;  %p8480_p12 = scmp.lt.s32.totalorder %s698_s30, %s698_s30 }
  0xce   : > { %p8481_p13 = scmp.lt.s32.totalorder %s8472_s27, %s8472_s27 }
  0xcf   : > { %p8475_p9 = pnand %p8473_p3, %p8975_p6 }
  0xd0   : > { %7408 = dma.hbm_to_vmem [thread:$0]  (!%p8969_p5), %s10427_s11, 64, %s672_s25, [#allocation16], %s8776_s4, %s8776_s4, %s8777_s6  }
  0xd1   : > { %p8476_p11 = pneg %p8475_p9  ;;  %p8482_p0 = por %p8481_p13, %p8480_p12 }
  0xd3   : > { %p8483_p2 = pnand %p8482_p0, %p8476_p11 }
  0xd5   : > { %8486 = shalt.err (!%p8483_p2)
}
  0xd6   : > { %s10428_s13 = sld [smem:[#allocation65_spill]]  ;;  %s8498_s8 = scalar_lea.vmem %s724_s16, 32 }
  0xd7   : > { %p8499_p4 = scmp.ne.s32.totalorder %s724_s16, %s8498_s8  ;;  %p8506_p10 = scmp.lt.s32.totalorder %s724_s16, %s724_s16 }
  0xd8   : > { %p8507_p3 = scmp.lt.s32.totalorder %s8498_s8, %s8498_s8 }
  0xd9   : > { %p8501_p7 = pnand %p8499_p4, %p8975_p6 }
  0xda   : > { %p8508_p9 = por %p8507_p3, %p8506_p10 }
  0xdb   : > { %p8502_p8 = pneg %p8501_p7 }
  0xdc   : > { %7414 = dma.hbm_to_vmem [thread:$0]  (!%p8969_p5), %s10428_s13, 32, %s698_s30, [#allocation19], %s10423_s29, %s10423_s29, %s10422_s24  }
  0xdd   : > { %p8509_p11 = pnand %p8508_p9, %p8502_p8 }
  0xdf   : > { %8512 = shalt.err (!%p8509_p11)
}
  0xe0   : > { %s10429_s15 = sld [smem:[#allocation67_spill]]  ;;  %s8780_s28 = smov [#allocation26]  }
  0xe1   : > { %s749_s30 = sshll.u32 %s8780_s28, 4  ;;  %s8781_s12 = smov [#allocation29]   ;;  %s750_s30 = int_to_ptr.vmem [resolvable:$true] %s749_s30 }
  0xe2   : > { %s775_s27 = sshll.u32 %s8781_s12, 4  ;;  %s8524_s10 = scalar_lea.vmem %s750_s30, 64  ;;  %s776_s27 = int_to_ptr.vmem [resolvable:$true] %s775_s27 }
  0xe3   : > { %p8525_p12 = scmp.ne.s32.totalorder %s750_s30, %s8524_s10  ;;  %p8532_p2 = scmp.lt.s32.totalorder %s750_s30, %s750_s30 }
  0xe4   : > { %p8533_p4 = scmp.lt.s32.totalorder %s8524_s10, %s8524_s10 }
  0xe5   : > { %p8527_p13 = pnand %p8525_p12, %p8975_p6 }
  0xe6   : > { %7420 = dma.hbm_to_vmem [thread:$0]  (!%p8969_p5), %s10429_s15, 32, %s724_s16, [#allocation22], %s10423_s29, %s10423_s29, %s10422_s24  }
  0xe7   : > { %p8528_p0 = pneg %p8527_p13  ;;  %p8534_p7 = por %p8533_p4, %p8532_p2 }
  0xe9   : > { %p8535_p8 = pnand %p8534_p7, %p8528_p0 }
  0xeb   : > { %8538 = shalt.err (!%p8535_p8)
}
  0xec   : > { %7426 = dma.hbm_to_vmem [thread:$0]  (!%p8969_p5), %s10357_s17, 64, %s750_s30, [#allocation25], %s8776_s4, %s8776_s4, %s8777_s6  }
  0xed   : > { %s8550_s8 = scalar_lea.vmem %s776_s27, 32  ;;  %p8558_p11 = scmp.lt.s32.totalorder %s776_s27, %s776_s27 }
  0xee   : > { %p8551_p10 = scmp.ne.s32.totalorder %s776_s27, %s8550_s8  ;;  %p8559_p12 = scmp.lt.s32.totalorder %s8550_s8, %s8550_s8 }
  0xf0   : > { %p8553_p3 = pnand %p8551_p10, %p8975_p6  ;;  %p8560_p13 = por %p8559_p12, %p8558_p11 }
  0xf2   : > { %p8554_p9 = pneg %p8553_p3 }
  0xf4   : > { %p8561_p0 = pnand %p8560_p13, %p8554_p9 }
  0xf6   : > { %8564 = shalt.err (!%p8561_p0)
}
  0xf7   : > { %7432 = dma.hbm_to_vmem [thread:$0]  (!%p8969_p5), %s10359_s19, 32, %s776_s27, [#allocation28], %s10423_s29, %s10423_s29, %s10422_s24  }
  0xf8   : > { %s8782_s4 = smov [#allocation32]  }
  0xf9   : > { %s801_s6 = sshll.u32 %s8782_s4, 4  ;;  %s802_s6 = int_to_ptr.vmem [resolvable:$true] %s801_s6 }
  0xfa   : > { %s8576_s28 = scalar_lea.vmem %s802_s6, 32  ;;  %p8584_p8 = scmp.lt.s32.totalorder %s802_s6, %s802_s6 }
  0xfb   : > { %p8577_p2 = scmp.ne.s32.totalorder %s802_s6, %s8576_s28  ;;  %p8585_p10 = scmp.lt.s32.totalorder %s8576_s28, %s8576_s28 }
  0xfd   : > { %p8579_p4 = pnand %p8577_p2, %p8975_p6  ;;  %p8586_p3 = por %p8585_p10, %p8584_p8 }
  0xff   : > { %p8580_p7 = pneg %p8579_p4 }
 0x101   : > { %p8587_p9 = pnand %p8586_p3, %p8580_p7 }
 0x103   : > { %8590 = shalt.err (!%p8587_p9)
}
 0x104   : > { %s10430_s27 = sld [smem:[#allocation47_spill]]  ;;  %s6415_s2 = sadd.s32 4294967294, %s8751_s1  }
 0x105   : > { %s10431_s22 = sld [smem:[#allocation46_spill]]  ;;  %s56_s25 = sadd.s32 1, %s8743_s0 }
 0x106   : > { %s10432_s10 = sld [smem:[#allocation45_spill]]  ;;  %p57_p6 = scmp.ge.s32.totalorder %s56_s25, 2 }
 0x107   : > { %7438 = dma.hbm_to_vmem [thread:$0]  (!%p8969_p5), %s10361_s21, 32, %s802_s6, [#allocation31], %s10423_s29, %s10423_s29, %s10422_s24  }
 0x108   : > { %s59_s8 = sadd.s32 1, %s8747_s23  ;;  %s10462_s25 = smov (%p57_p6, %s56_s25), 0 }
 0x109   : > { %s10464_s8 = smov (!%p57_p6, %s59_s8), %s8747_s23  ;;  %p100_p12 = scmp.eq.s32.totalorder %s8751_s1, 0 }
 0x10a   : > { %s92_s14 = sadd.s32 1, %s10430_s27  ;;  %p61_p0 = scmp.ge.s32.totalorder %s10464_s8, 2 }
 0x10b   : > { %p99_p11 = scmp.ne.s32.totalorder %s10430_s27, %s10431_s22  ;;  %s10434_s5 = sadd.s32 4294967295, %s8751_s1  }
 0x10c   : > { %p105_p13 = scmp.ne.s32.totalorder %s10431_s22, %s10432_s10  ;;  %p549_p2 = scmp.eq.s32.totalorder %s10434_s5, 3 }
 0x10d   : > { %p9167_p5 = por %p100_p12, %p99_p11  ;;  %s10466_s8 = smov (%p61_p0, %s10464_s8), 0 }
 0x10e   : > { %p9173_p4 = por %p8956_p1, %p105_p13  ;;  %p9179_p7 = por %p549_p2, %p99_p11 }
 0x10f   : > { %p555_p8 = scmp.eq.s32.totalorder %s6415_s2, 3  ;;  %s89_s6 = ssub.s32 %s8747_s23, %s10466_s8 }
 0x110   : > { %p7465_p10 = scmp.lt.s32.totalorder %s8751_s1, 4  ;;  %p90_p3 = scmp.eq.s32.totalorder %s89_s6, 0 }
 0x111   : > { %p9186_p9 = por %p555_p8, %p105_p13  ;;  %s824_s30 = sand.u32 1, %s10430_s27  }
 0x112   : > { %s6649_s12 = sshll.u32 %s8747_s23, 8  ;;  %s10468_s27 = smov (!%p90_p3, %s10430_s27), %s92_s14 }
 0x113   : > { %s6436_s22 = sshll.u32 %s824_s30, 4  ;;  %s10439_s5 = sld [smem:[#allocation53_spill]] }
 0x114   : > { %s828_s9 = scalar_lea.vmem [#allocation3], %s6436_s22  ;;  %p9200_p6 = pnand %p7465_p10, %p9167_p5 }
 0x115   : > { %s835_s11 = sshll.u32 %s828_s9, 4  ;;  %s825_s6 = scalar_lea.sflag [#allocation4], %s824_s30  ;;  %s836_s11 = int_to_ptr.vmem [resolvable:$true] %s835_s11 }
 0x116   : > { %p8593_p11 = pneg %p9200_p6  ;;  %s8604_s13 = scalar_lea.vmem %s836_s11, 256 }
 0x117   : > { %p8605_p12 = scmp.ne.s32.totalorder %s836_s11, %s8604_s13  ;;  %s8783_s14 = smov [#allocation3]  }
 0x118   : > { %s8609_s15 = sshll.u32 %s8783_s14, 4  ;;  %s8610_s15 = int_to_ptr.vmem [resolvable:$false] %s8609_s15 }
 0x119   : > { %s834_s7 = scalar_lea.hbm %s10439_s5, %s6649_s12  ;;  %p8607_p13 = pnand %p8605_p12, %p8593_p11 }
 0x11a   : > { %s8611_s12 = scalar_lea.vmem %s8610_s15, 512  ;;  %p8612_p2 = scmp.lt.s32.totalorder %s836_s11, %s8610_s15 }
 0x11b   : > { %p8608_p0 = pneg %p8607_p13  ;;  %p8613_p8 = scmp.lt.s32.totalorder %s8611_s12, %s8604_s13 }
 0x11d   : > { %p8614_p3 = por %p8613_p8, %p8612_p2 }
 0x11f   : > { %p8615_p5 = pnand %p8614_p3, %p8608_p0 }
 0x121   : > { %8618 = shalt.err (!%p8615_p5)
}
 0x122   : > { %7442 = dma.hbm_to_vmem [thread:$0]  (!%p9200_p6), %s834_s7, 256, %s836_s11, %s825_s6, %s10418_s3, %s10418_s3, %s10417_s26  }
 0x123   : > { %s10441_s9 = sld [smem:[#allocation51_spill]] }
 0x129   : > { %p10442_p10 = scmp.ne.s32.totalorder %s10441_s9, 0 }
 0x12a   : > { %s10443_s24 = sld [smem:[#allocation46_spill]] (!%p10442_p10) }
 0x12b   : > { %847 = sbr.rel (%p10442_p10) target bundleno = 4652 (0x122c), region = 108 }
 0x130   : > { %s9214_s30 = sand.u32 1, %s10443_s24  }
 0x131   : > { %s6440_s15 = sshll.u32 %s9214_s30, 4  ;;  %s850_s13 = scalar_lea.sflag [#allocation4], %s9214_s30 }
 0x132   : > { %s9218_s22 = scalar_lea.vmem [#allocation3], %s6440_s15 }
 0x133   : > { %8678 = dma.done.wait (%p9173_p4), %s850_s13, 256  }
 0x134   : > { %8680 = vsyncadd (%p9173_p4), %s850_s13, 4294967040 }
 0x135   : > { %8682 = dma.done.wait (%p8956_p1), [#allocation7], 6240  }
 0x136   : > { %8684 = vsyncadd (%p8956_p1), [#allocation7], 4294961056 }
 0x137   : > { %8686 = dma.done.wait (%p8956_p1), [#allocation10], 2080  }
 0x138   : > { %8688 = vsyncadd (%p8956_p1), [#allocation10], 4294965216 }
 0x139   : > { %8690 = dma.done.wait (%p8956_p1), [#allocation13], 2080  }
 0x13a   : > { %8692 = vsyncadd (%p8956_p1), [#allocation13], 4294965216 }
 0x13b   : > { %8694 = dma.done.wait (%p8956_p1), [#allocation16], 4160  }
 0x13c   : > { %8696 = vsyncadd (%p8956_p1), [#allocation16], 4294963136 }
 0x13d   : > { %8698 = dma.done.wait (%p8956_p1), [#allocation19], 2080  }
 0x13e   : > { %8700 = vsyncadd (%p8956_p1), [#allocation19], 4294965216 }
 0x13f   : > { %8702 = dma.done.wait (%p8956_p1), [#allocation22], 64  }
 0x140   : > { %8704 = vsyncadd (%p8956_p1), [#allocation22], 4294967232 }
 0x141   : > { %8706 = dma.done.wait (%p8956_p1), [#allocation25], 4160  }
 0x142   : > { %8708 = vsyncadd (%p8956_p1), [#allocation25], 4294963136 }
 0x143   : > { %8710 = dma.done.wait (%p8956_p1), [#allocation28], 4128  }
 0x144   : > { %8712 = vsyncadd (%p8956_p1), [#allocation28], 4294963168 }
 0x145   : > { %8714 = dma.done.wait (%p8956_p1), [#allocation31], 64  }
 0x146   : > { %8716 = vsyncadd (%p8956_p1), [#allocation31], 4294967232  ;;  %s10445_s7 = sld [smem:[#allocation49_spill]]  ;;  %s9264_s2 = scalar_lea.vmem [#allocation33], %s6440_s15 }
 0x147   : > { %s10446_s16 = sld [smem:[#allocation52_spill]] }
 0x148   : > { %s10447_s6 = sld [smem:[#allocation48_spill]] }
 0x14c   : > { %s6460_s11 = sshll.u32 %s10445_s7, 1 }
 0x14d   : > { %p992_p4 = scmp.lt.s32.totalorder %s6460_s11, 3 }
 0x14e   : > { %p6462_p6 = scmp.ne.s32.totalorder %s10447_s6, 0 }
 0x14f   : > { %s10470_s11 = smov (!%p992_p4, %s6460_s11), 3 }
 0x150   : > { %s6461_s26 = sshll.u32 %s10470_s11, 3  ;;  %1003 = sbr.rel (%p6462_p6) target bundleno = 343 (0x157), region = 188 }
 0x151   : > { %s995_s5 = scalar_lea.vmem %s10446_s16, %s6461_s26 }
 0x155   : > { %v1004_v0 = vld [vmem:[%s995_s5] sm:$0xff]  ;;  %v1005_v1 = vld [vmem:[%s995_s5 + $0x8] sm:$0xff] }
 0x156   : > { %1006 = vst [vmem:[#allocation2] sm:$0xff] %v1004_v0  ;;  %1007 = vst [vmem:[#allocation2 + $0x8] sm:$0xff] %v1005_v1 }
 0x157 PF: > { %s10448_s14 = sld [smem:[#allocation48_spill]]  ;;  %v8784_v2 = vmov 0   ;;  %v8785_v3 = vmov 0.0   ;;  %vm8786_vm0 = vmmov 0   ;;  %v1052_v31 = vlaneseq  ;;  %s8787_s13 = smov 112  }
 0x158   : > { %1227 = vmatprep.mubr.bf16.mxu0 %v8784_v2  ;;  %6844 = vmatprep.subr.bf16.mxu1 %v8785_v3  ;;  %vm1459_vm1 = vcmask 130048   ;;  %s8788_s10 = smov 96   ;;  %s8789_s7 = smov 80   ;;  %vm2392_vm2 = vcmask 1043456   ;;  %vm2196_vm3 = vcmask 64512   ;;  %vm3184_vm4 = vcmask 261120  }
 0x159   : > { %6860 = vmatprep.mubr.msk.bf16.mxu1 %vm8786_vm0, %v8785_v3  ;;  %v1053_v32 = vshrl.u32 %v1052_v31, 7  ;;  %s8790_s11 = smov 64   ;;  %s8791_s26 = smov 48   ;;  %vm3187_vm5 = vcmask 392192   ;;  %vm3190_vm6 = vcmask 523264   ;;  %vm3193_vm7 = vcmask 654336  }
 0x15a   : > { %s8792_s3 = smov 32   ;;  %s8793_s29 = smov 16   ;;  %vm3196_vm8 = vcmask 785408   ;;  %vm3199_vm9 = vcmask 916480  }
 0x15b   : > { %v9312_v33 = vsub.s32 1, %v1053_v32  ;;  %v9314_v35 = vsub.s32 0, %v1053_v32  ;;  %v1062_v55 = vsub.s32 2, %v1053_v32 }
 0x15d   : > { %s6650_s12 = smul.u32 192, %s10448_s14  ;;  %v1008_v25 = vld [vmem:[#allocation2] sm:$0xff]  ;;  %v1009_v26 = vld [vmem:[#allocation2 + $0x8] sm:$0xff]  ;;  %s9701_s16 = sshll.u32 %s10448_s14, 6 }
 0x15e   : > { %v1012_v28 = vpack.c.bf16 %v1009_v26, %v1008_v25  ;;  %s1048_s24 = smul.u32 3, %s10448_s14  ;;  %s9704_s5 = scalar_lea.vmem [#allocation9], %s9701_s16 }
 0x15f   : > { %s9272_s9 = scalar_lea.vmem [#allocation6], %s6650_s12  ;;  %p6643_p1 = scmp.ne.s32.totalorder %s10448_s14, 1 }
 0x160   : > { %v7861_v4 = vld [vmem:[%s9272_s9 + $0xac] ss:$12 sps:$4 sm:$0xff]   ;;  %v7863_v5 = vld [vmem:[%s9272_s9 + $0xa8] ss:$12 sps:$4 sm:$0xff]   ;;  %v7866_v7 = vld [vmem:[%s9272_s9 + $0x90] ss:$12 sps:$4 sm:$0xff]  }
 0x161   : > { %1195 = vmatprep.subr.bf16.mxu0 %v7861_v4  ;;  %v7864_v6 = vld [vmem:[%s9272_s9 + $0x94] ss:$12 sps:$4 sm:$0xff]   ;;  %v7867_v8 = vld [vmem:[%s9272_s9 + $0x7c] ss:$12 sps:$4 sm:$0xff]   ;;  %v7869_v9 = vld [vmem:[%s9272_s9 + $0x78] ss:$12 sps:$4 sm:$0xff]  }
 0x162   : > { %1196 = vmatpush1.bf16.msra.mxu0 %v7863_v5  ;;  %v7870_v10 = vld [vmem:[%s9272_s9 + $0x64] ss:$12 sps:$4 sm:$0xff]   ;;  %v7872_v11 = vld [vmem:[%s9272_s9 + $0x60] ss:$12 sps:$4 sm:$0xff]   ;;  %v7875_v15 = vld [vmem:[%s9272_s9 + $0x48] ss:$12 sps:$4 sm:$0xff]  }
 0x163   : > { %1197 = vmatprep.subr.bf16.mxu0 %v7864_v6  ;;  %v7885_v12 = vld [vmem:[%s9272_s9 + $0xb0] ss:$12 sps:$4 sm:$0xff]   ;;  %v7873_v13 = vld [vmem:[%s9272_s9 + $0x4c] ss:$12 sps:$4 sm:$0xff]   ;;  %v7876_v16 = vld [vmem:[%s9272_s9 + $0x34] ss:$12 sps:$4 sm:$0xff]  }
 0x164   : > { %6845 = vmatpush3.bf16.msra.mxu1 %v7885_v12  ;;  %v7886_v14 = vld [vmem:[%s9272_s9 + $0x98] ss:$12 sps:$4 sm:$0xff]   ;;  %v7887_v17 = vld [vmem:[%s9272_s9 + $0x80] ss:$12 sps:$4 sm:$0xff]   ;;  %v7878_v18 = vld [vmem:[%s9272_s9 + $0x30] ss:$12 sps:$4 sm:$0xff]  }
 0x165   : > { %6846 = vmatprep.subr.bf16.mxu1 %v8785_v3  ;;  %v7879_v19 = vld [vmem:[%s9272_s9 + $0x1c] ss:$12 sps:$4 sm:$0xff]   ;;  %v7881_v21 = vld [vmem:[%s9272_s9 + $0x18] ss:$12 sps:$4 sm:$0xff]   ;;  %v7884_v24 = vld [vmem:[%s9272_s9] ss:$12 sps:$4 sm:$0xff]  }
 0x166   : > { %1198 = vmatpush1.bf16.msra.mxu0 %v7866_v7  ;;  %v7888_v20 = vld [vmem:[%s9272_s9 + $0x68] ss:$12 sps:$4 sm:$0xff]   ;;  %v7882_v22 = vld [vmem:[%s9272_s9 + $0x4] ss:$12 sps:$4 sm:$0xff]   ;;  %v7891_v29 = vld [vmem:[%s9272_s9 + $0x20] ss:$12 sps:$4 sm:$0xff]  }
 0x167   : > { %1199 = vmatprep.subr.bf16.mxu0 %v7867_v8  ;;  %v7889_v23 = vld [vmem:[%s9272_s9 + $0x50] ss:$12 sps:$4 sm:$0xff]   ;;  %v7890_v27 = vld [vmem:[%s9272_s9 + $0x38] ss:$12 sps:$4 sm:$0xff]   ;;  %v7892_v30 = vld [vmem:[%s9272_s9 + $0x8] ss:$12 sps:$4 sm:$0xff]  }
 0x168   : > { %6847 = vmatpush3.bf16.msra.mxu1 %v7886_v14  ;;  %s1049_s15 = scalar_lea.vmem [#allocation8], %s1048_s24  ;;  %s10449_s9 = sld [smem:[#allocation57_spill]] }
 0x169   : > { %6848 = vmatprep.subr.bf16.mxu1 %v8785_v3  ;;  %v1050_v34 = vld [vmem:[%s1049_s15] sm:$0x7]  ;;  %s9749_s15 = sshll.u32 %s10448_s14, 7 }
 0x16a   : > { %1200 = vmatpush1.bf16.msra.mxu0 %v7869_v9  ;;  %v1059_v36 = vrot.slane %v1050_v34, %v9312_v33  ;;  %v1055_v39 = vrot.slane %v1050_v34, %v9314_v35  ;;  %v1063_v57 = vrot.slane %v1050_v34, %v1062_v55  ;;  %s9755_s6 = scalar_lea.vmem [#allocation15], %s9749_s15  ;;  %s9771_s12 = scalar_lea.vmem [#allocation27], %s9749_s15 }
 0x16b   : > { %1201 = vmatprep.subr.bf16.mxu0 %v7870_v10 }
 0x16c   : > { %6849 = vmatpush3.bf16.msra.mxu1 %v7887_v17 }
 0x16d   : > { %6850 = vmatprep.subr.bf16.mxu1 %v8785_v3 }
 0x16e   : > { %1202 = vmatpush1.bf16.msra.mxu0 %v7872_v11  ;;  %s3222_s24 = scalar_lea.vmem %s10449_s9, %s10448_s14 }
 0x16f   : > { %1203 = vmatprep.subr.bf16.mxu0 %v7873_v13 }
 0x170   : > { %6851 = vmatpush3.bf16.msra.mxu1 %v7888_v20 }
 0x171   : > { %6852 = vmatprep.subr.bf16.mxu1 %v8785_v3 }
 0x172   : > { %1204 = vmatpush1.bf16.msra.mxu0 %v7875_v15 }
 0x173   : > { %1205 = vmatprep.subr.bf16.mxu0 %v7876_v16 }
 0x174   : > { %6853 = vmatpush3.bf16.msra.mxu1 %v7889_v23 }
 0x175   : > { %6854 = vmatprep.subr.bf16.mxu1 %v8785_v3 }
 0x176   : > { %1206 = vmatpush1.bf16.msra.mxu0 %v7878_v18 }
 0x177   : > { %1207 = vmatprep.subr.bf16.mxu0 %v7879_v19 }
 0x178   : > { %6855 = vmatpush3.bf16.msra.mxu1 %v7890_v27 }
 0x179   : > { %6856 = vmatprep.subr.bf16.mxu1 %v8785_v3 }
 0x17a   : > { %1208 = vmatpush1.bf16.msra.mxu0 %v7881_v21 }
 0x17b   : > { %1209 = vmatprep.subr.bf16.mxu0 %v7882_v22 }
 0x17c   : > { %6857 = vmatpush3.bf16.msra.mxu1 %v7891_v29 }
 0x17d   : > { %6858 = vmatprep.subr.bf16.mxu1 %v8785_v3 }
 0x17e   : > { %1210 = vmatpush1.bf16.msra.mxu0 %v7884_v24 }
 0x17f   : > { %6888 = vmatprep.subr.bf16.mxu0 %v8785_v3 }
 0x180   : > { %6859 = vmatpush3.bf16.msra.mxu1 %v7892_v30 }
 0x181   : > { %1228 = vmatmul.mubr.bf16.vlgmr.msra.gmra.mxu0 %v1012_v28  ;;  %6864 = vmatprep.subr.bf16.mxu1 %v8785_v3 }
 0x182   : > { %6890 = vmatprep.mubr.msk.bf16.mxu0 %vm8786_vm0, %v8785_v3 }
 0x183   : > { %6861 = vmatmul.mubr.bf16.vlgmr.msra.gmra.mxu1 %v1012_v28 }
 0x184   : > { %6866 = vmatprep.mubr.msk.bf16.mxu1 %vm8786_vm0, %v8785_v3 }
 0x241   : > { %v1229_v37 = vpop.f32.mrf.mxu0 }
 0x242   : > { %v1230_v45 = vadd.f32 %v1229_v37, %v1055_v39 }
 0x243   : > { %v1231_v38 = vpop.f32.mrf.mxu0  ;;  %v1272_v56 = vpop.f32.mrf.mxu1 }
 0x244   : > { %v1232_v40 = vadd.f32 %v1231_v38, %v1059_v36  ;;  %v1323_v52 = vpack.c.bf16 %v1230_v45, %v1230_v45  ;;  %v9343_v59 = vadd.f32 %v1272_v56, %v1063_v57 }
 0x245   : > { %v1233_v41 = vpop.f32.mrf.mxu0  ;;  %v6862_v58 = vpop.f32.mrf.mxu1 }
 0x246   : > { %v1234_v42 = vadd.f32 %v1233_v41, %v1055_v39  ;;  %1341 = vrot.lane.b32.xlu0 %v1232_v40, %s8787_s13  ;;  %v1383_v43 = vpack.c.bf16 %v1232_v40, %v1232_v40 }
 0x247   : > { %v1235_v44 = vpop.f32.mrf.mxu0  ;;  %v1275_v60 = vpop.f32.mrf.mxu1 }
 0x248   : > { %v1236_v46 = vadd.f32 %v1235_v44, %v1059_v36  ;;  %1283 = vrot.lane.b32.xlu1 %v1234_v42, %s8787_s13  ;;  %v1464_v47 = vsel %vm1459_vm1, %v1383_v43, 0  ;;  %v7601_v51 = vpack.i.bf16 %v1234_v42, %v1230_v45  ;;  %v1324_v54 = vpack.c.bf16 %v1234_v42, %v1234_v42 }
 0x249   : > { %6865 = vmatpush3.bf16.xpose.msra.mxu1 %v1464_v47  ;;  %v9345_v61 = vadd.f32 %v1275_v60, %v1063_v57  ;;  %v6863_v62 = vpop.f32.mrf.mxu1 }
 0x24a   : > { %v7596_v48 = vpack.i.bf16 %v1236_v46, %v1232_v40  ;;  %v7591_v49 = vpack.i.bf16 %v1236_v46, %v1230_v45  ;;  %6870 = vmatprep.subr.bf16.mxu1 %v8785_v3  ;;  %v1384_v50 = vpack.c.bf16 %v1236_v46, %v1236_v46 }
 0x24b   : > { %v9349_v63 = vpack.i.bf16 %v9345_v61, %v9343_v59 }
 0x24c   : > { %7597 = vrot.lane.b32.xlu1 %v7596_v48, %s8788_s10  ;;  %7592 = vrot.lane.b32.xlu0 %v7591_v49, %s8787_s13  ;;  %v1510_v53 = vsel %vm1459_vm1, %v1384_v50, 0 }
 0x250   : > { %7607 = vrot.lane.b32.xlu1 %v7596_v48, %s8789_s7  ;;  %7602 = vrot.lane.b32.xlu0 %v7601_v51, %s8788_s10 }
 0x251   : > { %6867 = vmatmul.mubr.msk.bf16.vlgmr.msra.gmra.mxu1 %vm1459_vm1, %v1323_v52 }
 0x252   : > { %6871 = vmatpush3.bf16.xpose.msra.mxu1 %v1510_v53  ;;  %6872 = vmatprep.mubr.msk.bf16.mxu1 %vm8786_vm0, %v8785_v3 }
 0x253   : > { %6876 = vmatprep.subr.bf16.mxu1 %v8785_v3 }
 0x254   : > { %7617 = vrot.lane.b32.xlu1 %v7596_v48, %s8790_s11  ;;  %7612 = vrot.lane.b32.xlu0 %v7601_v51, %s8789_s7 }
 0x258   : > { %7627 = vrot.lane.b32.xlu1 %v7596_v48, %s8791_s26  ;;  %7622 = vrot.lane.b32.xlu0 %v7601_v51, %s8790_s11 }
 0x259   : > { %6873 = vmatmul.mubr.msk.bf16.vlgmr.msra.gmra.mxu1 %vm1459_vm1, %v1324_v54 }
 0x25a   : > { %6878 = vmatprep.mubr.msk.bf16.mxu1 %vm8786_vm0, %v8785_v3 }
 0x25c   : > { %7637 = vrot.lane.b32.xlu1 %v7596_v48, %s8792_s3  ;;  %7632 = vrot.lane.b32.xlu0 %v7601_v51, %s8791_s26 }
 0x260   : > { %7647 = vrot.lane.b32.xlu1 %v7596_v48, %s8793_s29  ;;  %7642 = vrot.lane.b32.xlu0 %v7601_v51, %s8792_s3 }
 0x264   : > { %7652 = vrot.lane.b32.xlu0 %v7601_v51, %s8793_s29 }
 0x268   : > { %7657 = vrot.lane.b32.xlu0 %v9349_v63, %s8787_s13 }
 0x2b8   : > { %v1342_v0 = vpop.permute.xlu0 %1341 }
 0x2b9   : > { %v1385_v1 = vpack.c.bf16 %v1342_v0, %v1342_v0 }
 0x2ba   : > { %v1284_v4 = vpop.permute.xlu1 %1283 }
 0x2bb   : > { %v1556_v5 = vsel %vm1459_vm1, %v1385_v1, 0  ;;  %v1326_v23 = vpack.c.bf16 %v1284_v4, %v1284_v4 }
 0x2bc   : > { %6877 = vmatpush3.bf16.xpose.msra.mxu1 %v1556_v5 }
 0x2bd   : > { %6882 = vmatprep.subr.bf16.mxu1 %v8785_v3 }
 0x2be   : > { %v7598_v6 = vpop.permute.xlu1 %7597  ;;  %v7593_v7 = vpop.permute.xlu0 %7592 }
 0x2bf   : > { %v7599_v8 = vunpack.i.l.bf16 %v7598_v6  ;;  %v7595_v9 = vunpack.i.h.bf16 %v7593_v7  ;;  %v7594_v10 = vunpack.i.l.bf16 %v7593_v7  ;;  %v7600_v18 = vunpack.i.h.bf16 %v7598_v6 }
 0x2c1   : > { %v1387_v11 = vpack.c.bf16 %v7599_v8, %v7599_v8  ;;  %v1386_v12 = vpack.c.bf16 %v7595_v9, %v7595_v9  ;;  %v1325_v13 = vpack.c.bf16 %v7594_v10, %v7594_v10  ;;  %v1388_v21 = vpack.c.bf16 %v7600_v18, %v7600_v18 }
 0x2c2   : > { %v7608_v14 = vpop.permute.xlu1 %7607  ;;  %v7603_v15 = vpop.permute.xlu0 %7602 }
 0x2c3   : > { %6879 = vmatmul.mubr.msk.bf16.vlgmr.msra.gmra.mxu1 %vm1459_vm1, %v1325_v13  ;;  %v1602_v16 = vsel %vm1459_vm1, %v1386_v12, 0  ;;  %v1648_v17 = vsel %vm1459_vm1, %v1387_v11, 0  ;;  %v7609_v19 = vunpack.i.l.bf16 %v7608_v14  ;;  %v7604_v20 = vunpack.i.l.bf16 %v7603_v15 }
 0x2c4   : > { %6884 = vmatprep.mubr.msk.bf16.mxu1 %vm8786_vm0, %v8785_v3  ;;  %6883 = vmatpush3.bf16.xpose.msra.mxu1 %v1602_v16  ;;  %v7610_v26 = vunpack.i.h.bf16 %v7608_v14  ;;  %v1694_v28 = vsel %vm1459_vm1, %v1388_v21, 0  ;;  %v7605_v31 = vunpack.i.h.bf16 %v7603_v15 }
 0x2c5   : > { %6889 = vmatpush3.bf16.xpose.msra.mxu0 %v1648_v17  ;;  %6894 = vmatprep.subr.bf16.mxu1 %v8785_v3  ;;  %v1389_v22 = vpack.c.bf16 %v7609_v19, %v7609_v19  ;;  %v1327_v24 = vpack.c.bf16 %v7604_v20, %v7604_v20 }
 0x2c6   : > { %6900 = vmatprep.subr.bf16.mxu0 %v8785_v3  ;;  %v7618_v25 = vpop.permute.xlu1 %7617  ;;  %v7613_v27 = vpop.permute.xlu0 %7612  ;;  %v1390_v34 = vpack.c.bf16 %v7610_v26, %v7610_v26  ;;  %v1328_v37 = vpack.c.bf16 %v7605_v31, %v7605_v31 }
 0x2c7   : > { %v1740_v29 = vsel %vm1459_vm1, %v1389_v22, 0  ;;  %v7619_v30 = vunpack.i.l.bf16 %v7618_v25  ;;  %v7614_v32 = vunpack.i.l.bf16 %v7613_v27  ;;  %v7620_v40 = vunpack.i.h.bf16 %v7618_v25 }
 0x2c8   : > { %v1786_v42 = vsel %vm1459_vm1, %v1390_v34, 0  ;;  %v7615_v45 = vunpack.i.h.bf16 %v7613_v27 }
 0x2c9   : > { %v1391_v36 = vpack.c.bf16 %v7619_v30, %v7619_v30  ;;  %v1329_v39 = vpack.c.bf16 %v7614_v32, %v7614_v32  ;;  %v1392_v47 = vpack.c.bf16 %v7620_v40, %v7620_v40 }
 0x2ca   : > { %v7628_v38 = vpop.permute.xlu1 %7627  ;;  %v7623_v41 = vpop.permute.xlu0 %7622  ;;  %v1330_v49 = vpack.c.bf16 %v7615_v45, %v7615_v45 }
 0x2cb   : > { %6885 = vmatmul.mubr.msk.bf16.vlgmr.msra.gmra.mxu1 %vm1459_vm1, %v1326_v23  ;;  %v7629_v43 = vunpack.i.l.bf16 %v7628_v38  ;;  %v1832_v44 = vsel %vm1459_vm1, %v1391_v36, 0  ;;  %v7624_v46 = vunpack.i.l.bf16 %v7623_v41  ;;  %v7630_v52 = vunpack.i.h.bf16 %v7628_v38 }
 0x2cc   : > { %6891 = vmatmul.mubr.msk.bf16.vlgmr.msra.gmra.mxu0 %vm1459_vm1, %v1327_v24  ;;  %6895 = vmatpush3.bf16.xpose.msra.mxu1 %v1694_v28  ;;  %v1878_v54 = vsel %vm1459_vm1, %v1392_v47, 0  ;;  %v7625_v57 = vunpack.i.h.bf16 %v7623_v41  ;;  %v1443_v23 = vpack.c.bf16 %v9343_v59, %v9343_v59  ;;  %v1444_v59 = vpack.c.bf16 %v9345_v61, %v9345_v61 }
 0x2cd   : > { %6901 = vmatpush3.bf16.xpose.msra.mxu0 %v1740_v29  ;;  %6896 = vmatprep.mubr.msk.bf16.mxu1 %vm8786_vm0, %v8785_v3  ;;  %v1393_v48 = vpack.c.bf16 %v7629_v43, %v7629_v43  ;;  %v1331_v51 = vpack.c.bf16 %v7624_v46, %v7624_v46  ;;  %v1394_v60 = vpack.c.bf16 %v7630_v52, %v7630_v52 }
 0x2ce   : > { %6902 = vmatprep.mubr.msk.bf16.mxu0 %vm8786_vm0, %v8785_v3  ;;  %6906 = vmatprep.subr.bf16.mxu1 %v8785_v3  ;;  %v7638_v50 = vpop.permute.xlu1 %7637  ;;  %v7633_v53 = vpop.permute.xlu0 %7632  ;;  %v1332_v0 = vpack.c.bf16 %v7625_v57, %v7625_v57  ;;  %v2394_v27 = vsel %vm2392_vm2, %v1443_v23, 0  ;;  %v2440_v30 = vsel %vm2392_vm2, %v1444_v59, 0 }
 0x2cf   : > { %6912 = vmatprep.subr.bf16.mxu0 %v8785_v3  ;;  %v7639_v55 = vunpack.i.l.bf16 %v7638_v50  ;;  %v1924_v56 = vsel %vm1459_vm1, %v1393_v48, 0  ;;  %v7634_v58 = vunpack.i.l.bf16 %v7633_v53  ;;  %v7640_v5 = vunpack.i.h.bf16 %v7638_v50 }
 0x2d0   : > { %v1970_v7 = vsel %vm1459_vm1, %v1394_v60, 0  ;;  %v7635_v10 = vunpack.i.h.bf16 %v7633_v53 }
 0x2d1   : > { %v1395_v62 = vpack.c.bf16 %v7639_v55, %v7639_v55  ;;  %v1333_v4 = vpack.c.bf16 %v7634_v58, %v7634_v58  ;;  %v1396_v12 = vpack.c.bf16 %v7640_v5, %v7640_v5 }
 0x2d2   : > { %v7648_v1 = vpop.permute.xlu1 %7647  ;;  %v7643_v6 = vpop.permute.xlu0 %7642  ;;  %v1334_v14 = vpack.c.bf16 %v7635_v10, %v7635_v10 }
 0x2d3   : > { %6897 = vmatmul.mubr.msk.bf16.vlgmr.msra.gmra.mxu1 %vm1459_vm1, %v1328_v37  ;;  %v7649_v8 = vunpack.i.l.bf16 %v7648_v1  ;;  %v2016_v9 = vsel %vm1459_vm1, %v1395_v62, 0  ;;  %v7644_v11 = vunpack.i.l.bf16 %v7643_v6  ;;  %v7650_v16 = vunpack.i.h.bf16 %v7648_v1 }
 0x2d4   : > { %6903 = vmatmul.mubr.msk.bf16.vlgmr.msra.gmra.mxu0 %vm1459_vm1, %v1329_v39  ;;  %6907 = vmatpush3.bf16.xpose.msra.mxu1 %v1786_v42  ;;  %v2062_v18 = vsel %vm1459_vm1, %v1396_v12, 0  ;;  %v7645_v20 = vunpack.i.h.bf16 %v7643_v6 }
 0x2d5   : > { %6913 = vmatpush3.bf16.xpose.msra.mxu0 %v1832_v44  ;;  %6908 = vmatprep.mubr.msk.bf16.mxu1 %vm8786_vm0, %v8785_v3  ;;  %v1397_v13 = vpack.c.bf16 %v7649_v8, %v7649_v8  ;;  %v1335_v15 = vpack.c.bf16 %v7644_v11, %v7644_v11  ;;  %v1398_v22 = vpack.c.bf16 %v7650_v16, %v7650_v16 }
 0x2d6   : > { %6914 = vmatprep.mubr.msk.bf16.mxu0 %vm8786_vm0, %v8785_v3  ;;  %6918 = vmatprep.subr.bf16.mxu1 %v8785_v3  ;;  %v7653_v17 = vpop.permute.xlu0 %7652  ;;  %v1336_v24 = vpack.c.bf16 %v7645_v20, %v7645_v20 }
 0x2d7   : > { %6924 = vmatprep.subr.bf16.mxu0 %v8785_v3  ;;  %v2108_v19 = vsel %vm1459_vm1, %v1397_v13, 0  ;;  %v7654_v21 = vunpack.i.l.bf16 %v7653_v17  ;;  %v2154_v26 = vsel %vm1459_vm1, %v1398_v22, 0  ;;  %v7655_v28 = vunpack.i.h.bf16 %v7653_v17 }
 0x2d9   : > { %v1337_v25 = vpack.c.bf16 %v7654_v21, %v7654_v21  ;;  %v1338_v29 = vpack.c.bf16 %v7655_v28, %v7655_v28 }
 0x2db   : > { %6909 = vmatmul.mubr.msk.bf16.vlgmr.msra.gmra.mxu1 %vm1459_vm1, %v1330_v49 }
 0x2dc   : > { %6915 = vmatmul.mubr.msk.bf16.vlgmr.msra.gmra.mxu0 %vm1459_vm1, %v1331_v51  ;;  %6919 = vmatpush3.bf16.xpose.msra.mxu1 %v1878_v54 }
 0x2dd   : > { %6925 = vmatpush3.bf16.xpose.msra.mxu0 %v1924_v56  ;;  %6920 = vmatprep.mubr.msk.bf16.mxu1 %vm8786_vm0, %v8785_v3 }
 0x2de   : > { %6926 = vmatprep.mubr.msk.bf16.mxu0 %vm8786_vm0, %v8785_v3  ;;  %6930 = vmatprep.subr.bf16.mxu1 %v8785_v3 }
 0x2df   : > { %6936 = vmatprep.subr.bf16.mxu0 %v8785_v3 }
 0x2e3   : > { %6921 = vmatmul.mubr.msk.bf16.vlgmr.msra.gmra.mxu1 %vm1459_vm1, %v1332_v0 }
 0x2e4   : > { %6927 = vmatmul.mubr.msk.bf16.vlgmr.msra.gmra.mxu0 %vm1459_vm1, %v1333_v4  ;;  %6931 = vmatpush3.bf16.xpose.msra.mxu1 %v1970_v7 }
 0x2e5   : > { %6937 = vmatpush3.bf16.xpose.msra.mxu0 %v2016_v9  ;;  %6932 = vmatprep.mubr.msk.bf16.mxu1 %vm8786_vm0, %v8785_v3 }
 0x2e6   : > { %6938 = vmatprep.mubr.msk.bf16.mxu0 %vm8786_vm0, %v8785_v3  ;;  %6942 = vmatprep.subr.bf16.mxu1 %v8785_v3 }
 0x2e7   : > { %6948 = vmatprep.subr.bf16.mxu0 %v8785_v3 }
 0x2eb   : > { %6933 = vmatmul.mubr.msk.bf16.vlgmr.msra.gmra.mxu1 %vm1459_vm1, %v1334_v14 }
 0x2ec   : > { %6939 = vmatmul.mubr.msk.bf16.vlgmr.msra.gmra.mxu0 %vm1459_vm1, %v1335_v15  ;;  %6943 = vmatpush3.bf16.xpose.msra.mxu1 %v2062_v18 }
 0x2ed   : > { %6949 = vmatpush3.bf16.xpose.msra.mxu0 %v2108_v19  ;;  %6944 = vmatprep.mubr.msk.bf16.mxu1 %vm8786_vm0, %v8785_v3 }
 0x2ee   : > { %6950 = vmatprep.mubr.msk.bf16.mxu0 %vm8786_vm0, %v8785_v3  ;;  %6954 = vmatprep.subr.bf16.mxu1 %v8785_v3 }
 0x2ef   : > { %6960 = vmatprep.subr.bf16.mxu0 %v8785_v3 }
 0x2f3   : > { %6945 = vmatmul.mubr.msk.bf16.vlgmr.msra.gmra.mxu1 %vm1459_vm1, %v1336_v24 }
 0x2f4   : > { %6951 = vmatmul.mubr.msk.bf16.vlgmr.msra.gmra.mxu0 %vm1459_vm1, %v1337_v25  ;;  %6955 = vmatpush3.bf16.xpose.msra.mxu1 %v2154_v26 }
 0x2f5   : > { %6956 = vmatprep.mubr.msk.bf16.mxu1 %vm8786_vm0, %v8785_v3  ;;  %6966 = vmatprep.subr.bf16.mxu1 %v8785_v3 }
 0x2f6   : > { %6961 = vmatpush3.bf16.msra.mxu0 %v2394_v27  ;;  %6962 = vmatprep.mubr.msk.bf16.mxu0 %vm8786_vm0, %v8785_v3 }
 0x2f7   : > { %6972 = vmatprep.subr.bf16.mxu0 %v8785_v3 }
 0x2fb   : > { %6957 = vmatmul.mubr.msk.bf16.vlgmr.msra.gmra.mxu1 %vm1459_vm1, %v1338_v29 }
 0x2fc   : > { %6967 = vmatpush3.bf16.msra.mxu1 %v2440_v30  ;;  %6968 = vmatprep.mubr.msk.bf16.mxu1 %vm8786_vm0, %v8785_v3 }
 0x2fd   : > { %6978 = vmatprep.subr.bf16.mxu1 %v8785_v3 }
 0x311   : > { %v9431_v31 = vpop.f32.mrf.mxu1 }
 0x312   : > { %v2197_v61 = vsel %vm2196_vm3, %v9431_v31, -inf }
 0x313   : > { %2198 = vmax.xlane.f32.xlu1 %v2197_v61  ;;  %v6868_v32 = vpop.f32.mrf.mxu1 }
 0x315   : > { %v1503_v34 = vpop.f32.mrf.mxu1 }
 0x317   : > { %v6869_v36 = vpop.f32.mrf.mxu1 }
 0x319   : > { %v9435_v37 = vpop.f32.mrf.mxu1 }
 0x31a   : > { %v2200_v38 = vsel %vm2196_vm3, %v9435_v37, -inf }
 0x31b   : > { %2201 = vmax.xlane.f32.xlu0 %v2200_v38  ;;  %v6874_v39 = vpop.f32.mrf.mxu1  ;;  %v9481_v38 = vpop.permute.xlu0 %7657 }
 0x31d   : > { %v1549_v40 = vpop.f32.mrf.mxu1 }
 0x31f   : > { %v6875_v41 = vpop.f32.mrf.mxu1 }
 0x383   : > { %v9439_v42 = vpop.f32.mrf.mxu1 }
 0x384   : > { %v2203_v43 = vsel %vm2196_vm3, %v9439_v42, -inf }
 0x385   : > { %2204 = vmax.xlane.f32.xlu0 %v2203_v43  ;;  %v6880_v44 = vpop.f32.mrf.mxu1 }
 0x387   : > { %v1595_v45 = vpop.f32.mrf.mxu1 }
 0x389   : > { %v6881_v46 = vpop.f32.mrf.mxu1 }
 0x38b   : > { %v9443_v47 = vpop.f32.mrf.mxu1 }
 0x38c   : > { %v9445_v48 = vpop.f32.mrf.mxu0  ;;  %v2206_v49 = vsel %vm2196_vm3, %v9443_v47, -inf }
 0x38d   : > { %v2209_v50 = vsel %vm2196_vm3, %v9445_v48, -inf  ;;  %2207 = vmax.xlane.f32.xlu1 %v2206_v49  ;;  %v6886_v51 = vpop.f32.mrf.mxu1 }
 0x38e   : > { %v6892_v52 = vpop.f32.mrf.mxu0  ;;  %2210 = vmax.xlane.f32.xlu0 %v2209_v50 }
 0x38f   : > { %v1641_v53 = vpop.f32.mrf.mxu1 }
 0x390   : > { %v1687_v54 = vpop.f32.mrf.mxu0 }
 0x391   : > { %v6887_v55 = vpop.f32.mrf.mxu1 }
 0x392   : > { %v6893_v56 = vpop.f32.mrf.mxu0 }
 0x393   : > { %v9451_v57 = vpop.f32.mrf.mxu1 }
 0x394   : > { %v9453_v58 = vpop.f32.mrf.mxu0  ;;  %v2212_v55 = vsel %vm2196_vm3, %v9451_v57, -inf }
 0x395   : > { %v2215_v60 = vsel %vm2196_vm3, %v9453_v58, -inf  ;;  %v6898_v62 = vpop.f32.mrf.mxu1 }
 0x396   : > { %v6904_v0 = vpop.f32.mrf.mxu0  ;;  %2216 = vmax.xlane.f32.xlu0 %v2215_v60 }
 0x397   : > { %v1733_v1 = vpop.f32.mrf.mxu1 }
 0x398   : > { %v1779_v4 = vpop.f32.mrf.mxu0 }
 0x399   : > { %v6899_v5 = vpop.f32.mrf.mxu1 }
 0x39a   : > { %v6905_v6 = vpop.f32.mrf.mxu0 }
 0x39b   : > { %v9457_v7 = vpop.f32.mrf.mxu1 }
 0x39c   : > { %v9459_v8 = vpop.f32.mrf.mxu0  ;;  %v2218_v60 = vsel %vm2196_vm3, %v9457_v7, -inf  ;;  %v2199_v0 = vpop.xlane.xlu1 %2198 }
 0x39d   : > { %v2221_v9 = vsel %vm2196_vm3, %v9459_v8, -inf  ;;  %v6910_v10 = vpop.f32.mrf.mxu1  ;;  %v2245_v5 = vsub.f32 %v9431_v31, %v2199_v0 }
 0x39e   : > { %7662 = vrot.lane.b32.xlu1 %v9349_v63, %s8788_s10  ;;  %v6916_v11 = vpop.f32.mrf.mxu0  ;;  %2222 = vmax.xlane.f32.xlu0 %v2221_v9 }
 0x39f   : > { %v1825_v12 = vpop.f32.mrf.mxu1  ;;  %v2261_v9 = vmul.f32 1.442695, %v2245_v5 }
 0x3a0   : > { %v1871_v13 = vpop.f32.mrf.mxu0 }
 0x3a1   : > { %v6911_v14 = vpop.f32.mrf.mxu1 }
 0x3a2   : > { %v6917_v15 = vpop.f32.mrf.mxu0 }
 0x3a3   : > { %v9465_v16 = vpop.f32.mrf.mxu1 }
 0x3a4   : > { %v9467_v17 = vpop.f32.mrf.mxu0  ;;  %v2202_v45 = vpop.xlane.xlu0 %2201  ;;  %v2224_v62 = vsel %vm2196_vm3, %v9465_v16, -inf }
 0x3a5   : > { %v2227_v18 = vsel %vm2196_vm3, %v9467_v17, -inf  ;;  %v6922_v19 = vpop.f32.mrf.mxu1  ;;  %v2246_v51 = vsub.f32 %v9435_v37, %v2202_v45 }
 0x3a6   : > { %v6928_v20 = vpop.f32.mrf.mxu0  ;;  %2228 = vmax.xlane.f32.xlu0 %v2227_v18 }
 0x3a7   : > { %v1917_v21 = vpop.f32.mrf.mxu1  ;;  %v2263_v54 = vmul.f32 1.442695, %v2246_v51 }
 0x3a8   : > { %v1963_v22 = vpop.f32.mrf.mxu0 }
 0x3a9   : > { %v6923_v23 = vpop.f32.mrf.mxu1  ;;  %7981 = vpow2.f32 %v2263_v54 }
 0x3aa   : > { %v6929_v24 = vpop.f32.mrf.mxu0  ;;  %7983 = vpow2.f32 %v2261_v9 }
 0x3ab   : > { %v9471_v25 = vpop.f32.mrf.mxu1 }
 0x3ac   : > { %v9473_v26 = vpop.f32.mrf.mxu0  ;;  %v2230_v37 = vsel %vm2196_vm3, %v9471_v25, -inf }
 0x3ad   : > { %v2233_v27 = vsel %vm2196_vm3, %v9473_v26, -inf  ;;  %v6934_v28 = vpop.f32.mrf.mxu1 }
 0x3ae   : > { %v6940_v59 = vpop.f32.mrf.mxu0  ;;  %2234 = vmax.xlane.f32.xlu0 %v2233_v27 }
 0x3af   : > { %v2009_v29 = vpop.f32.mrf.mxu1 }
 0x3b0   : > { %v2055_v30 = vpop.f32.mrf.mxu0 }
 0x3b1   : > { %v6935_v61 = vpop.f32.mrf.mxu1 }
 0x3b2   : > { %v6941_v32 = vpop.f32.mrf.mxu0 }
 0x3b3   : > { %v9477_v34 = vpop.f32.mrf.mxu1 }
 0x3b4   : > { %v9479_v36 = vpop.f32.mrf.mxu0  ;;  %v2236_v1 = vsel %vm2196_vm3, %v9477_v34, -inf }
 0x3b5   : > { %v2239_v39 = vsel %vm2196_vm3, %v9479_v36, -inf  ;;  %v6946_v40 = vpop.f32.mrf.mxu1 }
 0x3b6   : > { %v6952_v41 = vpop.f32.mrf.mxu0  ;;  %2240 = vmax.xlane.f32.xlu0 %v2239_v39  ;;  %v9500_v4 = vpop.eup %7981 }
 0x3b7   : > { %v2101_v43 = vpop.f32.mrf.mxu1  ;;  %v2296_v6 = vsel %vm2196_vm3, %v9500_v4, 0.0  ;;  %v9507_v11 = vpop.eup %7983 }
 0x3b8   : > { %v2147_v44 = vpop.f32.mrf.mxu0  ;;  %v2293_v12 = vsel %vm2196_vm3, %v9507_v11, 0.0 }
 0x3b9   : > { %v6947_v46 = vpop.f32.mrf.mxu1 }
 0x3ba   : > { %v6953_v49 = vpop.f32.mrf.mxu0 }
 0x3bb   : > { %v9485_v50 = vpop.f32.mrf.mxu1 }
 0x3bc   : > { %v2242_v10 = vsel %vm2196_vm3, %v9485_v50, -inf }
 0x3bd   : > { %v6958_v52 = vpop.f32.mrf.mxu1 }
 0x3bf   : > { %v2193_v53 = vpop.f32.mrf.mxu1 }
 0x3c1   : > { %v6959_v56 = vpop.f32.mrf.mxu1 }
 0x3c2   : > { %2213 = vmax.xlane.f32.xlu1 %v2212_v55 }
 0x3c6   : > { %2219 = vmax.xlane.f32.xlu1 %v2218_v60 }
 0x3ca   : > { %2225 = vmax.xlane.f32.xlu1 %v2224_v62 }
 0x3cc   : > { %7667 = vrot.lane.b32.xlu0 %v9349_v63, %s8789_s7 }
 0x3ce   : > { %2231 = vmax.xlane.f32.xlu1 %v2230_v37 }
 0x3d2   : > { %2237 = vmax.xlane.f32.xlu1 %v2236_v1 }
 0x3d6   : > { %2297 = vadd.xlane.f32.xlu1 %v2296_v6 }
 0x3da   : > { %2243 = vmax.xlane.f32.xlu1 %v2242_v10 }
 0x3eb   : > { %7672 = vrot.lane.b32.xlu1 %v9349_v63, %s8790_s11  ;;  %2294 = vadd.xlane.f32.xlu0 %v2293_v12 }
 0x40e   : > { %v2205_v31 = vpop.xlane.xlu0 %2204 }
 0x40f   : > { %v2247_v13 = vsub.f32 %v9439_v42, %v2205_v31 }
 0x411   : > { %v2265_v14 = vmul.f32 1.442695, %v2247_v13 }
 0x413   : > { %7985 = vpow2.f32 %v2265_v14 }
 0x416   : > { %v2208_v15 = vpop.xlane.xlu1 %2207 }
 0x417   : > { %v2211_v18 = vpop.xlane.xlu0 %2210  ;;  %v2248_v19 = vsub.f32 %v9443_v47, %v2208_v15 }
 0x418   : > { %v2249_v20 = vsub.f32 %v9445_v48, %v2211_v18 }
 0x419   : > { %v2267_v21 = vmul.f32 1.442695, %v2248_v19 }
 0x41a   : > { %v2269_v22 = vmul.f32 1.442695, %v2249_v20  ;;  %v9538_v44 = vpop.permute.xlu1 %7662 }
 0x41b   : > { %7987 = vpow2.f32 %v2267_v21 }
 0x41c   : > { %7989 = vpow2.f32 %v2269_v22  ;;  %v7660_v22 = vunpack.i.h.bf16 %v9481_v38 }
 0x41f   : > { %v2217_v24 = vpop.xlane.xlu0 %2216 }
 0x420   : > { %v9516_v23 = vpop.eup %7985  ;;  %v2251_v42 = vsub.f32 %v9453_v58, %v2217_v24 }
 0x421   : > { %v2299_v27 = vsel %vm2196_vm3, %v9516_v23, 0.0 }
 0x422   : > { %2300 = vadd.xlane.f32.xlu0 %v2299_v27  ;;  %v2273_v28 = vmul.f32 1.442695, %v2251_v42  ;;  %v1446_v42 = vpack.c.bf16 %v7660_v22, %v7660_v22 }
 0x424   : > { %7991 = vpow2.f32 %v2273_v28 }
 0x427   : > { %v2223_v30 = vpop.xlane.xlu0 %2222 }
 0x428   : > { %v9521_v59 = vpop.eup %7987  ;;  %v2253_v45 = vsub.f32 %v9459_v8, %v2223_v30 }
 0x429   : > { %v9523_v47 = vpop.eup %7989  ;;  %v2302_v48 = vsel %vm2196_vm3, %v9521_v59, 0.0 }
 0x42a   : > { %v2305_v29 = vsel %vm2196_vm3, %v9523_v47, 0.0  ;;  %2303 = vadd.xlane.f32.xlu1 %v2302_v48  ;;  %v2277_v49 = vmul.f32 1.442695, %v2253_v45 }
 0x42b   : > { %2306 = vadd.xlane.f32.xlu0 %v2305_v29 }
 0x42f   : > { %v2229_v61 = vpop.xlane.xlu0 %2228 }
 0x430   : > { %v2255_v32 = vsub.f32 %v9467_v17, %v2229_v61 }
 0x431   : > { %v9530_v58 = vpop.eup %7991 }
 0x432   : > { %v2281_v39 = vmul.f32 1.442695, %v2255_v32  ;;  %v2311_v40 = vsel %vm2196_vm3, %v9530_v58, 0.0  ;;  %v2532_v32 = vsel %vm2392_vm2, %v1446_v42, 0 }
 0x433   : > { %2312 = vadd.xlane.f32.xlu0 %v2311_v40 }
 0x434   : > { %7993 = vpow2.f32 %v2281_v39 }
 0x437   : > { %v2235_v55 = vpop.xlane.xlu0 %2234 }
 0x438   : > { %v2257_v62 = vsub.f32 %v9473_v26, %v2235_v55 }
 0x43a   : > { %v2285_v0 = vmul.f32 1.442695, %v2257_v62 }
 0x43f   : > { %v2241_v5 = vpop.xlane.xlu0 %2240 }
 0x441   : > { %v9534_v41 = vpop.eup %7993 }
 0x442   : > { %v2323_v43 = vsel %vm2196_vm3, %v9534_v41, 0.0 }
 0x443   : > { %2324 = vadd.xlane.f32.xlu0 %v2323_v43  ;;  %v9575_v48 = vpop.permute.xlu0 %7667 }
 0x44b   : > { %v2214_v46 = vpop.xlane.xlu1 %2213 }
 0x44c   : > { %v2250_v17 = vsub.f32 %v9451_v57, %v2214_v46 }
 0x44e   : > { %v2271_v51 = vmul.f32 1.442695, %v2250_v17  ;;  %v7659_v17 = vunpack.i.l.bf16 %v9481_v38 }
 0x44f   : > { %v2220_v52 = vpop.xlane.xlu1 %2219 }
 0x450   : > { %7995 = vpow2.f32 %v2271_v51  ;;  %v2252_v53 = vsub.f32 %v9457_v7, %v2220_v52  ;;  %v1445_v51 = vpack.c.bf16 %v7659_v17, %v7659_v17 }
 0x451   : > { %7997 = vpow2.f32 %v2277_v49 }
 0x452   : > { %v2275_v54 = vmul.f32 1.442695, %v2252_v53 }
 0x453   : > { %v2226_v56 = vpop.xlane.xlu1 %2225 }
 0x454   : > { %v2254_v60 = vsub.f32 %v9465_v16, %v2226_v56  ;;  %7999 = vpow2.f32 %v2275_v54  ;;  %v2486_v54 = vsel %vm2392_vm2, %v1445_v51, 0 }
 0x456   : > { %v2279_v37 = vmul.f32 1.442695, %v2254_v60  ;;  %v7664_v60 = vunpack.i.l.bf16 %v9538_v44 }
 0x457   : > { %v2232_v8 = vpop.xlane.xlu1 %2231 }
 0x458   : > { %8001 = vpow2.f32 %v2279_v37  ;;  %v2256_v57 = vsub.f32 %v9471_v25, %v2232_v8  ;;  %v2259_v25 = vsub.f32 %v9479_v36, %v2241_v5  ;;  %v1447_v37 = vpack.c.bf16 %v7664_v60, %v7664_v60 }
 0x459   : > { %7677 = vrot.lane.b32.xlu0 %v9349_v63, %s8791_s26  ;;  %8003 = vpow2.f32 %v2285_v0  ;;  %v7669_v5 = vunpack.i.l.bf16 %v9575_v48 }
 0x45a   : > { %v2283_v6 = vmul.f32 1.442695, %v2256_v57 }
 0x45b   : > { %v2238_v1 = vpop.xlane.xlu1 %2237 }
 0x45c   : > { %v2258_v16 = vsub.f32 %v9477_v34, %v2238_v1  ;;  %v2289_v34 = vmul.f32 1.442695, %v2259_v25  ;;  %v7665_v1 = vunpack.i.h.bf16 %v9538_v44 }
 0x45d   : > { %v9548_v7 = vpop.eup %7995 }
 0x45e   : > { %v2308_v26 = vsel %vm2196_vm3, %v9548_v7, 0.0  ;;  %v9553_v9 = vpop.eup %7997  ;;  %v2287_v12 = vmul.f32 1.442695, %v2258_v16 }
 0x45f   : > { %v2298_v10 = vpop.xlane.xlu1 %2297  ;;  %2309 = vadd.xlane.f32.xlu1 %v2308_v26  ;;  %v2317_v31 = vsel %vm2196_vm3, %v9553_v9, 0.0 }
 0x460   : > { %8005 = vrcp.f32 %v2298_v10  ;;  %v1449_v10 = vpack.c.bf16 %v7669_v5, %v7669_v5 }
 0x461   : > { %8007 = vpow2.f32 %v2283_v6  ;;  %v9558_v13 = vpop.eup %7999 }
 0x462   : > { %8009 = vpow2.f32 %v2287_v12  ;;  %v2314_v19 = vsel %vm2196_vm3, %v9558_v13, 0.0 }
 0x463   : > { %2318 = vadd.xlane.f32.xlu1 %v2317_v31  ;;  %v2244_v14 = vpop.xlane.xlu1 %2243  ;;  %8011 = vpow2.f32 %v2289_v34 }
 0x464   : > { %v2260_v15 = vsub.f32 %v9485_v50, %v2244_v14  ;;  %v2670_v14 = vsel %vm2392_vm2, %v1449_v10, 0 }
 0x465   : > { %v9563_v20 = vpop.eup %8001 }
 0x466   : > { %v2291_v18 = vmul.f32 1.442695, %v2260_v15  ;;  %v2320_v36 = vsel %vm2196_vm3, %v9563_v20, 0.0  ;;  %v9567_v21 = vpop.eup %8003 }
 0x467   : > { %2315 = vadd.xlane.f32.xlu1 %v2314_v19  ;;  %v2329_v50 = vsel %vm2196_vm3, %v9567_v21, 0.0 }
 0x468   : > { %8013 = vpow2.f32 %v2291_v18 }
 0x46b   : > { %2321 = vadd.xlane.f32.xlu1 %v2320_v36 }
 0x46d   : > { %v8006_v24 = vpop.eup %8005 }
 0x46e   : > { %v9572_v27 = vpop.eup %8007  ;;  %v2358_v28 = vmul.f32 %v8006_v24, %v9500_v4 }
 0x46f   : > { %2330 = vadd.xlane.f32.xlu1 %v2329_v50  ;;  %v2326_v30 = vsel %vm2196_vm3, %v9572_v27, 0.0  ;;  %v9579_v61 = vpop.eup %8009 }
 0x470   : > { %v2374_v29 = vpack.c.bf16 %v2358_v28, %v2358_v28  ;;  %v9585_v39 = vpop.eup %8011  ;;  %v2332_v40 = vsel %vm2196_vm3, %v9579_v61, 0.0 }
 0x471   : > { %v2335_v45 = vsel %vm2196_vm3, %v9585_v39, 0.0 }
 0x472   : > { %6969 = vmatmul.mubr.msk.bf16.vlgmr.msra.gmra.mxu1 %vm2196_vm3, %v2374_v29 }
 0x473   : > { %2327 = vadd.xlane.f32.xlu1 %v2326_v30  ;;  %6979 = vmatpush3.bf16.msra.mxu1 %v2532_v32 }
 0x474   : > { %6980 = vmatprep.mubr.msk.bf16.mxu1 %vm8786_vm0, %v8785_v3  ;;  %v2295_v4 = vpop.xlane.xlu0 %2294  ;;  %6990 = vmatprep.subr.bf16.mxu1 %v8785_v3 }
 0x475   : > { %8015 = vrcp.f32 %v2295_v4  ;;  %v9590_v43 = vpop.eup %8013 }
 0x476   : > { %v2338_v46 = vsel %vm2196_vm3, %v9590_v43, 0.0 }
 0x477   : > { %2333 = vadd.xlane.f32.xlu1 %v2332_v40 }
 0x478   : > { %2336 = vadd.xlane.f32.xlu0 %v2335_v45 }
 0x47b   : > { %2339 = vadd.xlane.f32.xlu1 %v2338_v46 }
 0x482   : > { %v8016_v49 = vpop.eup %8015 }
 0x483   : > { %v2357_v52 = vmul.f32 %v8016_v49, %v9507_v11  ;;  %v9607_v11 = vpop.permute.xlu1 %7672 }
 0x484   : > { %v7674_v34 = vunpack.i.l.bf16 %v9607_v11  ;;  %v7675_v49 = vunpack.i.h.bf16 %v9607_v11 }
 0x485   : > { %v2373_v53 = vpack.c.bf16 %v2357_v52, %v2357_v52 }
 0x487   : > { %6963 = vmatmul.mubr.msk.bf16.vlgmr.msra.gmra.mxu0 %vm2196_vm3, %v2373_v53 }
 0x488   : > { %6973 = vmatpush3.bf16.msra.mxu0 %v2486_v54  ;;  %6974 = vmatprep.mubr.msk.bf16.mxu0 %vm8786_vm0, %v8785_v3 }
 0x489   : > { %6984 = vmatprep.subr.bf16.mxu0 %v8785_v3 }
 0x48c   : > { %7682 = vrot.lane.b32.xlu1 %v9349_v63, %s8792_s3 }
 0x48e   : > { %7687 = vrot.lane.b32.xlu0 %v9349_v63, %s8793_s29  ;;  %v2578_v63 = vsel %vm2392_vm2, %v1447_v37, 0 }
 0x4ab   : > { %v2301_v38 = vpop.xlane.xlu0 %2300 }
 0x4ac   : > { %8017 = vrcp.f32 %v2301_v38  ;;  %v1452_v38 = vpack.c.bf16 %v7675_v49, %v7675_v49 }
 0x4b3   : > { %v2304_v55 = vpop.xlane.xlu1 %2303 }
 0x4b4   : > { %v2307_v56 = vpop.xlane.xlu0 %2306  ;;  %8019 = vrcp.f32 %v2304_v55 }
 0x4b5   : > { %8021 = vrcp.f32 %v2307_v56 }
 0x4b9   : > { %v8018_v62 = vpop.eup %8017 }
 0x4ba   : > { %v2359_v8 = vmul.f32 %v8018_v62, %v9516_v23  ;;  %v1448_v23 = vpack.c.bf16 %v7665_v1, %v7665_v1 }
 0x4bc   : > { %v2375_v0 = vpack.c.bf16 %v2359_v8, %v2359_v8  ;;  %v2313_v57 = vpop.xlane.xlu0 %2312  ;;  %v2624_v44 = vsel %vm2392_vm2, %v1448_v23, 0 }
 0x4bd   : > { %8023 = vrcp.f32 %v2313_v57 }
 0x4be   : > { %6975 = vmatmul.mubr.msk.bf16.vlgmr.msra.gmra.mxu0 %vm2196_vm3, %v2375_v0  ;;  %v2808_v0 = vsel %vm2392_vm2, %v1452_v38, 0 }
 0x4bf   : > { %6985 = vmatpush3.bf16.msra.mxu0 %v2578_v63  ;;  %6986 = vmatprep.mubr.msk.bf16.mxu0 %vm8786_vm0, %v8785_v3 }
 0x4c0   : > { %6996 = vmatprep.subr.bf16.mxu0 %v8785_v3 }
 0x4c1   : > { %v8020_v6 = vpop.eup %8019 }
 0x4c2   : > { %v8022_v16 = vpop.eup %8021  ;;  %v2360_v26 = vmul.f32 %v8020_v6, %v9521_v59 }
 0x4c3   : > { %v2361_v25 = vmul.f32 %v8022_v16, %v9523_v47  ;;  %v1451_v47 = vpack.c.bf16 %v7674_v34, %v7674_v34 }
 0x4c4   : > { %v2376_v12 = vpack.c.bf16 %v2360_v26, %v2360_v26 }
 0x4c5   : > { %v2377_v31 = vpack.c.bf16 %v2361_v25, %v2361_v25  ;;  %v2762_v19 = vsel %vm2392_vm2, %v1451_v47, 0 }
 0x4c6   : > { %6981 = vmatmul.mubr.msk.bf16.vlgmr.msra.gmra.mxu1 %vm2196_vm3, %v2376_v12 }
 0x4c7   : > { %6987 = vmatmul.mubr.msk.bf16.vlgmr.msra.gmra.mxu0 %vm2196_vm3, %v2377_v31  ;;  %6991 = vmatpush3.bf16.msra.mxu1 %v2624_v44 }
 0x4c8   : > { %6997 = vmatpush3.bf16.msra.mxu0 %v2670_v14  ;;  %6998 = vmatprep.mubr.msk.bf16.mxu0 %vm8786_vm0, %v8785_v3 }
 0x4c9   : > { %7008 = vmatprep.subr.bf16.mxu0 %v8785_v3  ;;  %6992 = vmatprep.mubr.msk.bf16.mxu1 %vm8786_vm0, %v8785_v3 }
 0x4ca   : > { %7002 = vmatprep.subr.bf16.mxu1 %v8785_v3  ;;  %v8024_v59 = vpop.eup %8023 }
 0x4cb   : > { %v2363_v15 = vmul.f32 %v8024_v59, %v9530_v58  ;;  %v7670_v58 = vunpack.i.h.bf16 %v9575_v48 }
 0x4cc   : > { %v2325_v24 = vpop.xlane.xlu0 %2324 }
 0x4cd   : > { %v2379_v18 = vpack.c.bf16 %v2363_v15, %v2363_v15  ;;  %v1450_v30 = vpack.c.bf16 %v7670_v58, %v7670_v58 }
 0x4cf   : > { %6999 = vmatmul.mubr.msk.bf16.vlgmr.msra.gmra.mxu0 %vm2196_vm3, %v2379_v18  ;;  %v2716_v17 = vsel %vm2392_vm2, %v1450_v30, 0 }
 0x4d0   : > { %7009 = vmatpush3.bf16.msra.mxu0 %v2762_v19  ;;  %7010 = vmatprep.mubr.msk.bf16.mxu0 %vm8786_vm0, %v8785_v3  ;;  %v7678_v42 = vpop.permute.xlu0 %7677 }
 0x4d1   : > { %7020 = vmatprep.subr.bf16.mxu0 %v8785_v3  ;;  %v7679_v32 = vunpack.i.l.bf16 %v7678_v42  ;;  %v7680_v8 = vunpack.i.h.bf16 %v7678_v42 }
 0x4d3   : > { %v1453_v51 = vpack.c.bf16 %v7679_v32, %v7679_v32  ;;  %v1454_v1 = vpack.c.bf16 %v7680_v8, %v7680_v8 }
 0x4d5   : > { %v2854_v11 = vsel %vm2392_vm2, %v1453_v51, 0  ;;  %v2900_v31 = vsel %vm2392_vm2, %v1454_v1, 0 }
 0x4e8   : > { %v2310_v36 = vpop.xlane.xlu1 %2309 }
 0x4e9   : > { %8025 = vrcp.f32 %v2310_v36 }
 0x4ec   : > { %v2319_v22 = vpop.xlane.xlu1 %2318 }
 0x4ed   : > { %8027 = vrcp.f32 %v2319_v22 }
 0x4ee   : > { %8029 = vrcp.f32 %v2325_v24 }
 0x4f0   : > { %v2316_v50 = vpop.xlane.xlu1 %2315 }
 0x4f1   : > { %8031 = vrcp.f32 %v2316_v50 }
 0x4f4   : > { %v2322_v28 = vpop.xlane.xlu1 %2321 }
 0x4f5   : > { %8033 = vrcp.f32 %v2322_v28 }
 0x4f6   : > { %v8026_v29 = vpop.eup %8025 }
 0x4f7   : > { %v2362_v4 = vmul.f32 %v8026_v29, %v9548_v7 }
 0x4f8   : > { %v2331_v40 = vpop.xlane.xlu1 %2330 }
 0x4f9   : > { %v2378_v45 = vpack.c.bf16 %v2362_v4, %v2362_v4  ;;  %8035 = vrcp.f32 %v2331_v40 }
 0x4fa   : > { %v8028_v46 = vpop.eup %8027 }
 0x4fb   : > { %6993 = vmatmul.mubr.msk.bf16.vlgmr.msra.gmra.mxu1 %vm2196_vm3, %v2378_v45  ;;  %v2365_v48 = vmul.f32 %v8028_v46, %v9553_v9  ;;  %v8030_v53 = vpop.eup %8029 }
 0x4fc   : > { %7003 = vmatpush3.bf16.msra.mxu1 %v2716_v17  ;;  %v2328_v52 = vpop.xlane.xlu1 %2327  ;;  %7004 = vmatprep.mubr.msk.bf16.mxu1 %vm8786_vm0, %v8785_v3  ;;  %v2367_v60 = vmul.f32 %v8030_v53, %v9534_v41 }
 0x4fd   : > { %8037 = vrcp.f32 %v2328_v52  ;;  %v2381_v7 = vpack.c.bf16 %v2365_v48, %v2365_v48  ;;  %7014 = vmatprep.subr.bf16.mxu1 %v8785_v3 }
 0x4fe   : > { %v8032_v54 = vpop.eup %8031  ;;  %v2383_v57 = vpack.c.bf16 %v2367_v60, %v2367_v60 }
 0x4ff   : > { %7011 = vmatmul.mubr.msk.bf16.vlgmr.msra.gmra.mxu0 %vm2196_vm3, %v2381_v7  ;;  %v2364_v55 = vmul.f32 %v8032_v54, %v9558_v13 }
 0x500   : > { %7021 = vmatpush3.bf16.msra.mxu0 %v2854_v11  ;;  %v2334_v9 = vpop.xlane.xlu1 %2333  ;;  %7022 = vmatprep.mubr.msk.bf16.mxu0 %vm8786_vm0, %v8785_v3 }
 0x501   : > { %v2380_v56 = vpack.c.bf16 %v2364_v55, %v2364_v55  ;;  %7032 = vmatprep.subr.bf16.mxu0 %v8785_v3  ;;  %v2337_v37 = vpop.xlane.xlu0 %2336 }
 0x502   : > { %v8034_v62 = vpop.eup %8033  ;;  %8039 = vrcp.f32 %v2337_v37 }
 0x503   : > { %7005 = vmatmul.mubr.msk.bf16.vlgmr.msra.gmra.mxu1 %vm2196_vm3, %v2380_v56  ;;  %8041 = vrcp.f32 %v2334_v9  ;;  %v2366_v41 = vmul.f32 %v8034_v62, %v9563_v20 }
 0x504   : > { %7015 = vmatpush3.bf16.msra.mxu1 %v2808_v0  ;;  %v2340_v13 = vpop.xlane.xlu1 %2339  ;;  %7016 = vmatprep.mubr.msk.bf16.mxu1 %vm8786_vm0, %v8785_v3 }
 0x505   : > { %7026 = vmatprep.subr.bf16.mxu1 %v8785_v3  ;;  %v7688_v63 = vpop.permute.xlu0 %7687  ;;  %v2382_v26 = vpack.c.bf16 %v2366_v41, %v2366_v41  ;;  %8043 = vrcp.f32 %v2340_v13 }
 0x506   : > { %v8036_v5 = vpop.eup %8035  ;;  %v7689_v16 = vunpack.i.l.bf16 %v7688_v63  ;;  %v7690_v36 = vunpack.i.h.bf16 %v7688_v63  ;;  %v7893_v63 = vld [vmem:[%s9704_s5 + $0x38] sm:$0xff]  }
 0x507   : > { %7023 = vmatmul.mubr.msk.bf16.vlgmr.msra.gmra.mxu0 %vm2196_vm3, %v2383_v57  ;;  %v2369_v20 = vmul.f32 %v8036_v5, %v9567_v21 }
 0x508   : > { %v7683_v6 = vpop.permute.xlu1 %7682  ;;  %7034 = vmatprep.mubr.msk.bf16.mxu0 %vm8786_vm0, %v8785_v3  ;;  %v1457_v44 = vpack.c.bf16 %v7689_v16, %v7689_v16  ;;  %v1458_v50 = vpack.c.bf16 %v7690_v36, %v7690_v36 }
 0x509   : > { %v7684_v23 = vunpack.i.l.bf16 %v7683_v6  ;;  %v7685_v25 = vunpack.i.h.bf16 %v7683_v6  ;;  %v2385_v47 = vpack.c.bf16 %v2369_v20, %v2369_v20  ;;  %v7895_v20 = vld [vmem:[%s9704_s5 + $0x28] sm:$0xff]  }
 0x50a   : > { %v8038_v10 = vpop.eup %8037  ;;  %v3038_v21 = vsel %vm2392_vm2, %v1457_v44, 0 }
 0x50b   : > { %v1455_v12 = vpack.c.bf16 %v7684_v23, %v7684_v23  ;;  %7017 = vmatmul.mubr.msk.bf16.vlgmr.msra.gmra.mxu1 %vm2196_vm3, %v2382_v26  ;;  %v2368_v34 = vmul.f32 %v8038_v10, %v9572_v27  ;;  %v1456_v59 = vpack.c.bf16 %v7685_v25, %v7685_v25  ;;  %v7894_v10 = vld [vmem:[%s9704_s5 + $0x30] sm:$0xff]  }
 0x50c   : > { %7027 = vmatpush3.bf16.msra.mxu1 %v2900_v31  ;;  %7028 = vmatprep.mubr.msk.bf16.mxu1 %vm8786_vm0, %v8785_v3 }
 0x50d   : > { %v2946_v14 = vsel %vm2392_vm2, %v1455_v12, 0  ;;  %7038 = vmatprep.subr.bf16.mxu1 %v8785_v3  ;;  %v2384_v18 = vpack.c.bf16 %v2368_v34, %v2368_v34  ;;  %v2992_v27 = vsel %vm2392_vm2, %v1456_v59, 0 }
 0x50e   : > { %7033 = vmatpush3.bf16.msra.mxu0 %v2946_v14 }
 0x50f   : > { %7044 = vmatprep.subr.bf16.mxu0 %v8785_v3  ;;  %v8040_v15 = vpop.eup %8039 }
 0x510   : > { %v8042_v19 = vpop.eup %8041  ;;  %v2371_v22 = vmul.f32 %v8040_v15, %v9585_v39  ;;  %v3084_v39 = vsel %vm2392_vm2, %v1458_v50, 0 }
 0x511   : > { %7035 = vmatmul.mubr.msk.bf16.vlgmr.msra.gmra.mxu0 %vm2196_vm3, %v2385_v47  ;;  %v2370_v24 = vmul.f32 %v8042_v19, %v9579_v61 }
 0x512   : > { %7045 = vmatpush3.bf16.msra.mxu0 %v3038_v21  ;;  %7046 = vmatprep.mubr.msk.bf16.mxu0 %vm8786_vm0, %v8785_v3  ;;  %v2387_v58 = vpack.c.bf16 %v2371_v22, %v2371_v22  ;;  %v8044_v28 = vpop.eup %8043  ;;  %v7896_v21 = vld [vmem:[%s9704_s5 + $0x20] sm:$0xff]  }
 0x513   : > { %7029 = vmatmul.mubr.msk.bf16.vlgmr.msra.gmra.mxu1 %vm2196_vm3, %v2384_v18  ;;  %7056 = vmatprep.subr.bf16.mxu0 %v8785_v3  ;;  %v2386_v42 = vpack.c.bf16 %v2370_v24, %v2370_v24  ;;  %v2372_v29 = vmul.f32 %v8044_v28, %v9590_v43  ;;  %v7898_v28 = vld [vmem:[%s9704_s5 + $0x10] sm:$0xff]  }
 0x514   : > { %7039 = vmatpush3.bf16.msra.mxu1 %v2992_v27  ;;  %7040 = vmatprep.mubr.msk.bf16.mxu1 %vm8786_vm0, %v8785_v3  ;;  %v7897_v27 = vld [vmem:[%s9704_s5 + $0x18] sm:$0xff]  }
 0x515   : > { %7050 = vmatprep.subr.bf16.mxu1 %v8785_v3  ;;  %v2388_v61 = vpack.c.bf16 %v2372_v29, %v2372_v29 }
 0x519   : > { %7047 = vmatmul.mubr.msk.bf16.vlgmr.msra.gmra.mxu0 %vm2196_vm3, %v2387_v58 }
 0x51a   : > { %7072 = vmatprep.mubr.msk.bf16.mxu0 %vm8786_vm0, %v8785_v3  ;;  %7057 = vmatpush3.bf16.msra.mxu0 %v7893_v63 }
 0x51b   : > { %7041 = vmatmul.mubr.msk.bf16.vlgmr.msra.gmra.mxu1 %vm2196_vm3, %v2386_v42  ;;  %7058 = vmatprep.subr.bf16.mxu0 %v8785_v3 }
 0x51c   : > { %7051 = vmatpush3.bf16.msra.mxu1 %v3084_v39  ;;  %7052 = vmatprep.mubr.msk.bf16.mxu1 %vm8786_vm0, %v8785_v3 }
 0x51d   : > { %7076 = vmatprep.subr.bf16.mxu1 %v8785_v3 }
 0x51e   : > { %7059 = vmatpush3.bf16.msra.mxu0 %v7894_v10 }
 0x51f   : > { %7060 = vmatprep.subr.bf16.mxu0 %v8785_v3 }
 0x522   : > { %7061 = vmatpush3.bf16.msra.mxu0 %v7895_v20 }
 0x523   : > { %7053 = vmatmul.mubr.msk.bf16.vlgmr.msra.gmra.mxu1 %vm2196_vm3, %v2388_v61  ;;  %7062 = vmatprep.subr.bf16.mxu0 %v8785_v3 }
 0x524   : > { %7092 = vmatprep.mubr.msk.bf16.mxu1 %vm8786_vm0, %v8785_v3 }
 0x526   : > { %7063 = vmatpush3.bf16.msra.mxu0 %v7896_v21 }
 0x527   : > { %7064 = vmatprep.subr.bf16.mxu0 %v8785_v3 }
 0x52a   : > { %7065 = vmatpush3.bf16.msra.mxu0 %v7897_v27 }
 0x52b   : > { %7066 = vmatprep.subr.bf16.mxu0 %v8785_v3 }
 0x52e   : > { %7067 = vmatpush3.bf16.msra.mxu0 %v7898_v28 }
 0x52f   : > { %7068 = vmatprep.subr.bf16.mxu0 %v8785_v3 }
 0x532   : > { %v9695_v30 = vpop.f32.mrf.mxu1 }
 0x534   : > { %v6970_v32 = vpop.f32.mrf.mxu1 }
 0x535   : > { %v7899_v32 = vld [vmem:[%s9704_s5 + $0x8] sm:$0xff]  }
 0x536   : > { %v2479_v4 = vpop.f32.mrf.mxu1  ;;  %7069 = vmatpush3.bf16.msra.mxu0 %v7899_v32 }
 0x537   : > { %7070 = vmatprep.subr.bf16.mxu0 %v8785_v3 }
 0x538   : > { %v6971_v40 = vpop.f32.mrf.mxu1 }
 0x547   : > { %v9697_v45 = vpop.f32.mrf.mxu0 }
 0x549   : > { %v6964_v46 = vpop.f32.mrf.mxu0 }
 0x54b   : > { %v2433_v17 = vpop.f32.mrf.mxu0 }
 0x54d   : > { %v6965_v49 = vpop.f32.mrf.mxu0 }
 0x57e   : > { %v2522_v51 = vpop.f32.mrf.mxu0 }
 0x580   : > { %v6976_v43 = vpop.f32.mrf.mxu0 }
 0x582   : > { %v2525_v48 = vpop.f32.mrf.mxu0 }
 0x583   : > { %v7900_v48 = vld [vmem:[%s9704_s5] sm:$0xff]   ;;  %s9752_s5 = scalar_lea.vmem [#allocation12], %s9701_s16 }
 0x584   : > { %v6977_v52 = vpop.f32.mrf.mxu0  ;;  %7071 = vmatpush3.bf16.msra.mxu0 %v7900_v48  ;;  %v7906_v48 = vld [vmem:[%s9755_s6 + $0x64] ss:$8 sps:$4 sm:$0xff]  }
 0x586   : > { %v2568_v53 = vpop.f32.mrf.mxu1 }
 0x587   : > { %v7691_v7 = vpack.i.bf16 %v2568_v53, %v2522_v51  ;;  %v2614_v54 = vpop.f32.mrf.mxu0 }
 0x588   : > { %v6982_v38 = vpop.f32.mrf.mxu1 }
 0x589   : > { %v6988_v11 = vpop.f32.mrf.mxu0  ;;  %7692 = vrot.lane.b32.xlu0 %v7691_v7, %s8793_s29 }
 0x58a   : > { %v2571_v55 = vpop.f32.mrf.mxu1 }
 0x58b   : > { %v2617_v9 = vpop.f32.mrf.mxu0 }
 0x58c   : > { %v6983_v56 = vpop.f32.mrf.mxu1 }
 0x58d   : > { %v6989_v60 = vpop.f32.mrf.mxu0 }
 0x58f   : > { %v2706_v62 = vpop.f32.mrf.mxu0 }
 0x591   : > { %v7000_v37 = vpop.f32.mrf.mxu0 }
 0x593   : > { %v2709_v8 = vpop.f32.mrf.mxu0 }
 0x595   : > { %v7001_v0 = vpop.f32.mrf.mxu0 }
 0x5bb   : > { %v2660_v13 = vpop.f32.mrf.mxu1 }
 0x5bc   : > { %v7696_v57 = vpack.i.bf16 %v2660_v13, %v2614_v54 }
 0x5bd   : > { %v6994_v41 = vpop.f32.mrf.mxu1 }
 0x5be   : > { %7697 = vrot.lane.b32.xlu0 %v7696_v57, %s8792_s3 }
 0x5bf   : > { %v2663_v1 = vpop.f32.mrf.mxu1  ;;  %v2798_v5 = vpop.f32.mrf.mxu0 }
 0x5c1   : > { %v6995_v6 = vpop.f32.mrf.mxu1  ;;  %v7012_v16 = vpop.f32.mrf.mxu0 }
 0x5c3   : > { %v2752_v23 = vpop.f32.mrf.mxu1  ;;  %v2801_v26 = vpop.f32.mrf.mxu0 }
 0x5c4   : > { %v7701_v25 = vpack.i.bf16 %v2752_v23, %v2706_v62 }
 0x5c5   : > { %v7006_v12 = vpop.f32.mrf.mxu1  ;;  %v7013_v31 = vpop.f32.mrf.mxu0 }
 0x5c6   : > { %7702 = vrot.lane.b32.xlu0 %v7701_v25, %s8791_s26 }
 0x5c7   : > { %v2755_v44 = vpop.f32.mrf.mxu1  ;;  %v2890_v14 = vpop.f32.mrf.mxu0 }
 0x5c9   : > { %v7007_v34 = vpop.f32.mrf.mxu1  ;;  %v7024_v59 = vpop.f32.mrf.mxu0 }
 0x5cb   : > { %v2844_v47 = vpop.f32.mrf.mxu1  ;;  %v2893_v15 = vpop.f32.mrf.mxu0 }
 0x5cc   : > { %v7706_v18 = vpack.i.bf16 %v2844_v47, %v2798_v5 }
 0x5cd   : > { %v7018_v19 = vpop.f32.mrf.mxu1  ;;  %v7025_v36 = vpop.f32.mrf.mxu0 }
 0x5ce   : > { %7707 = vrot.lane.b32.xlu1 %v7706_v18, %s8790_s11 }
 0x5cf   : > { %v2847_v22 = vpop.f32.mrf.mxu1 }
 0x5d1   : > { %v7019_v24 = vpop.f32.mrf.mxu1  ;;  %v2982_v50 = vpop.f32.mrf.mxu0 }
 0x5d3   : > { %v2936_v58 = vpop.f32.mrf.mxu1  ;;  %v7036_v42 = vpop.f32.mrf.mxu0 }
 0x5d4   : > { %v7711_v39 = vpack.i.bf16 %v2936_v58, %v2890_v14  ;;  %v6522_v42 = vld [vmem:[%s3222_s24] ss:$0 sm:$0xff]  ;;  %s10450_s24 = sld [smem:[#allocation58_spill]] }
 0x5d5   : > { %v7030_v29 = vpop.f32.mrf.mxu1  ;;  %v2985_v61 = vpop.f32.mrf.mxu0 }
 0x5d6   : > { %7712 = vrot.lane.b32.xlu0 %v7711_v39, %s8789_s7  ;;  %v8121_v61 = vld [vmem:[#allocation2] sm:$0xff] }
 0x5d7   : > { %v2939_v4 = vpop.f32.mrf.mxu1  ;;  %v7037_v40 = vpop.f32.mrf.mxu0 }
 0x5d9   : > { %v7031_v46 = vpop.f32.mrf.mxu1  ;;  %v3074_v17 = vpop.f32.mrf.mxu0 }
 0x5db   : > { %v3028_v49 = vpop.f32.mrf.mxu1  ;;  %v7048_v51 = vpop.f32.mrf.mxu0 }
 0x5dc   : > { %v7716_v43 = vpack.i.bf16 %v3028_v49, %v2982_v50  ;;  %v7901_v51 = vld [vmem:[%s9755_s6 + $0x70] ss:$8 sps:$4 sm:$0xff]  }
 0x5dd   : > { %v7042_v52 = vpop.f32.mrf.mxu1  ;;  %v3077_v53 = vpop.f32.mrf.mxu0 }
 0x5de   : > { %7717 = vrot.lane.b32.xlu1 %v7716_v43, %s8788_s10  ;;  %v7903_v43 = vld [vmem:[%s9755_s6 + $0x74] ss:$8 sps:$4 sm:$0xff]   ;;  %v7904_v52 = vld [vmem:[%s9755_s6 + $0x60] ss:$8 sps:$4 sm:$0xff]  }
 0x5df   : > { %v3031_v7 = vpop.f32.mrf.mxu1  ;;  %v7049_v54 = vpop.f32.mrf.mxu0  ;;  %3594 = vmatprep.subr.bf16.mxu0 %v7903_v43  ;;  %v7909_v53 = vld [vmem:[%s9755_s6 + $0x54] ss:$8 sps:$4 sm:$0xff]  }
 0x5e0   : > { %v7907_v7 = vld [vmem:[%s9755_s6 + $0x50] ss:$8 sps:$4 sm:$0xff]   ;;  %v7912_v54 = vld [vmem:[%s9755_s6 + $0x44] ss:$8 sps:$4 sm:$0xff]  }
 0x5e1   : > { %v7043_v38 = vpop.f32.mrf.mxu1 }
 0x5e2   : > { %v7910_v38 = vld [vmem:[%s9755_s6 + $0x40] ss:$8 sps:$4 sm:$0xff]  }
 0x5e3   : > { %v3120_v11 = vpop.f32.mrf.mxu1 }
 0x5e4   : > { %v7721_v55 = vpack.i.bf16 %v3120_v11, %v3074_v17  ;;  %v8122_v17 = vld [vmem:[#allocation2 + $0x8] sm:$0xff]  ;;  %v7925_v11 = vld [vmem:[%s9752_s5 + $0x38] sm:$0xff]  }
 0x5e5   : > { %v7054_v9 = vpop.f32.mrf.mxu1  ;;  %7077 = vmatpush3.bf16.msra.mxu1 %v7925_v11 }
 0x5e6   : > { %7722 = vrot.lane.b32.xlu0 %v7721_v55, %s8787_s13  ;;  %v7915_v55 = vld [vmem:[%s9755_s6 + $0x34] ss:$8 sps:$4 sm:$0xff]   ;;  %7078 = vmatprep.subr.bf16.mxu1 %v8785_v3  ;;  %v7913_v9 = vld [vmem:[%s9755_s6 + $0x30] ss:$8 sps:$4 sm:$0xff]  }
 0x5e7   : > { %v3123_v56 = vpop.f32.mrf.mxu1 }
 0x5e8   : > { %v7918_v56 = vld [vmem:[%s9755_s6 + $0x24] ss:$8 sps:$4 sm:$0xff]  }
 0x5e9   : > { %v7055_v60 = vpop.f32.mrf.mxu1 }
 0x5ea   : > { %v7916_v60 = vld [vmem:[%s9755_s6 + $0x20] ss:$8 sps:$4 sm:$0xff]  }
 0x5fb   : > { %v7693_v62 = vpop.permute.xlu0 %7692 }
 0x5fc   : > { %v7695_v13 = vunpack.i.h.bf16 %v7693_v62  ;;  %v7694_v57 = vunpack.i.l.bf16 %v7693_v62  ;;  %v7921_v62 = vld [vmem:[%s9755_s6 + $0x14] ss:$8 sps:$4 sm:$0xff]  }
 0x5fe   : > { %v3183_v10 = vsel %vm1459_vm1, %v9695_v30, %v7695_v13  ;;  %v3182_v25 = vsel %vm1459_vm1, %v9697_v45, %v7694_v57 }
 0x630   : > { %v7698_v37 = vpop.permute.xlu0 %7697 }
 0x631   : > { %v7700_v41 = vunpack.i.h.bf16 %v7698_v37  ;;  %v7699_v63 = vunpack.i.l.bf16 %v7698_v37  ;;  %v7919_v37 = vld [vmem:[%s9755_s6 + $0x10] ss:$8 sps:$4 sm:$0xff]  }
 0x633   : > { %v3186_v20 = vsel %vm3184_vm4, %v3183_v10, %v7700_v41  ;;  %v3185_v44 = vsel %vm3184_vm4, %v3182_v25, %v7699_v63  ;;  %v7926_v25 = vld [vmem:[%s9752_s5 + $0x30] sm:$0xff]  }
 0x634   : > { %7079 = vmatpush3.bf16.msra.mxu1 %v7926_v25 }
 0x635   : > { %7080 = vmatprep.subr.bf16.mxu1 %v8785_v3 }
 0x638   : > { %v7703_v8 = vpop.permute.xlu0 %7702 }
 0x639   : > { %v7705_v5 = vunpack.i.h.bf16 %v7703_v8  ;;  %v7704_v6 = vunpack.i.l.bf16 %v7703_v8  ;;  %v7924_v8 = vld [vmem:[%s9755_s6 + $0x4] ss:$8 sps:$4 sm:$0xff]  }
 0x63b   : > { %v3189_v59 = vsel %vm3187_vm5, %v3186_v20, %v7705_v5  ;;  %v3188_v47 = vsel %vm3187_vm5, %v3185_v44, %v7704_v6  ;;  %v7929_v20 = vld [vmem:[%s9752_s5 + $0x18] sm:$0xff]   ;;  %v7930_v44 = vld [vmem:[%s9752_s5 + $0x10] sm:$0xff]  }
 0x640   : > { %v7708_v0 = vpop.permute.xlu1 %7707 }
 0x641   : > { %v7710_v23 = vunpack.i.h.bf16 %v7708_v0  ;;  %v7709_v26 = vunpack.i.l.bf16 %v7708_v0  ;;  %v7922_v0 = vld [vmem:[%s9755_s6] ss:$8 sps:$4 sm:$0xff]   ;;  %s3344_s6 = scalar_lea.vmem %s10450_s24, %s10448_s14  ;;  %s3383_s24 = scalar_lea.vmem [#allocation14], %s10448_s14 }
 0x643   : > { %v3192_v15 = vsel %vm3190_vm6, %v3189_v59, %v7710_v23  ;;  %v3191_v30 = vsel %vm3190_vm6, %v3188_v47, %v7709_v26  ;;  %v1010_v23 = vld [vmem:[%s9218_s22] sm:$0xff]  ;;  %v1011_v26 = vld [vmem:[%s9218_s22 + $0x8] sm:$0xff]  ;;  %s6545_s22 = sshll.u32 %s10448_s14, 1 }
 0x644   : > { %v3480_v10 = vpack.c.bf16 %v1011_v26, %v1010_v23  ;;  %s3501_s9 = scalar_lea.vmem [#allocation17], %s6545_s22 }
 0x648   : > { %v7713_v1 = vpop.permute.xlu0 %7712 }
 0x649   : > { %v7715_v12 = vunpack.i.h.bf16 %v7713_v1  ;;  %v7714_v31 = vunpack.i.l.bf16 %v7713_v1 }
 0x64b   : > { %v3195_v21 = vsel %vm3193_vm7, %v3192_v15, %v7715_v12  ;;  %v3194_v18 = vsel %vm3193_vm7, %v3191_v30, %v7714_v31  ;;  %v7927_v12 = vld [vmem:[%s9752_s5 + $0x28] sm:$0xff]   ;;  %v7928_v31 = vld [vmem:[%s9752_s5 + $0x20] sm:$0xff]  }
 0x64c   : > { %7081 = vmatpush3.bf16.msra.mxu1 %v7927_v12 }
 0x64d   : > { %7082 = vmatprep.subr.bf16.mxu1 %v8785_v3 }
 0x650   : > { %v7718_v16 = vpop.permute.xlu1 %7717  ;;  %7083 = vmatpush3.bf16.msra.mxu1 %v7928_v31 }
 0x651   : > { %v7720_v14 = vunpack.i.h.bf16 %v7718_v16  ;;  %v7719_v34 = vunpack.i.l.bf16 %v7718_v16  ;;  %7084 = vmatprep.subr.bf16.mxu1 %v8785_v3 }
 0x653   : > { %v3198_v27 = vsel %vm3196_vm8, %v3195_v21, %v7720_v14  ;;  %v3197_v22 = vsel %vm3196_vm8, %v3194_v18, %v7719_v34  ;;  %v7931_v14 = vld [vmem:[%s9752_s5 + $0x8] sm:$0xff]   ;;  %v7932_v34 = vld [vmem:[%s9752_s5] sm:$0xff]   ;;  %s3354_s5 = scalar_lea.vmem [#allocation11], %s10448_s14 }
 0x654   : > { %7085 = vmatpush3.bf16.msra.mxu1 %v7929_v20 }
 0x655   : > { %7086 = vmatprep.subr.bf16.mxu1 %v8785_v3 }
 0x658   : > { %v7723_v45 = vpop.permute.xlu0 %7722  ;;  %7087 = vmatpush3.bf16.msra.mxu1 %v7930_v44 }
 0x659   : > { %v7725_v19 = vunpack.i.h.bf16 %v7723_v45  ;;  %v7724_v36 = vunpack.i.l.bf16 %v7723_v45  ;;  %7088 = vmatprep.subr.bf16.mxu1 %v8785_v3 }
 0x65b   : > { %v3201_v24 = vsel %vm3199_vm9, %v3198_v27, %v7725_v19  ;;  %v3200_v50 = vsel %vm3199_vm9, %v3197_v22, %v7724_v36  ;;  %v6531_v36 = vld [vmem:[%s3344_s6] ss:$0 sm:$0xff] }
 0x65c   : > { %v3202_v58 = vpack.c.bf16 %v3201_v24, %v3200_v50  ;;  %7089 = vmatpush3.bf16.msra.mxu1 %v7931_v14  ;;  %v6532_v50 = vld [vmem:[%s3354_s5] ss:$0 sm:$0xff] }
 0x65d   : > { %7090 = vmatprep.subr.bf16.mxu1 %v8785_v3 }
 0x65e   : > { %7073 = vmatmul.mubr.bf16.vlgmr.msra.gmra.mxu0 %v3202_v58 }
 0x65f   : > { %3626 = vmatprep.mubr.bf16.mxu0 %v8784_v2  ;;  %3595 = vmatpush1.bf16.msra.mxu0 %v7901_v51 }
 0x660   : > { %3596 = vmatprep.subr.bf16.mxu0 %v7906_v48  ;;  %7091 = vmatpush3.bf16.msra.mxu1 %v7932_v34 }
 0x661   : > { %7096 = vmatprep.subr.bf16.mxu1 %v8785_v3 }
 0x663   : > { %3597 = vmatpush1.bf16.msra.mxu0 %v7904_v52 }
 0x664   : > { %3598 = vmatprep.subr.bf16.mxu0 %v7909_v53 }
 0x667   : > { %3599 = vmatpush1.bf16.msra.mxu0 %v7907_v7 }
 0x668   : > { %3600 = vmatprep.subr.bf16.mxu0 %v7912_v54 }
 0x66b   : > { %3601 = vmatpush1.bf16.msra.mxu0 %v7910_v38 }
 0x66c   : > { %3602 = vmatprep.subr.bf16.mxu0 %v7915_v55 }
 0x66f   : > { %3603 = vmatpush1.bf16.msra.mxu0 %v7913_v9 }
 0x670   : > { %3604 = vmatprep.subr.bf16.mxu0 %v7918_v56 }
 0x673   : > { %3605 = vmatpush1.bf16.msra.mxu0 %v7916_v60  ;;  %v6534_v60 = vld [vmem:[%s3383_s24] ss:$0 sm:$0xff] }
 0x674   : > { %3606 = vmatprep.subr.bf16.mxu0 %v7921_v62 }
 0x677   : > { %3607 = vmatpush1.bf16.msra.mxu0 %v7919_v37 }
 0x678   : > { %3608 = vmatprep.subr.bf16.mxu0 %v7924_v8 }
 0x67b   : > { %3609 = vmatpush1.bf16.msra.mxu0 %v7922_v0 }
 0x67c   : > { %7120 = vmatprep.subr.bf16.mxu0 %v8785_v3 }
 0x67e   : > { %3627 = vmatmul.mubr.bf16.vlgmr.msra.gmra.mxu0 %v3480_v10 }
 0x67f   : > { %7122 = vmatprep.mubr.msk.bf16.mxu0 %vm8786_vm0, %v8785_v3 }
 0x71e   : > { %v3312_v28 = vpop.f32.mrf.mxu0 }
 0x71f   : > { %v3313_v39 = vadd.f32 %v6522_v42, %v3312_v28 }
 0x720   : > { %v7074_v29 = vpop.f32.mrf.mxu0 }
 0x721   : > { %v3319_v32 = vadd.f32 %v8121_v61, %v3313_v39  ;;  %v3502_v29 = vld [vmem:[%s3501_s9] sm:$0x3] }
 0x722   : > { %v3315_v4 = vpop.f32.mrf.mxu0  ;;  %v3507_v61 = vrot.slane %v3502_v29, %v9314_v35 }
 0x723   : > { %v3316_v40 = vadd.f32 %v6522_v42, %v3315_v4  ;;  %3321 = vadd.xlane.f32.xlu1 %v3319_v32 }
 0x724   : > { %v7075_v46 = vpop.f32.mrf.mxu0 }
 0x725   : > { %v3320_v49 = vadd.f32 %v8122_v17, %v3316_v40 }
 0x727   : > { %3323 = vadd.xlane.f32.xlu0 %v3320_v49 }
 0x73e   : > { %v3628_v4 = vpop.f32.mrf.mxu0 }
 0x73f   : > { %v3629_v40 = vadd.f32 %v3628_v4, %v3507_v61 }
 0x740   : > { %v3630_v46 = vpop.f32.mrf.mxu0 }
 0x742   : > { %v3632_v51 = vpop.f32.mrf.mxu0 }
 0x743   : > { %v3633_v43 = vadd.f32 %v3632_v51, %v3507_v61 }
 0x744   : > { %v3634_v53 = vpop.f32.mrf.mxu0 }
 0x745   : > { %v7731_v52 = vpack.i.bf16 %v3633_v43, %v3629_v40  ;;  %v3742_v8 = vpack.c.bf16 %v3633_v43, %v3633_v43 }
 0x7ac   : > { %v3322_v13 = vpop.xlane.xlu1 %3321 }
 0x7ad   : > { %v3326_v57 = vmul.f32 0.0078125, %v3322_v13 }
 0x7af   : > { %v3328_v41 = vsub.f32 %v3319_v32, %v3326_v57  ;;  %v3511_v32 = vrot.slane %v3502_v29, %v9312_v33 }
 0x7b0   : > { %v3324_v63 = vpop.xlane.xlu0 %3323 }
 0x7b1   : > { %v3327_v1 = vmul.f32 0.0078125, %v3324_v63  ;;  %v3330_v5 = vmul.f32 %v3328_v41, %v3328_v41  ;;  %v9815_v17 = vadd.f32 %v3630_v46, %v3511_v32  ;;  %v9824_v7 = vadd.f32 %v3634_v53, %v3511_v32 }
 0x7b2   : > { %v3867_v63 = vsel %vm1459_vm1, %v3742_v8, 0 }
 0x7b3   : > { %v3329_v6 = vsub.f32 %v3320_v49, %v3327_v1  ;;  %3332 = vadd.xlane.f32.xlu0 %v3330_v5  ;;  %v3741_v49 = vpack.c.bf16 %v3629_v40, %v3629_v40  ;;  %v9829_v54 = vpack.i.bf16 %v9824_v7, %v9815_v17 }
 0x7b5   : > { %v3331_v16 = vmul.f32 %v3329_v6, %v3329_v6  ;;  %v3821_v48 = vsel %vm1459_vm1, %v3741_v49, 0 }
 0x7b7   : > { %3334 = vadd.xlane.f32.xlu1 %v3331_v16 }
 0x7c9   : > { %3699 = vrot.lane.b32.xlu0 %v3629_v40, %s8787_s13 }
 0x7cd   : > { %7732 = vrot.lane.b32.xlu0 %v7731_v52, %s8788_s10 }
 0x7d1   : > { %7742 = vrot.lane.b32.xlu0 %v7731_v52, %s8789_s7 }
 0x7d5   : > { %7752 = vrot.lane.b32.xlu0 %v7731_v52, %s8790_s11 }
 0x7d9   : > { %7762 = vrot.lane.b32.xlu0 %v7731_v52, %s8791_s26 }
 0x7dd   : > { %7772 = vrot.lane.b32.xlu0 %v7731_v52, %s8792_s3 }
 0x7e1   : > { %7782 = vrot.lane.b32.xlu0 %v7731_v52, %s8793_s29 }
 0x83c   : > { %v3333_v59 = vpop.xlane.xlu0 %3332 }
 0x83d   : > { %v3336_v47 = vmul.f32 0.0078125, %v3333_v59 }
 0x83f   : > { %v3338_v15 = vadd.f32 1e-05, %v3336_v47 }
 0x840   : > { %v3335_v30 = vpop.xlane.xlu1 %3334  ;;  %v3700_v38 = vpop.permute.xlu0 %3699 }
 0x841   : > { %8045 = vrsqrt.f32 %v3338_v15  ;;  %v3337_v45 = vmul.f32 0.0078125, %v3335_v30 }
 0x843   : > { %v3339_v21 = vadd.f32 1e-05, %v3337_v45 }
 0x844   : > { %v7733_v11 = vpop.permute.xlu0 %7732 }
 0x845   : > { %8047 = vrsqrt.f32 %v3339_v21  ;;  %v7734_v55 = vunpack.i.l.bf16 %v7733_v11  ;;  %v7735_v34 = vunpack.i.h.bf16 %v7733_v11 }
 0x847   : > { %v3745_v9 = vpack.c.bf16 %v7734_v55, %v7734_v55  ;;  %v3746_v30 = vpack.c.bf16 %v7735_v34, %v7735_v34 }
 0x848   : > { %v7743_v44 = vpop.permute.xlu0 %7742 }
 0x849   : > { %v4005_v56 = vsel %vm1459_vm1, %v3745_v9, 0  ;;  %v7744_v59 = vunpack.i.l.bf16 %v7743_v44 }
 0x84a   : > { %7121 = vmatpush3.bf16.xpose.msra.mxu0 %v4005_v56 }
 0x84b   : > { %7132 = vmatprep.subr.bf16.mxu0 %v8785_v3  ;;  %v3747_v45 = vpack.c.bf16 %v7744_v59, %v7744_v59 }
 0x84e   : > { %v8046_v18 = vpop.eup %8045 }
 0x84f   : > { %v3342_v19 = vmul.f32 %v8046_v18, %v3328_v41 }
 0x851   : > { %v3352_v24 = vmul.f32 %v6531_v36, %v3342_v19 }
 0x852   : > { %v8048_v27 = vpop.eup %8047 }
 0x853   : > { %v3343_v22 = vmul.f32 %v8048_v27, %v3329_v6  ;;  %v9802_v42 = vadd.f32 %v6532_v50, %v3352_v24  ;;  %v3743_v6 = vpack.c.bf16 %v3700_v38, %v3700_v38 }
 0x855   : > { %v3353_v58 = vmul.f32 %v6531_v36, %v3343_v22  ;;  %v3913_v26 = vsel %vm1459_vm1, %v3743_v6, 0  ;;  %v7753_v36 = vpop.permute.xlu0 %7752  ;;  %v7745_v22 = vunpack.i.h.bf16 %v7743_v44 }
 0x856   : > { %v7754_v24 = vunpack.i.l.bf16 %v7753_v36  ;;  %v7755_v51 = vunpack.i.h.bf16 %v7753_v36  ;;  %v3801_v36 = vpack.c.bf16 %v9815_v17, %v9815_v17  ;;  %v3802_v17 = vpack.c.bf16 %v9824_v7, %v9824_v7 }
 0x857   : > { %v9804_v28 = vadd.f32 %v6532_v50, %v3353_v58  ;;  %v4097_v50 = vsel %vm1459_vm1, %v3747_v45, 0  ;;  %v4051_v58 = vsel %vm1459_vm1, %v3746_v30, 0  ;;  %v3748_v61 = vpack.c.bf16 %v7745_v22, %v7745_v22 }
 0x858   : > { %v3749_v32 = vpack.c.bf16 %v7754_v24, %v7754_v24  ;;  %v3750_v11 = vpack.c.bf16 %v7755_v51, %v7755_v51  ;;  %v4749_v24 = vsel %vm2392_vm2, %v3801_v36, 0 }
 0x859   : > { %v3364_v39 = vpack.c.bf16 %v9804_v28, %v9802_v42  ;;  %v7763_v46 = vpop.permute.xlu0 %7762  ;;  %v4143_v52 = vsel %vm1459_vm1, %v3748_v61, 0 }
 0x85b   : > { %7093 = vmatmul.mubr.bf16.vlgmr.msra.gmra.mxu1 %v3364_v39 }
 0x85c   : > { %7098 = vmatprep.mubr.msk.bf16.mxu1 %vm8786_vm0, %v8785_v3  ;;  %7097 = vmatpush3.bf16.xpose.msra.mxu1 %v3821_v48  ;;  %v4189_v48 = vsel %vm1459_vm1, %v3749_v32, 0 }
 0x85d   : > { %7102 = vmatprep.subr.bf16.mxu1 %v8785_v3 }
 0x91b   : > { %v3473_v62 = vpop.f32.mrf.mxu1 }
 0x91c   : > { %v3474_v37 = vadd.f32 %v6534_v60, %v3473_v62 }
 0x91d   : > { %v7094_v0 = vpop.f32.mrf.mxu1 }
 0x91e   : > { %v7726_v13 = vpack.i.bf16 %v3633_v43, %v3474_v37  ;;  %v3681_v57 = vpack.c.bf16 %v3474_v37, %v3474_v37  ;;  %v7764_v43 = vunpack.i.l.bf16 %v7763_v46 }
 0x91f   : > { %v3476_v41 = vpop.f32.mrf.mxu1 }
 0x920   : > { %7727 = vrot.lane.b32.xlu1 %v7726_v13, %s8787_s13  ;;  %7099 = vmatmul.mubr.msk.bf16.vlgmr.msra.gmra.mxu1 %vm1459_vm1, %v3681_v57  ;;  %v3477_v5 = vadd.f32 %v6534_v60, %v3476_v41  ;;  %v3751_v55 = vpack.c.bf16 %v7764_v43, %v7764_v43  ;;  %v7773_v60 = vpop.permute.xlu0 %7772  ;;  %v4235_v13 = vsel %vm1459_vm1, %v3750_v11, 0 }
 0x921   : > { %7103 = vmatpush3.bf16.xpose.msra.mxu1 %v3867_v63  ;;  %v7095_v1 = vpop.f32.mrf.mxu1  ;;  %7104 = vmatprep.mubr.msk.bf16.mxu1 %vm8786_vm0, %v8785_v3  ;;  %v7774_v8 = vunpack.i.l.bf16 %v7773_v60 }
 0x922   : > { %7108 = vmatprep.subr.bf16.mxu1 %v8785_v3  ;;  %v7736_v16 = vpack.i.bf16 %v3477_v5, %v3474_v37  ;;  %v3682_v23 = vpack.c.bf16 %v3477_v5, %v3477_v5  ;;  %v7765_v37 = vunpack.i.h.bf16 %v7763_v46  ;;  %v4281_v0 = vsel %vm1459_vm1, %v3751_v55, 0 }
 0x923   : > { %v3753_v1 = vpack.c.bf16 %v7774_v8, %v7774_v8 }
 0x924   : > { %3641 = vrot.lane.b32.xlu1 %v3477_v5, %s8787_s13  ;;  %v3752_v63 = vpack.c.bf16 %v7765_v37, %v7765_v37  ;;  %v7783_v5 = vpop.permute.xlu0 %7782 }
 0x928   : > { %7737 = vrot.lane.b32.xlu1 %v7736_v16, %s8788_s10  ;;  %7105 = vmatmul.mubr.msk.bf16.vlgmr.msra.gmra.mxu1 %vm1459_vm1, %v3682_v23 }
 0x929   : > { %7109 = vmatpush3.bf16.xpose.msra.mxu1 %v3913_v26  ;;  %7110 = vmatprep.mubr.msk.bf16.mxu1 %vm8786_vm0, %v8785_v3  ;;  %v7775_v26 = vunpack.i.h.bf16 %v7773_v60 }
 0x92a   : > { %7114 = vmatprep.subr.bf16.mxu1 %v8785_v3 }
 0x92b   : > { %v3754_v44 = vpack.c.bf16 %v7775_v26, %v7775_v26 }
 0x92c   : > { %7747 = vrot.lane.b32.xlu1 %v7736_v16, %s8789_s7 }
 0x92d   : > { %v4419_v45 = vsel %vm1459_vm1, %v3754_v44, 0 }
 0x930   : > { %7757 = vrot.lane.b32.xlu1 %v7736_v16, %s8790_s11 }
 0x934   : > { %7767 = vrot.lane.b32.xlu1 %v7736_v16, %s8791_s26 }
 0x938   : > { %7777 = vrot.lane.b32.xlu1 %v7736_v16, %s8792_s3 }
 0x93c   : > { %7787 = vrot.lane.b32.xlu1 %v7736_v16, %s8793_s29 }
 0x992   : > { %v7728_v10 = vpop.permute.xlu1 %7727 }
 0x993   : > { %v7730_v25 = vunpack.i.h.bf16 %v7728_v10  ;;  %v7729_v12 = vunpack.i.l.bf16 %v7728_v10  ;;  %v7784_v10 = vunpack.i.l.bf16 %v7783_v5 }
 0x995   : > { %v3744_v31 = vpack.c.bf16 %v7730_v25, %v7730_v25  ;;  %v3683_v20 = vpack.c.bf16 %v7729_v12, %v7729_v12  ;;  %v4373_v25 = vsel %vm1459_vm1, %v3753_v1, 0  ;;  %v4327_v12 = vsel %vm1459_vm1, %v3752_v63, 0 }
 0x996   : > { %v3642_v14 = vpop.permute.xlu1 %3641 }
 0x997   : > { %7111 = vmatmul.mubr.msk.bf16.vlgmr.msra.gmra.mxu1 %vm1459_vm1, %v3683_v20  ;;  %v3959_v47 = vsel %vm1459_vm1, %v3744_v31, 0  ;;  %v3684_v18 = vpack.c.bf16 %v3642_v14, %v3642_v14  ;;  %v3755_v14 = vpack.c.bf16 %v7784_v10, %v7784_v10 }
 0x998   : > { %7115 = vmatpush3.bf16.xpose.msra.mxu1 %v3959_v47  ;;  %7116 = vmatprep.mubr.msk.bf16.mxu1 %vm8786_vm0, %v8785_v3 }
 0x999   : > { %7126 = vmatprep.subr.bf16.mxu1 %v8785_v3  ;;  %v4465_v30 = vsel %vm1459_vm1, %v3755_v14, 0 }
 0x99a   : > { %v7738_v15 = vpop.permute.xlu1 %7737 }
 0x99b   : > { %v7739_v21 = vunpack.i.l.bf16 %v7738_v15  ;;  %v7740_v39 = vunpack.i.h.bf16 %v7738_v15  ;;  %v7785_v15 = vunpack.i.h.bf16 %v7783_v5 }
 0x99d   : > { %v3685_v19 = vpack.c.bf16 %v7739_v21, %v7739_v21  ;;  %v3686_v4 = vpack.c.bf16 %v7740_v39, %v7740_v39 }
 0x99e   : > { %v7748_v27 = vpop.permute.xlu1 %7747 }
 0x99f   : > { %7117 = vmatmul.mubr.msk.bf16.vlgmr.msra.gmra.mxu1 %vm1459_vm1, %v3684_v18  ;;  %7123 = vmatmul.mubr.msk.bf16.vlgmr.msra.gmra.mxu0 %vm1459_vm1, %v3685_v19  ;;  %v7749_v29 = vunpack.i.l.bf16 %v7748_v27  ;;  %v7750_v53 = vunpack.i.h.bf16 %v7748_v27  ;;  %v3756_v19 = vpack.c.bf16 %v7785_v15, %v7785_v15 }
 0x9a0   : > { %7133 = vmatpush3.bf16.xpose.msra.mxu0 %v4097_v50  ;;  %7127 = vmatpush3.bf16.xpose.msra.mxu1 %v4051_v58 }
 0x9a1   : > { %7128 = vmatprep.mubr.msk.bf16.mxu1 %vm8786_vm0, %v8785_v3  ;;  %7134 = vmatprep.mubr.msk.bf16.mxu0 %vm8786_vm0, %v8785_v3  ;;  %v3687_v40 = vpack.c.bf16 %v7749_v29, %v7749_v29  ;;  %v3688_v9 = vpack.c.bf16 %v7750_v53, %v7750_v53  ;;  %v4511_v50 = vsel %vm1459_vm1, %v3756_v19, 0  ;;  %v4795_v29 = vsel %vm2392_vm2, %v3802_v17, 0 }
 0x9a2   : > { %7144 = vmatprep.subr.bf16.mxu0 %v8785_v3  ;;  %7138 = vmatprep.subr.bf16.mxu1 %v8785_v3  ;;  %v7758_v49 = vpop.permute.xlu1 %7757 }
 0x9a3   : > { %v7759_v38 = vunpack.i.l.bf16 %v7758_v49  ;;  %v7760_v57 = vunpack.i.h.bf16 %v7758_v49 }
 0x9a5   : > { %v3689_v56 = vpack.c.bf16 %v7759_v38, %v7759_v38  ;;  %v3690_v6 = vpack.c.bf16 %v7760_v57, %v7760_v57 }
 0x9a6   : > { %v7768_v62 = vpop.permute.xlu1 %7767 }
 0x9a7   : > { %7129 = vmatmul.mubr.msk.bf16.vlgmr.msra.gmra.mxu1 %vm1459_vm1, %v3686_v4  ;;  %7135 = vmatmul.mubr.msk.bf16.vlgmr.msra.gmra.mxu0 %vm1459_vm1, %v3687_v40  ;;  %v7769_v41 = vunpack.i.l.bf16 %v7768_v62  ;;  %v7770_v31 = vunpack.i.h.bf16 %v7768_v62 }
 0x9a8   : > { %7145 = vmatpush3.bf16.xpose.msra.mxu0 %v4189_v48  ;;  %7139 = vmatpush3.bf16.xpose.msra.mxu1 %v4143_v52 }
 0x9a9   : > { %7140 = vmatprep.mubr.msk.bf16.mxu1 %vm8786_vm0, %v8785_v3  ;;  %7146 = vmatprep.mubr.msk.bf16.mxu0 %vm8786_vm0, %v8785_v3  ;;  %v3691_v16 = vpack.c.bf16 %v7769_v41, %v7769_v41  ;;  %v3692_v34 = vpack.c.bf16 %v7770_v31, %v7770_v31 }
 0x9aa   : > { %7156 = vmatprep.subr.bf16.mxu0 %v8785_v3  ;;  %7150 = vmatprep.subr.bf16.mxu1 %v8785_v3  ;;  %v7778_v23 = vpop.permute.xlu1 %7777 }
 0x9ab   : > { %v7779_v20 = vunpack.i.l.bf16 %v7778_v23  ;;  %v7780_v21 = vunpack.i.h.bf16 %v7778_v23 }
 0x9ad   : > { %v3693_v59 = vpack.c.bf16 %v7779_v20, %v7779_v20  ;;  %v3694_v27 = vpack.c.bf16 %v7780_v21, %v7780_v21 }
 0x9ae   : > { %v7788_v47 = vpop.permute.xlu1 %7787 }
 0x9af   : > { %7141 = vmatmul.mubr.msk.bf16.vlgmr.msra.gmra.mxu1 %vm1459_vm1, %v3688_v9  ;;  %7147 = vmatmul.mubr.msk.bf16.vlgmr.msra.gmra.mxu0 %vm1459_vm1, %v3689_v56  ;;  %v7789_v18 = vunpack.i.l.bf16 %v7788_v47  ;;  %v7790_v58 = vunpack.i.h.bf16 %v7788_v47 }
 0x9b0   : > { %7157 = vmatpush3.bf16.xpose.msra.mxu0 %v4281_v0  ;;  %7151 = vmatpush3.bf16.xpose.msra.mxu1 %v4235_v13 }
 0x9b1   : > { %7152 = vmatprep.mubr.msk.bf16.mxu1 %vm8786_vm0, %v8785_v3  ;;  %7158 = vmatprep.mubr.msk.bf16.mxu0 %vm8786_vm0, %v8785_v3  ;;  %v3695_v22 = vpack.c.bf16 %v7789_v18, %v7789_v18  ;;  %v3696_v39 = vpack.c.bf16 %v7790_v58, %v7790_v58 }
 0x9b2   : > { %7168 = vmatprep.subr.bf16.mxu0 %v8785_v3  ;;  %7162 = vmatprep.subr.bf16.mxu1 %v8785_v3 }
 0x9b7   : > { %7153 = vmatmul.mubr.msk.bf16.vlgmr.msra.gmra.mxu1 %vm1459_vm1, %v3690_v6  ;;  %7159 = vmatmul.mubr.msk.bf16.vlgmr.msra.gmra.mxu0 %vm1459_vm1, %v3691_v16 }
 0x9b8   : > { %7169 = vmatpush3.bf16.xpose.msra.mxu0 %v4373_v25  ;;  %7163 = vmatpush3.bf16.xpose.msra.mxu1 %v4327_v12 }
 0x9b9   : > { %7164 = vmatprep.mubr.msk.bf16.mxu1 %vm8786_vm0, %v8785_v3  ;;  %7170 = vmatprep.mubr.msk.bf16.mxu0 %vm8786_vm0, %v8785_v3 }
 0x9ba   : > { %7180 = vmatprep.subr.bf16.mxu0 %v8785_v3  ;;  %7174 = vmatprep.subr.bf16.mxu1 %v8785_v3 }
 0x9bf   : > { %7165 = vmatmul.mubr.msk.bf16.vlgmr.msra.gmra.mxu1 %vm1459_vm1, %v3692_v34  ;;  %7171 = vmatmul.mubr.msk.bf16.vlgmr.msra.gmra.mxu0 %vm1459_vm1, %v3693_v59 }
 0x9c0   : > { %7181 = vmatpush3.bf16.xpose.msra.mxu0 %v4465_v30  ;;  %7175 = vmatpush3.bf16.xpose.msra.mxu1 %v4419_v45 }
 0x9c1   : > { %7176 = vmatprep.mubr.msk.bf16.mxu1 %vm8786_vm0, %v8785_v3  ;;  %7182 = vmatprep.mubr.msk.bf16.mxu0 %vm8786_vm0, %v8785_v3 }
 0x9c2   : > { %7192 = vmatprep.subr.bf16.mxu0 %v8785_v3  ;;  %7186 = vmatprep.subr.bf16.mxu1 %v8785_v3 }
 0x9c7   : > { %7177 = vmatmul.mubr.msk.bf16.vlgmr.msra.gmra.mxu1 %vm1459_vm1, %v3694_v27  ;;  %7183 = vmatmul.mubr.msk.bf16.vlgmr.msra.gmra.mxu0 %vm1459_vm1, %v3695_v22 }
 0x9c8   : > { %7193 = vmatpush3.bf16.msra.mxu0 %v4749_v24  ;;  %7187 = vmatpush3.bf16.xpose.msra.mxu1 %v4511_v50 }
 0x9c9   : > { %7188 = vmatprep.mubr.msk.bf16.mxu1 %vm8786_vm0, %v8785_v3  ;;  %7198 = vmatprep.subr.bf16.mxu1 %v8785_v3 }
 0x9ca   : > { %7194 = vmatprep.mubr.msk.bf16.mxu0 %vm8786_vm0, %v8785_v3  ;;  %7204 = vmatprep.subr.bf16.mxu0 %v8785_v3 }
 0x9cf   : > { %7189 = vmatmul.mubr.msk.bf16.vlgmr.msra.gmra.mxu1 %vm1459_vm1, %v3696_v39 }
 0x9d0   : > { %7199 = vmatpush3.bf16.msra.mxu1 %v4795_v29  ;;  %7200 = vmatprep.mubr.msk.bf16.mxu1 %vm8786_vm0, %v8785_v3 }
 0x9d1   : > { %7210 = vmatprep.subr.bf16.mxu1 %v8785_v3 }
 0x9e0   : > { %v9927_v61 = vpop.f32.mrf.mxu1 }
 0x9e1   : > { %v4553_v32 = vsel %vm2196_vm3, %v9927_v61, -inf }
 0x9e2   : > { %4554 = vmax.xlane.f32.xlu0 %v4553_v32  ;;  %v7100_v4 = vpop.f32.mrf.mxu1 }
 0x9e4   : > { %v3860_v40 = vpop.f32.mrf.mxu1 }
 0x9e6   : > { %v7101_v7 = vpop.f32.mrf.mxu1 }
 0x9e8   : > { %v3903_v46 = vpop.f32.mrf.mxu1 }
 0x9e9   : > { %v4556_v49 = vsel %vm2196_vm3, %v3903_v46, -inf }
 0x9ea   : > { %4557 = vmax.xlane.f32.xlu1 %v4556_v49  ;;  %v7106_v51 = vpop.f32.mrf.mxu1 }
 0x9ec   : > { %v3906_v43 = vpop.f32.mrf.mxu1 }
 0x9ee   : > { %v7107_v48 = vpop.f32.mrf.mxu1 }
 0xa57   : > { %v9932_v52 = vpop.f32.mrf.mxu1 }
 0xa58   : > { %v4559_v53 = vsel %vm2196_vm3, %v9932_v52, -inf }
 0xa59   : > { %4560 = vmax.xlane.f32.xlu0 %v4559_v53  ;;  %v7112_v38 = vpop.f32.mrf.mxu1 }
 0xa5b   : > { %v3952_v11 = vpop.f32.mrf.mxu1 }
 0xa5d   : > { %v7113_v55 = vpop.f32.mrf.mxu1 }
 0xa5f   : > { %v9936_v9 = vpop.f32.mrf.mxu1  ;;  %v9938_v56 = vpop.f32.mrf.mxu0 }
 0xa60   : > { %v4565_v60 = vsel %vm2196_vm3, %v9938_v56, -inf  ;;  %v4562_v62 = vsel %vm2196_vm3, %v9936_v9, -inf }
 0xa61   : > { %v7124_v37 = vpop.f32.mrf.mxu0  ;;  %4566 = vmax.xlane.f32.xlu1 %v4565_v60  ;;  %4563 = vmax.xlane.f32.xlu0 %v4562_v62  ;;  %v7118_v8 = vpop.f32.mrf.mxu1 }
 0xa63   : > { %v3998_v0 = vpop.f32.mrf.mxu1  ;;  %v4044_v13 = vpop.f32.mrf.mxu0 }
 0xa65   : > { %v7119_v57 = vpop.f32.mrf.mxu1  ;;  %v7125_v41 = vpop.f32.mrf.mxu0 }
 0xa67   : > { %v9944_v63 = vpop.f32.mrf.mxu1  ;;  %v9946_v1 = vpop.f32.mrf.mxu0 }
 0xa68   : > { %v4568_v5 = vsel %vm2196_vm3, %v9944_v63, -inf }
 0xa69   : > { %v7136_v6 = vpop.f32.mrf.mxu0  ;;  %4569 = vmax.xlane.f32.xlu0 %v4568_v5  ;;  %v7130_v16 = vpop.f32.mrf.mxu1 }
 0xa6b   : > { %v4136_v23 = vpop.f32.mrf.mxu0  ;;  %v4090_v26 = vpop.f32.mrf.mxu1 }
 0xa6c   : > { %v4555_v0 = vpop.xlane.xlu0 %4554  ;;  %v4571_v26 = vsel %vm2196_vm3, %v9946_v1, -inf }
 0xa6d   : > { %v7137_v10 = vpop.f32.mrf.mxu0  ;;  %v7131_v25 = vpop.f32.mrf.mxu1  ;;  %v4601_v41 = vsub.f32 %v9927_v61, %v4555_v0 }
 0xa6f   : > { %v9950_v12 = vpop.f32.mrf.mxu0  ;;  %v9952_v31 = vpop.f32.mrf.mxu1  ;;  %v4617_v23 = vmul.f32 1.442695, %v4601_v41 }
 0xa70   : > { %v4574_v44 = vsel %vm2196_vm3, %v9952_v31, -inf  ;;  %v4577_v25 = vsel %vm2196_vm3, %v9950_v12, -inf }
 0xa71   : > { %v7148_v20 = vpop.f32.mrf.mxu0  ;;  %4575 = vmax.xlane.f32.xlu0 %v4574_v44  ;;  %v7142_v14 = vpop.f32.mrf.mxu1 }
 0xa72   : > { %7792 = vrot.lane.b32.xlu1 %v9829_v54, %s8787_s13 }
 0xa73   : > { %v4228_v34 = vpop.f32.mrf.mxu0  ;;  %v4558_v59 = vpop.xlane.xlu1 %4557 }
 0xa74   : > { %v4182_v47 = vpop.f32.mrf.mxu1  ;;  %v4602_v15 = vsub.f32 %v3903_v46, %v4558_v59 }
 0xa75   : > { %v7149_v30 = vpop.f32.mrf.mxu0 }
 0xa76   : > { %v7143_v45 = vpop.f32.mrf.mxu1  ;;  %v4619_v19 = vmul.f32 1.442695, %v4602_v15 }
 0xa77   : > { %v9958_v21 = vpop.f32.mrf.mxu0 }
 0xa78   : > { %v9960_v18 = vpop.f32.mrf.mxu1  ;;  %8049 = vpow2.f32 %v4619_v19  ;;  %v4583_v61 = vsel %vm2196_vm3, %v9958_v21, -inf }
 0xa79   : > { %v7160_v36 = vpop.f32.mrf.mxu0  ;;  %v4580_v27 = vsel %vm2196_vm3, %v9960_v18, -inf  ;;  %8051 = vpow2.f32 %v4617_v23 }
 0xa7a   : > { %4581 = vmax.xlane.f32.xlu0 %v4580_v27  ;;  %v7154_v22 = vpop.f32.mrf.mxu1 }
 0xa7b   : > { %v4320_v24 = vpop.f32.mrf.mxu0 }
 0xa7c   : > { %v4274_v50 = vpop.f32.mrf.mxu1 }
 0xa7d   : > { %v7161_v58 = vpop.f32.mrf.mxu0 }
 0xa7e   : > { %v7155_v17 = vpop.f32.mrf.mxu1 }
 0xa7f   : > { %v9964_v39 = vpop.f32.mrf.mxu0 }
 0xa80   : > { %v9966_v29 = vpop.f32.mrf.mxu1  ;;  %v4589_v20 = vsel %vm2196_vm3, %v9964_v39, -inf }
 0xa81   : > { %v7172_v32 = vpop.f32.mrf.mxu0  ;;  %v4586_v4 = vsel %vm2196_vm3, %v9966_v29, -inf }
 0xa82   : > { %4587 = vmax.xlane.f32.xlu0 %v4586_v4  ;;  %v7166_v40 = vpop.f32.mrf.mxu1 }
 0xa83   : > { %v4412_v7 = vpop.f32.mrf.mxu0 }
 0xa84   : > { %v4366_v46 = vpop.f32.mrf.mxu1 }
 0xa85   : > { %v7173_v49 = vpop.f32.mrf.mxu0  ;;  %v9976_v11 = vpop.eup %8049 }
 0xa86   : > { %v7167_v51 = vpop.f32.mrf.mxu1  ;;  %v4652_v8 = vsel %vm2196_vm3, %v9976_v11, 0.0  ;;  %v9995_v14 = vpop.eup %8051 }
 0xa87   : > { %v9970_v43 = vpop.f32.mrf.mxu0  ;;  %v4649_v34 = vsel %vm2196_vm3, %v9995_v14, 0.0 }
 0xa88   : > { %v9972_v48 = vpop.f32.mrf.mxu1  ;;  %v4595_v44 = vsel %vm2196_vm3, %v9970_v43, -inf }
 0xa89   : > { %v7184_v53 = vpop.f32.mrf.mxu0  ;;  %v4592_v38 = vsel %vm2196_vm3, %v9972_v48, -inf }
 0xa8a   : > { %4593 = vmax.xlane.f32.xlu0 %v4592_v38  ;;  %v7178_v55 = vpop.f32.mrf.mxu1 }
 0xa8b   : > { %v4504_v60 = vpop.f32.mrf.mxu0 }
 0xa8c   : > { %v4458_v62 = vpop.f32.mrf.mxu1 }
 0xa8d   : > { %v7185_v37 = vpop.f32.mrf.mxu0 }
 0xa8e   : > { %4653 = vadd.xlane.f32.xlu0 %v4652_v8  ;;  %v7179_v13 = vpop.f32.mrf.mxu1 }
 0xa90   : > { %v9980_v57 = vpop.f32.mrf.mxu1 }
 0xa91   : > { %v4598_v5 = vsel %vm2196_vm3, %v9980_v57, -inf }
 0xa92   : > { %4599 = vmax.xlane.f32.xlu0 %v4598_v5  ;;  %v7190_v6 = vpop.f32.mrf.mxu1 }
 0xa94   : > { %v4550_v16 = vpop.f32.mrf.mxu1 }
 0xa96   : > { %v7191_v10 = vpop.f32.mrf.mxu1  ;;  %4572 = vmax.xlane.f32.xlu1 %v4571_v26 }
 0xa9a   : > { %4578 = vmax.xlane.f32.xlu1 %v4577_v25 }
 0xa9e   : > { %4584 = vmax.xlane.f32.xlu1 %v4583_v61 }
 0xaa2   : > { %4590 = vmax.xlane.f32.xlu1 %v4589_v20 }
 0xaa6   : > { %4596 = vmax.xlane.f32.xlu1 %v4595_v44 }
 0xaa8   : > { %7797 = vrot.lane.b32.xlu0 %v9829_v54, %s8788_s10 }
 0xaaa   : > { %4650 = vadd.xlane.f32.xlu1 %v4649_v34 }
 0xabb   : > { %7802 = vrot.lane.b32.xlu1 %v9829_v54, %s8789_s7 }
 0xae2   : > { %v4561_v59 = vpop.xlane.xlu0 %4560 }
 0xae3   : > { %v4603_v47 = vsub.f32 %v9932_v52, %v4561_v59 }
 0xae5   : > { %v4621_v15 = vmul.f32 1.442695, %v4603_v47 }
 0xae7   : > { %8053 = vpow2.f32 %v4621_v15 }
 0xaea   : > { %v4567_v30 = vpop.xlane.xlu1 %4566  ;;  %v4564_v45 = vpop.xlane.xlu0 %4563 }
 0xaeb   : > { %v4605_v19 = vsub.f32 %v9938_v56, %v4567_v30  ;;  %v4604_v36 = vsub.f32 %v9936_v9, %v4564_v45 }
 0xaed   : > { %v4625_v27 = vmul.f32 1.442695, %v4605_v19  ;;  %v4623_v22 = vmul.f32 1.442695, %v4604_v36 }
 0xaee   : > { %v10023_v38 = vpop.permute.xlu1 %7792 }
 0xaef   : > { %8055 = vpow2.f32 %v4625_v27  ;;  %v7795_v8 = vunpack.i.h.bf16 %v10023_v38 }
 0xaf0   : > { %8057 = vpow2.f32 %v4623_v22 }
 0xaf1   : > { %v3804_v23 = vpack.c.bf16 %v7795_v8, %v7795_v8 }
 0xaf2   : > { %v4570_v24 = vpop.xlane.xlu0 %4569 }
 0xaf3   : > { %v4606_v50 = vsub.f32 %v9944_v63, %v4570_v24 }
 0xaf4   : > { %v10007_v58 = vpop.eup %8053 }
 0xaf5   : > { %v4627_v17 = vmul.f32 1.442695, %v4606_v50  ;;  %v4655_v52 = vsel %vm2196_vm3, %v10007_v58, 0.0 }
 0xaf6   : > { %4656 = vadd.xlane.f32.xlu1 %v4655_v52  ;;  %v7794_v52 = vunpack.i.l.bf16 %v10023_v38 }
 0xaf7   : > { %8059 = vpow2.f32 %v4627_v17 }
 0xafa   : > { %v4576_v7 = vpop.xlane.xlu0 %4575 }
 0xafb   : > { %v4608_v62 = vsub.f32 %v9952_v31, %v4576_v7  ;;  %v3803_v7 = vpack.c.bf16 %v7794_v52, %v7794_v52 }
 0xafc   : > { %v10011_v32 = vpop.eup %8055 }
 0xafd   : > { %v10013_v56 = vpop.eup %8057  ;;  %v4661_v9 = vsel %vm2196_vm3, %v10011_v32, 0.0  ;;  %v4631_v5 = vmul.f32 1.442695, %v4608_v62  ;;  %v4841_v38 = vsel %vm2392_vm2, %v3803_v7, 0 }
 0xafe   : > { %4662 = vadd.xlane.f32.xlu1 %v4661_v9  ;;  %v4658_v4 = vsel %vm2196_vm3, %v10013_v56, 0.0 }
 0xaff   : > { %4659 = vadd.xlane.f32.xlu0 %v4658_v4 }
 0xb03   : > { %v4582_v46 = vpop.xlane.xlu0 %4581 }
 0xb04   : > { %v10019_v63 = vpop.eup %8059  ;;  %v4610_v6 = vsub.f32 %v9960_v18, %v4582_v46 }
 0xb05   : > { %v4664_v40 = vsel %vm2196_vm3, %v10019_v63, 0.0 }
 0xb06   : > { %4665 = vadd.xlane.f32.xlu0 %v4664_v40  ;;  %v4635_v25 = vmul.f32 1.442695, %v4610_v6 }
 0xb0b   : > { %v4588_v49 = vpop.xlane.xlu0 %4587 }
 0xb13   : > { %v4594_v51 = vpop.xlane.xlu0 %4593 }
 0xb14   : > { %v4614_v45 = vsub.f32 %v9972_v48, %v4594_v51 }
 0xb17   : > { %v4654_v53 = vpop.xlane.xlu0 %4653 }
 0xb18   : > { %8061 = vrcp.f32 %v4654_v53 }
 0xb1b   : > { %v4600_v62 = vpop.xlane.xlu0 %4599 }
 0xb1f   : > { %v4573_v55 = vpop.xlane.xlu1 %4572 }
 0xb20   : > { %v4607_v60 = vsub.f32 %v9946_v1, %v4573_v55 }
 0xb22   : > { %v4629_v37 = vmul.f32 1.442695, %v4607_v60 }
 0xb23   : > { %v4579_v0 = vpop.xlane.xlu1 %4578 }
 0xb24   : > { %8063 = vpow2.f32 %v4629_v37  ;;  %v4609_v13 = vsub.f32 %v9950_v12, %v4579_v0  ;;  %v4887_v12 = vsel %vm2392_vm2, %v3804_v23, 0  ;;  %v4616_v37 = vsub.f32 %v9980_v57, %v4600_v62  ;;  %v7798_v57 = vpop.permute.xlu0 %7797 }
 0xb25   : > { %v8062_v41 = vpop.eup %8061  ;;  %v7799_v23 = vunpack.i.l.bf16 %v7798_v57 }
 0xb26   : > { %v4633_v16 = vmul.f32 1.442695, %v4609_v13  ;;  %v4714_v26 = vmul.f32 %v8062_v41, %v9976_v11  ;;  %v4647_v8 = vmul.f32 1.442695, %v4616_v37 }
 0xb27   : > { %v4585_v10 = vpop.xlane.xlu1 %4584 }
 0xb28   : > { %8065 = vpow2.f32 %v4633_v16  ;;  %v4611_v1 = vsub.f32 %v9958_v21, %v4585_v10  ;;  %v4730_v31 = vpack.c.bf16 %v4714_v26, %v4714_v26  ;;  %v4612_v21 = vsub.f32 %v9966_v29, %v4588_v49 }
 0xb29   : > { %8067 = vpow2.f32 %v4631_v5  ;;  %v3805_v10 = vpack.c.bf16 %v7799_v23, %v7799_v23 }
 0xb2a   : > { %v4637_v61 = vmul.f32 1.442695, %v4611_v1  ;;  %7201 = vmatmul.mubr.msk.bf16.vlgmr.msra.gmra.mxu1 %vm2196_vm3, %v4730_v31  ;;  %v4639_v59 = vmul.f32 1.442695, %v4612_v21 }
 0xb2b   : > { %v4591_v20 = vpop.xlane.xlu1 %4590  ;;  %7211 = vmatpush3.bf16.msra.mxu1 %v4887_v12  ;;  %7212 = vmatprep.mubr.msk.bf16.mxu1 %vm8786_vm0, %v8785_v3  ;;  %v7800_v12 = vunpack.i.h.bf16 %v7798_v57 }
 0xb2c   : > { %8069 = vpow2.f32 %v4637_v61  ;;  %v4613_v18 = vsub.f32 %v9964_v39, %v4591_v20  ;;  %7222 = vmatprep.subr.bf16.mxu1 %v8785_v3  ;;  %v4933_v61 = vsel %vm2392_vm2, %v3805_v10, 0 }
 0xb2d   : > { %8071 = vpow2.f32 %v4635_v25 }
 0xb2e   : > { %v4641_v11 = vmul.f32 1.442695, %v4613_v18 }
 0xb2f   : > { %v4597_v44 = vpop.xlane.xlu1 %4596 }
 0xb30   : > { %8073 = vpow2.f32 %v4641_v11  ;;  %v4615_v47 = vsub.f32 %v9970_v43, %v4597_v44  ;;  %v4643_v43 = vmul.f32 1.442695, %v4614_v45  ;;  %v3806_v11 = vpack.c.bf16 %v7800_v12, %v7800_v12 }
 0xb31   : > { %v10039_v34 = vpop.eup %8063 }
 0xb32   : > { %v4667_v15 = vsel %vm2196_vm3, %v10039_v34, 0.0  ;;  %v4645_v29 = vmul.f32 1.442695, %v4615_v47  ;;  %v4979_v45 = vsel %vm2392_vm2, %v3806_v11, 0 }
 0xb33   : > { %v4651_v39 = vpop.xlane.xlu1 %4650  ;;  %4668 = vadd.xlane.f32.xlu1 %v4667_v15 }
 0xb34   : > { %8075 = vrcp.f32 %v4651_v39 }
 0xb35   : > { %v10044_v30 = vpop.eup %8065  ;;  %8077 = vpow2.f32 %v4639_v59 }
 0xb36   : > { %v4673_v19 = vsel %vm2196_vm3, %v10044_v30, 0.0  ;;  %v10049_v36 = vpop.eup %8067  ;;  %8079 = vpow2.f32 %v4645_v29 }
 0xb37   : > { %4674 = vadd.xlane.f32.xlu0 %v4673_v19  ;;  %v4670_v24 = vsel %vm2196_vm3, %v10049_v36, 0.0  ;;  %8081 = vpow2.f32 %v4643_v43  ;;  %v7803_v41 = vpop.permute.xlu1 %7802 }
 0xb38   : > { %8083 = vpow2.f32 %v4647_v8  ;;  %v7804_v25 = vunpack.i.l.bf16 %v7803_v41  ;;  %v7805_v39 = vunpack.i.h.bf16 %v7803_v41 }
 0xb39   : > { %v10051_v27 = vpop.eup %8069 }
 0xb3a   : > { %v4679_v22 = vsel %vm2196_vm3, %v10051_v27, 0.0  ;;  %v10057_v50 = vpop.eup %8071  ;;  %v3807_v21 = vpack.c.bf16 %v7804_v25, %v7804_v25  ;;  %v3808_v29 = vpack.c.bf16 %v7805_v39, %v7805_v39 }
 0xb3b   : > { %4680 = vadd.xlane.f32.xlu1 %v4679_v22  ;;  %4671 = vadd.xlane.f32.xlu0 %v4670_v24  ;;  %v4676_v48 = vsel %vm2196_vm3, %v10057_v50, 0.0 }
 0xb3c   : > { %v5025_v15 = vsel %vm2392_vm2, %v3807_v21, 0  ;;  %v5071_v43 = vsel %vm2392_vm2, %v3808_v29, 0 }
 0xb3d   : > { %v10061_v17 = vpop.eup %8073 }
 0xb3e   : > { %v4685_v4 = vsel %vm2196_vm3, %v10061_v17, 0.0 }
 0xb3f   : > { %4677 = vadd.xlane.f32.xlu0 %v4676_v48 }
 0xb41   : > { %v8076_v9 = vpop.eup %8075 }
 0xb42   : > { %v10066_v40 = vpop.eup %8077  ;;  %v4713_v46 = vmul.f32 %v8076_v9, %v9995_v14 }
 0xb43   : > { %4686 = vadd.xlane.f32.xlu0 %v4685_v4  ;;  %v4682_v51 = vsel %vm2196_vm3, %v10066_v40, 0.0  ;;  %v10071_v53 = vpop.eup %8079 }
 0xb44   : > { %v4729_v49 = vpack.c.bf16 %v4713_v46, %v4713_v46  ;;  %v4691_v14 = vsel %vm2196_vm3, %v10071_v53, 0.0  ;;  %v10080_v55 = vpop.eup %8081 }
 0xb45   : > { %v4688_v60 = vsel %vm2196_vm3, %v10080_v55, 0.0  ;;  %v10091_v0 = vpop.eup %8083 }
 0xb46   : > { %7195 = vmatmul.mubr.msk.bf16.vlgmr.msra.gmra.mxu0 %vm2196_vm3, %v4729_v49  ;;  %v4694_v13 = vsel %vm2196_vm3, %v10091_v0, 0.0 }
 0xb47   : > { %4683 = vadd.xlane.f32.xlu0 %v4682_v51  ;;  %7205 = vmatpush3.bf16.msra.mxu0 %v4841_v38 }
 0xb48   : > { %7206 = vmatprep.mubr.msk.bf16.mxu0 %vm8786_vm0, %v8785_v3  ;;  %7216 = vmatprep.subr.bf16.mxu0 %v8785_v3 }
 0xb4b   : > { %4692 = vadd.xlane.f32.xlu0 %v4691_v14 }
 0xb4c   : > { %7807 = vrot.lane.b32.xlu1 %v9829_v54, %s8790_s11 }
 0xb4f   : > { %4689 = vadd.xlane.f32.xlu0 %v4688_v60 }
 0xb65   : > { %7812 = vrot.lane.b32.xlu0 %v9829_v54, %s8791_s26 }
 0xb69   : > { %7817 = vrot.lane.b32.xlu0 %v9829_v54, %s8792_s3 }
 0xb6d   : > { %7822 = vrot.lane.b32.xlu0 %v9829_v54, %s8793_s29 }
 0xb70   : > { %4695 = vadd.xlane.f32.xlu1 %v4694_v13 }
 0xb7f   : > { %v4657_v5 = vpop.xlane.xlu1 %4656 }
 0xb80   : > { %8085 = vrcp.f32 %v4657_v5 }
 0xb87   : > { %v4663_v6 = vpop.xlane.xlu1 %4662 }
 0xb88   : > { %8087 = vrcp.f32 %v4663_v6  ;;  %v4660_v16 = vpop.xlane.xlu0 %4659 }
 0xb89   : > { %8089 = vrcp.f32 %v4660_v16 }
 0xb8d   : > { %v8086_v26 = vpop.eup %8085 }
 0xb8e   : > { %v4715_v1 = vmul.f32 %v8086_v26, %v10007_v58 }
 0xb8f   : > { %v4666_v31 = vpop.xlane.xlu0 %4665 }
 0xb90   : > { %8091 = vrcp.f32 %v4666_v31  ;;  %v4731_v54 = vpack.c.bf16 %v4715_v1, %v4715_v1 }
 0xb92   : > { %7207 = vmatmul.mubr.msk.bf16.vlgmr.msra.gmra.mxu0 %vm2196_vm3, %v4731_v54 }
 0xb93   : > { %7217 = vmatpush3.bf16.msra.mxu0 %v4933_v61  ;;  %7218 = vmatprep.mubr.msk.bf16.mxu0 %vm8786_vm0, %v8785_v3 }
 0xb94   : > { %7228 = vmatprep.subr.bf16.mxu0 %v8785_v3 }
 0xb95   : > { %v8088_v20 = vpop.eup %8087 }
 0xb96   : > { %v8090_v18 = vpop.eup %8089  ;;  %v4717_v58 = vmul.f32 %v8088_v20, %v10011_v32 }
 0xb97   : > { %v4716_v44 = vmul.f32 %v8090_v18, %v10013_v56 }
 0xb98   : > { %v4733_v59 = vpack.c.bf16 %v4717_v58, %v4717_v58 }
 0xb99   : > { %v4732_v47 = vpack.c.bf16 %v4716_v44, %v4716_v44 }
 0xb9a   : > { %7219 = vmatmul.mubr.msk.bf16.vlgmr.msra.gmra.mxu0 %vm2196_vm3, %v4733_v59 }
 0xb9b   : > { %7213 = vmatmul.mubr.msk.bf16.vlgmr.msra.gmra.mxu1 %vm2196_vm3, %v4732_v47  ;;  %7229 = vmatpush3.bf16.msra.mxu0 %v5025_v15 }
 0xb9c   : > { %7223 = vmatpush3.bf16.msra.mxu1 %v4979_v45  ;;  %7224 = vmatprep.mubr.msk.bf16.mxu1 %vm8786_vm0, %v8785_v3 }
 0xb9d   : > { %v8092_v32 = vpop.eup %8091  ;;  %7234 = vmatprep.subr.bf16.mxu1 %v8785_v3  ;;  %7230 = vmatprep.mubr.msk.bf16.mxu0 %vm8786_vm0, %v8785_v3 }
 0xb9e   : > { %v4718_v56 = vmul.f32 %v8092_v32, %v10019_v63  ;;  %7240 = vmatprep.subr.bf16.mxu0 %v8785_v3 }
 0xba0   : > { %v4734_v19 = vpack.c.bf16 %v4718_v56, %v4718_v56 }
 0xba3   : > { %7225 = vmatmul.mubr.msk.bf16.vlgmr.msra.gmra.mxu1 %vm2196_vm3, %v4734_v19 }
 0xba4   : > { %7235 = vmatpush3.bf16.msra.mxu1 %v5071_v43  ;;  %7236 = vmatprep.mubr.msk.bf16.mxu1 %vm8786_vm0, %v8785_v3 }
 0xba5   : > { %7246 = vmatprep.subr.bf16.mxu1 %v8785_v3 }
 0xbbc   : > { %v4669_v22 = vpop.xlane.xlu1 %4668 }
 0xbbd   : > { %8093 = vrcp.f32 %v4669_v22 }
 0xbc0   : > { %v4675_v24 = vpop.xlane.xlu0 %4674 }
 0xbc1   : > { %8095 = vrcp.f32 %v4675_v24 }
 0xbc4   : > { %v4681_v48 = vpop.xlane.xlu1 %4680  ;;  %v4672_v63 = vpop.xlane.xlu0 %4671 }
 0xbc5   : > { %8097 = vrcp.f32 %v4672_v63 }
 0xbc8   : > { %v7808_v52 = vpop.permute.xlu1 %7807  ;;  %v4678_v9 = vpop.xlane.xlu0 %4677 }
 0xbc9   : > { %v7809_v4 = vunpack.i.l.bf16 %v7808_v52  ;;  %8099 = vrcp.f32 %v4678_v9  ;;  %v7810_v62 = vunpack.i.h.bf16 %v7808_v52 }
 0xbca   : > { %v8094_v7 = vpop.eup %8093  ;;  %8101 = vrcp.f32 %v4681_v48 }
 0xbcb   : > { %v3809_v46 = vpack.c.bf16 %v7809_v4, %v7809_v4  ;;  %v4719_v49 = vmul.f32 %v8094_v7, %v10039_v34  ;;  %v3810_v41 = vpack.c.bf16 %v7810_v62, %v7810_v62 }
 0xbcc   : > { %v4687_v51 = vpop.xlane.xlu0 %4686 }
 0xbcd   : > { %v4735_v38 = vpack.c.bf16 %v4719_v49, %v4719_v49  ;;  %v5117_v14 = vsel %vm2392_vm2, %v3809_v46, 0  ;;  %v5163_v23 = vsel %vm2392_vm2, %v3810_v41, 0 }
 0xbce   : > { %v8096_v60 = vpop.eup %8095 }
 0xbcf   : > { %7231 = vmatmul.mubr.msk.bf16.vlgmr.msra.gmra.mxu0 %vm2196_vm3, %v4735_v38  ;;  %v4721_v8 = vmul.f32 %v8096_v60, %v10044_v30 }
 0xbd0   : > { %7241 = vmatpush3.bf16.msra.mxu0 %v5117_v14  ;;  %v4684_v37 = vpop.xlane.xlu0 %4683  ;;  %7242 = vmatprep.mubr.msk.bf16.mxu0 %vm8786_vm0, %v8785_v3 }
 0xbd1   : > { %7252 = vmatprep.subr.bf16.mxu0 %v8785_v3  ;;  %8103 = vrcp.f32 %v4684_v37  ;;  %v4737_v57 = vpack.c.bf16 %v4721_v8, %v4721_v8 }
 0xbd2   : > { %v8098_v34 = vpop.eup %8097  ;;  %8105 = vrcp.f32 %v4687_v51 }
 0xbd3   : > { %v4720_v13 = vmul.f32 %v8098_v34, %v10049_v36 }
 0xbd4   : > { %v4693_v5 = vpop.xlane.xlu0 %4692 }
 0xbd5   : > { %v4736_v6 = vpack.c.bf16 %v4720_v13, %v4720_v13 }
 0xbd6   : > { %v8100_v16 = vpop.eup %8099 }
 0xbd7   : > { %7243 = vmatmul.mubr.msk.bf16.vlgmr.msra.gmra.mxu0 %vm2196_vm3, %v4737_v57  ;;  %7237 = vmatmul.mubr.msk.bf16.vlgmr.msra.gmra.mxu1 %vm2196_vm3, %v4736_v6  ;;  %v4722_v30 = vmul.f32 %v8100_v16, %v10057_v50  ;;  %v8102_v36 = vpop.eup %8101 }
 0xbd8   : > { %v4690_v26 = vpop.xlane.xlu0 %4689  ;;  %7254 = vmatprep.mubr.msk.bf16.mxu0 %vm8786_vm0, %v8785_v3  ;;  %7247 = vmatpush3.bf16.msra.mxu1 %v5163_v23  ;;  %v4723_v61 = vmul.f32 %v8102_v36, %v10051_v27 }
 0xbd9   : > { %7248 = vmatprep.mubr.msk.bf16.mxu1 %vm8786_vm0, %v8785_v3  ;;  %8107 = vrcp.f32 %v4690_v26  ;;  %7258 = vmatprep.subr.bf16.mxu1 %v8785_v3  ;;  %v4738_v54 = vpack.c.bf16 %v4722_v30, %v4722_v30 }
 0xbda   : > { %8109 = vrcp.f32 %v4693_v5  ;;  %v4739_v59 = vpack.c.bf16 %v4723_v61, %v4723_v61 }
 0xbdc   : > { %v7813_v10 = vpop.permute.xlu0 %7812 }
 0xbdd   : > { %v7815_v1 = vunpack.i.h.bf16 %v7813_v10  ;;  %v7814_v31 = vunpack.i.l.bf16 %v7813_v10 }
 0xbde   : > { %v8104_v25 = vpop.eup %8103 }
 0xbdf   : > { %v3812_v12 = vpack.c.bf16 %v7815_v1, %v7815_v1  ;;  %v3811_v20 = vpack.c.bf16 %v7814_v31, %v7814_v31  ;;  %7249 = vmatmul.mubr.msk.bf16.vlgmr.msra.gmra.mxu1 %vm2196_vm3, %v4738_v54  ;;  %v4724_v11 = vmul.f32 %v8104_v25, %v10066_v40  ;;  %v8106_v15 = vpop.eup %8105 }
 0xbe0   : > { %v7818_v18 = vpop.permute.xlu0 %7817  ;;  %7260 = vmatprep.mubr.msk.bf16.mxu1 %vm8786_vm0, %v8785_v3  ;;  %v4725_v19 = vmul.f32 %v8106_v15, %v10061_v17 }
 0xbe1   : > { %v7820_v21 = vunpack.i.h.bf16 %v7818_v18  ;;  %v7819_v58 = vunpack.i.l.bf16 %v7818_v18  ;;  %v5209_v50 = vsel %vm2392_vm2, %v3811_v20, 0  ;;  %v5255_v44 = vsel %vm2392_vm2, %v3812_v12, 0 }
 0xbe2   : > { %7253 = vmatpush3.bf16.msra.mxu0 %v5209_v50  ;;  %7259 = vmatpush3.bf16.msra.mxu1 %v5255_v44  ;;  %v4740_v56 = vpack.c.bf16 %v4724_v11, %v4724_v11  ;;  %v4741_v48 = vpack.c.bf16 %v4725_v19, %v4725_v19 }
 0xbe3   : > { %v3814_v27 = vpack.c.bf16 %v7820_v21, %v7820_v21  ;;  %v3813_v47 = vpack.c.bf16 %v7819_v58, %v7819_v58  ;;  %7264 = vmatprep.subr.bf16.mxu0 %v8785_v3  ;;  %7270 = vmatprep.subr.bf16.mxu1 %v8785_v3 }
 0xbe4   : > { %v7823_v39 = vpop.permute.xlu0 %7822 }
 0xbe5   : > { %v7824_v45 = vunpack.i.l.bf16 %v7823_v39  ;;  %7255 = vmatmul.mubr.msk.bf16.vlgmr.msra.gmra.mxu0 %vm2196_vm3, %v4739_v59  ;;  %v5301_v32 = vsel %vm2392_vm2, %v3813_v47, 0  ;;  %v5347_v40 = vsel %vm2392_vm2, %v3814_v27, 0  ;;  %v7825_v43 = vunpack.i.h.bf16 %v7823_v39 }
 0xbe6   : > { %7265 = vmatpush3.bf16.msra.mxu0 %v5301_v32  ;;  %7266 = vmatprep.mubr.msk.bf16.mxu0 %vm8786_vm0, %v8785_v3  ;;  %v8108_v29 = vpop.eup %8107 }
 0xbe7   : > { %7276 = vmatprep.subr.bf16.mxu0 %v8785_v3  ;;  %7261 = vmatmul.mubr.msk.bf16.vlgmr.msra.gmra.mxu1 %vm2196_vm3, %v4740_v56  ;;  %v3815_v22 = vpack.c.bf16 %v7824_v45, %v7824_v45  ;;  %v4726_v24 = vmul.f32 %v8108_v29, %v10080_v55  ;;  %v8110_v52 = vpop.eup %8109  ;;  %v3816_v9 = vpack.c.bf16 %v7825_v43, %v7825_v43 }
 0xbe8   : > { %7271 = vmatpush3.bf16.msra.mxu1 %v5347_v40  ;;  %7272 = vmatprep.mubr.msk.bf16.mxu1 %vm8786_vm0, %v8785_v3  ;;  %v4727_v46 = vmul.f32 %v8110_v52, %v10071_v53 }
 0xbe9   : > { %7282 = vmatprep.subr.bf16.mxu1 %v8785_v3  ;;  %v5393_v4 = vsel %vm2392_vm2, %v3815_v22, 0  ;;  %v4742_v7 = vpack.c.bf16 %v4726_v24, %v4726_v24  ;;  %v5439_v49 = vsel %vm2392_vm2, %v3816_v9, 0 }
 0xbea   : > { %v10159_v63 = vpop.f32.mrf.mxu1  ;;  %v4743_v38 = vpack.c.bf16 %v4727_v46, %v4727_v46 }
 0xbec   : > { %v7202_v17 = vpop.f32.mrf.mxu1 }
 0xbed   : > { %7267 = vmatmul.mubr.msk.bf16.vlgmr.msra.gmra.mxu0 %vm2196_vm3, %v4741_v48 }
 0xbee   : > { %7277 = vmatpush3.bf16.msra.mxu0 %v5393_v4  ;;  %7278 = vmatprep.mubr.msk.bf16.mxu0 %vm8786_vm0, %v8785_v3  ;;  %v4834_v55 = vpop.f32.mrf.mxu1 }
 0xbef   : > { %7288 = vmatprep.subr.bf16.mxu0 %v8785_v3  ;;  %7273 = vmatmul.mubr.msk.bf16.vlgmr.msra.gmra.mxu1 %vm2196_vm3, %v4742_v7 }
 0xbf0   : > { %v7203_v51 = vpop.f32.mrf.mxu1  ;;  %7283 = vmatpush3.bf16.msra.mxu1 %v5439_v49  ;;  %7284 = vmatprep.mubr.msk.bf16.mxu1 %vm8786_vm0, %v8785_v3 }
 0xbf5   : > { %7279 = vmatmul.mubr.msk.bf16.vlgmr.msra.gmra.mxu0 %vm2196_vm3, %v4743_v38 }
 0xbf6   : > { %7304 = vmatprep.mubr.msk.bf16.mxu0 %vm8786_vm0, %v8785_v3 }
 0xbf9   : > { %v4696_v14 = vpop.xlane.xlu1 %4695 }
 0xbfa   : > { %8111 = vrcp.f32 %v4696_v14 }
 0xc06   : > { %v10174_v60 = vpop.f32.mrf.mxu0 }
 0xc07   : > { %v8112_v53 = vpop.eup %8111 }
 0xc08   : > { %v4728_v62 = vmul.f32 %v8112_v53, %v10091_v0  ;;  %v7196_v37 = vpop.f32.mrf.mxu0 }
 0xc0a   : > { %v4744_v8 = vpack.c.bf16 %v4728_v62, %v4728_v62  ;;  %v4788_v34 = vpop.f32.mrf.mxu0 }
 0xc0c   : > { %7285 = vmatmul.mubr.msk.bf16.vlgmr.msra.gmra.mxu1 %vm2196_vm3, %v4744_v8  ;;  %v7197_v13 = vpop.f32.mrf.mxu0 }
 0xc0d   : > { %5855 = vmatprep.mubr.bf16.mxu1 %v8784_v2 }
 0xc52   : > { %v4877_v41 = vpop.f32.mrf.mxu0 }
 0xc54   : > { %v7208_v5 = vpop.f32.mrf.mxu0 }
 0xc56   : > { %v4880_v57 = vpop.f32.mrf.mxu0 }
 0xc58   : > { %v7209_v6 = vpop.f32.mrf.mxu0 }
 0xc5a   : > { %v4969_v16 = vpop.f32.mrf.mxu0 }
 0xc5b   : > { %v4923_v23 = vpop.f32.mrf.mxu1 }
 0xc5c   : > { %v7826_v26 = vpack.i.bf16 %v4923_v23, %v4877_v41  ;;  %v7220_v30 = vpop.f32.mrf.mxu0 }
 0xc5d   : > { %v7214_v36 = vpop.f32.mrf.mxu1 }
 0xc5e   : > { %7827 = vrot.lane.b32.xlu0 %v7826_v26, %s8793_s29  ;;  %v4972_v0 = vpop.f32.mrf.mxu0  ;;  %s5906_s29 = scalar_lea.vmem [#allocation29], %s10448_s14 }
 0xc5f   : > { %v4926_v10 = vpop.f32.mrf.mxu1 }
 0xc60   : > { %v7221_v1 = vpop.f32.mrf.mxu0 }
 0xc61   : > { %v7215_v31 = vpop.f32.mrf.mxu1 }
 0xc63   : > { %v5015_v54 = vpop.f32.mrf.mxu1 }
 0xc64   : > { %v7831_v25 = vpack.i.bf16 %v5015_v54, %v4969_v16 }
 0xc65   : > { %v7226_v61 = vpop.f32.mrf.mxu1 }
 0xc66   : > { %7832 = vrot.lane.b32.xlu0 %v7831_v25, %s8792_s3  ;;  %s10184_s3 = scalar_lea.vmem [#allocation18], %s9701_s16  ;;  %s6075_s16 = scalar_lea.vmem [#allocation30], %s10448_s14 }
 0xc67   : > { %v5018_v2 = vpop.f32.mrf.mxu1  ;;  %v7933_v9 = vld [vmem:[%s10184_s3 + $0x38] sm:$0xff]   ;;  %v7934_v7 = vld [vmem:[%s10184_s3 + $0x30] sm:$0xff]   ;;  %v7935_v38 = vld [vmem:[%s10184_s3 + $0x28] sm:$0xff]  }
 0xc68   : > { %7289 = vmatpush3.bf16.msra.mxu0 %v7933_v9  ;;  %v7936_v34 = vld [vmem:[%s10184_s3 + $0x20] sm:$0xff]   ;;  %v7937_v6 = vld [vmem:[%s10184_s3 + $0x18] sm:$0xff]   ;;  %v7938_v26 = vld [vmem:[%s10184_s3 + $0x10] sm:$0xff]  }
 0xc69   : > { %v7227_v12 = vpop.f32.mrf.mxu1  ;;  %7290 = vmatprep.subr.bf16.mxu0 %v8785_v3  ;;  %v7939_v30 = vld [vmem:[%s10184_s3 + $0x8] sm:$0xff]   ;;  %v7940_v36 = vld [vmem:[%s10184_s3] sm:$0xff]  }
 0xc6c   : > { %7291 = vmatpush3.bf16.msra.mxu0 %v7934_v7 }
 0xc6d   : > { %7292 = vmatprep.subr.bf16.mxu0 %v8785_v3 }
 0xc70   : > { %7293 = vmatpush3.bf16.msra.mxu0 %v7935_v38 }
 0xc71   : > { %7294 = vmatprep.subr.bf16.mxu0 %v8785_v3 }
 0xc74   : > { %7295 = vmatpush3.bf16.msra.mxu0 %v7936_v34 }
 0xc75   : > { %7296 = vmatprep.subr.bf16.mxu0 %v8785_v3 }
 0xc78   : > { %7297 = vmatpush3.bf16.msra.mxu0 %v7937_v6 }
 0xc79   : > { %7298 = vmatprep.subr.bf16.mxu0 %v8785_v3 }
 0xc7c   : > { %7299 = vmatpush3.bf16.msra.mxu0 %v7938_v26 }
 0xc7d   : > { %7300 = vmatprep.subr.bf16.mxu0 %v8785_v3 }
 0xc80   : > { %7301 = vmatpush3.bf16.msra.mxu0 %v7939_v30 }
 0xc81   : > { %7302 = vmatprep.subr.bf16.mxu0 %v8785_v3 }
 0xc84   : > { %7303 = vmatpush3.bf16.msra.mxu0 %v7940_v36 }
 0xc8f   : > { %v5061_v20 = vpop.f32.mrf.mxu0 }
 0xc91   : > { %v7232_v18 = vpop.f32.mrf.mxu0 }
 0xc93   : > { %v5064_v21 = vpop.f32.mrf.mxu0 }
 0xc95   : > { %v7233_v58 = vpop.f32.mrf.mxu0 }
 0xc97   : > { %v5153_v50 = vpop.f32.mrf.mxu0  ;;  %v5107_v11 = vpop.f32.mrf.mxu1 }
 0xc98   : > { %v7836_v44 = vpack.i.bf16 %v5107_v11, %v5061_v20 }
 0xc99   : > { %v7244_v59 = vpop.f32.mrf.mxu0  ;;  %v7238_v27 = vpop.f32.mrf.mxu1 }
 0xc9a   : > { %7837 = vrot.lane.b32.xlu1 %v7836_v44, %s8791_s26  ;;  %s5730_s26 = scalar_lea.vmem [#allocation26], %s6545_s22 }
 0xc9b   : > { %v5156_v47 = vpop.f32.mrf.mxu0  ;;  %v5110_v15 = vpop.f32.mrf.mxu1 }
 0xc9d   : > { %v7245_v39 = vpop.f32.mrf.mxu0  ;;  %v7239_v45 = vpop.f32.mrf.mxu1 }
 0xc9f   : > { %v5199_v32 = vpop.f32.mrf.mxu1 }
 0xca0   : > { %v7841_v56 = vpack.i.bf16 %v5199_v32, %v5153_v50 }
 0xca1   : > { %v7250_v40 = vpop.f32.mrf.mxu1 }
 0xca2   : > { %7842 = vrot.lane.b32.xlu0 %v7841_v56, %s8790_s11  ;;  %s5701_s11 = scalar_lea.vmem [#allocation23], %s10448_s14 }
 0xca3   : > { %v5202_v29 = vpop.f32.mrf.mxu1 }
 0xca5   : > { %v5245_v19 = vpop.f32.mrf.mxu0  ;;  %v7251_v43 = vpop.f32.mrf.mxu1 }
 0xca7   : > { %v7256_v22 = vpop.f32.mrf.mxu0  ;;  %v5291_v24 = vpop.f32.mrf.mxu1 }
 0xca8   : > { %v7846_v48 = vpack.i.bf16 %v5291_v24, %v5245_v19 }
 0xca9   : > { %v5248_v52 = vpop.f32.mrf.mxu0  ;;  %v7262_v17 = vpop.f32.mrf.mxu1 }
 0xcaa   : > { %7847 = vrot.lane.b32.xlu0 %v7846_v48, %s8789_s7  ;;  %s5691_s7 = scalar_lea.vmem [#allocation21], %s10448_s14 }
 0xcab   : > { %v7257_v4 = vpop.f32.mrf.mxu0  ;;  %v5294_v46 = vpop.f32.mrf.mxu1 }
 0xcad   : > { %v5337_v55 = vpop.f32.mrf.mxu0  ;;  %v7263_v49 = vpop.f32.mrf.mxu1 }
 0xcaf   : > { %v7268_v51 = vpop.f32.mrf.mxu0  ;;  %v5383_v14 = vpop.f32.mrf.mxu1 }
 0xcb0   : > { %v7851_v53 = vpack.i.bf16 %v5383_v14, %v5337_v55 }
 0xcb1   : > { %v5340_v62 = vpop.f32.mrf.mxu0  ;;  %v7274_v37 = vpop.f32.mrf.mxu1 }
 0xcb2   : > { %7852 = vrot.lane.b32.xlu0 %v7851_v53, %s8788_s10  ;;  %s10224_s10 = scalar_lea.vmem [#allocation24], %s9749_s15  ;;  %s6085_s15 = scalar_lea.vmem [#allocation32], %s10448_s14 }
 0xcb3   : > { %v7269_v8 = vpop.f32.mrf.mxu0  ;;  %v5386_v13 = vpop.f32.mrf.mxu1  ;;  %v7946_v30 = vld [vmem:[%s10224_s10 + $0x64] ss:$8 sps:$4 sm:$0xff]   ;;  %v7944_v36 = vld [vmem:[%s10224_s10 + $0x60] ss:$8 sps:$4 sm:$0xff]  }
 0xcb4   : > { %v7941_v13 = vld [vmem:[%s10224_s10 + $0x70] ss:$8 sps:$4 sm:$0xff]  }
 0xcb5   : > { %v5429_v41 = vpop.f32.mrf.mxu0  ;;  %v7275_v5 = vpop.f32.mrf.mxu1 }
 0xcb7   : > { %v7280_v57 = vpop.f32.mrf.mxu0 }
 0xcb9   : > { %v5432_v16 = vpop.f32.mrf.mxu0 }
 0xcbb   : > { %v7281_v23 = vpop.f32.mrf.mxu0 }
 0xccc   : > { %v5475_v0 = vpop.f32.mrf.mxu1 }
 0xccd   : > { %v7856_v10 = vpack.i.bf16 %v5475_v0, %v5429_v41  ;;  %v7943_v41 = vld [vmem:[%s10224_s10 + $0x74] ss:$8 sps:$4 sm:$0xff]  }
 0xcce   : > { %v7286_v1 = vpop.f32.mrf.mxu1  ;;  %5823 = vmatprep.subr.bf16.mxu1 %v7943_v41  ;;  %v7949_v0 = vld [vmem:[%s10224_s10 + $0x54] ss:$8 sps:$4 sm:$0xff]  }
 0xccf   : > { %7857 = vrot.lane.b32.xlu0 %v7856_v10, %s8787_s13  ;;  %s5570_s13 = scalar_lea.vmem [#allocation20], %s10448_s14  ;;  %5824 = vmatpush1.bf16.msra.mxu1 %v7941_v13  ;;  %v7947_v10 = vld [vmem:[%s10224_s10 + $0x50] ss:$8 sps:$4 sm:$0xff]   ;;  %v7952_v1 = vld [vmem:[%s10224_s10 + $0x44] ss:$8 sps:$4 sm:$0xff]  }
 0xcd0   : > { %v5478_v31 = vpop.f32.mrf.mxu1  ;;  %v7828_v25 = vpop.permute.xlu0 %7827  ;;  %v6595_v49 = vld [vmem:[%s5570_s13] ss:$0 sm:$0xff]  ;;  %5825 = vmatprep.subr.bf16.mxu1 %v7946_v30 }
 0xcd1   : > { %v7830_v18 = vunpack.i.h.bf16 %v7828_v25  ;;  %v7829_v21 = vunpack.i.l.bf16 %v7828_v25  ;;  %v7950_v31 = vld [vmem:[%s10224_s10 + $0x40] ss:$8 sps:$4 sm:$0xff]   ;;  %v7953_v25 = vld [vmem:[%s10224_s10 + $0x30] ss:$8 sps:$4 sm:$0xff]  }
 0xcd2   : > { %v7287_v54 = vpop.f32.mrf.mxu1 }
 0xcd3   : > { %v5538_v47 = vsel %vm1459_vm1, %v10159_v63, %v7830_v18  ;;  %v5537_v15 = vsel %vm1459_vm1, %v10174_v60, %v7829_v21  ;;  %5826 = vmatpush1.bf16.msra.mxu1 %v7944_v36  ;;  %v7955_v54 = vld [vmem:[%s10224_s10 + $0x34] ss:$8 sps:$4 sm:$0xff]   ;;  %v7964_v18 = vld [vmem:[%s10224_s10 + $0x4] ss:$8 sps:$4 sm:$0xff]   ;;  %v7962_v21 = vld [vmem:[%s10224_s10] ss:$8 sps:$4 sm:$0xff]  }
 0xcd4   : > { %5827 = vmatprep.subr.bf16.mxu1 %v7949_v0 }
 0xcd7   : > { %5828 = vmatpush1.bf16.msra.mxu1 %v7947_v10 }
 0xcd8   : > { %v7833_v61 = vpop.permute.xlu0 %7832  ;;  %5829 = vmatprep.subr.bf16.mxu1 %v7952_v1 }
 0xcd9   : > { %v7835_v58 = vunpack.i.h.bf16 %v7833_v61  ;;  %v7834_v50 = vunpack.i.l.bf16 %v7833_v61  ;;  %v7958_v61 = vld [vmem:[%s10224_s10 + $0x24] ss:$8 sps:$4 sm:$0xff]  }
 0xcdb   : > { %v5540_v32 = vsel %vm3184_vm4, %v5538_v47, %v7835_v58  ;;  %v5539_v56 = vsel %vm3184_vm4, %v5537_v15, %v7834_v50  ;;  %5830 = vmatpush1.bf16.msra.mxu1 %v7950_v31  ;;  %v7965_v58 = vld [vmem:[%s9771_s12 + $0x78] sm:$0xff]   ;;  %v7972_v47 = vld [vmem:[%s9771_s12 + $0x20] sm:$0xff]  }
 0xcdc   : > { %5831 = vmatprep.subr.bf16.mxu1 %v7955_v54  ;;  %v7966_v50 = vld [vmem:[%s9771_s12 + $0x38] sm:$0xff]   ;;  %6822 = vmatprep.subr.bf16.mxu0 %v7965_v58 }
 0xcdd   : > { %v7973_v15 = vld [vmem:[%s9771_s12 + $0x58] sm:$0xff]  }
 0xcdf   : > { %5832 = vmatpush1.bf16.msra.mxu1 %v7953_v25 }
 0xce0   : > { %5833 = vmatprep.subr.bf16.mxu1 %v7958_v61 }
 0xd0c   : > { %v7838_v20 = vpop.permute.xlu1 %7837 }
 0xd0d   : > { %v7840_v11 = vunpack.i.h.bf16 %v7838_v20  ;;  %v7839_v3 = vunpack.i.l.bf16 %v7838_v20  ;;  %v7961_v20 = vld [vmem:[%s10224_s10 + $0x14] ss:$8 sps:$4 sm:$0xff]  }
 0xd0f   : > { %v5542_v19 = vsel %vm3187_vm5, %v5540_v32, %v7840_v11  ;;  %v5541_v43 = vsel %vm3187_vm5, %v5539_v56, %v7839_v3  ;;  %v7967_v11 = vld [vmem:[%s9771_s12 + $0x70] sm:$0xff]  }
 0xd10   : > { %v7968_v3 = vld [vmem:[%s9771_s12 + $0x30] sm:$0xff]  }
 0xd14   : > { %v7843_v2 = vpop.permute.xlu0 %7842 }
 0xd15   : > { %v7845_v59 = vunpack.i.h.bf16 %v7843_v2  ;;  %v7844_v27 = vunpack.i.l.bf16 %v7843_v2  ;;  %v7956_v2 = vld [vmem:[%s10224_s10 + $0x20] ss:$8 sps:$4 sm:$0xff]  }
 0xd16   : > { %5834 = vmatpush1.bf16.msra.mxu1 %v7956_v2 }
 0xd17   : > { %v5544_v22 = vsel %vm3190_vm6, %v5542_v19, %v7845_v59  ;;  %v5543_v63 = vsel %vm3190_vm6, %v5541_v43, %v7844_v27  ;;  %5835 = vmatprep.subr.bf16.mxu1 %v7961_v20  ;;  %v7970_v59 = vld [vmem:[%s9771_s12 + $0x28] sm:$0xff]   ;;  %v7971_v27 = vld [vmem:[%s9771_s12 + $0x60] sm:$0xff]  }
 0xd1c   : > { %v7848_v12 = vpop.permute.xlu0 %7847 }
 0xd1d   : > { %v7850_v39 = vunpack.i.h.bf16 %v7848_v12  ;;  %v7849_v45 = vunpack.i.l.bf16 %v7848_v12  ;;  %v7959_v12 = vld [vmem:[%s10224_s10 + $0x10] ss:$8 sps:$4 sm:$0xff]  }
 0xd1e   : > { %5836 = vmatpush1.bf16.msra.mxu1 %v7959_v12 }
 0xd1f   : > { %v5546_v60 = vsel %vm3193_vm7, %v5544_v22, %v7850_v39  ;;  %v5545_v48 = vsel %vm3193_vm7, %v5543_v63, %v7849_v45  ;;  %5837 = vmatprep.subr.bf16.mxu1 %v7964_v18  ;;  %v7974_v39 = vld [vmem:[%s9771_s12 + $0x18] sm:$0xff]   ;;  %v6604_v63 = vld [vmem:[%s5691_s7] ss:$0 sm:$0xff] }
 0xd22   : > { %5838 = vmatpush1.bf16.msra.mxu1 %v7962_v21 }
 0xd24   : > { %v7853_v44 = vpop.permute.xlu0 %7852 }
 0xd25   : > { %v7855_v40 = vunpack.i.h.bf16 %v7853_v44  ;;  %v7854_v29 = vunpack.i.l.bf16 %v7853_v44  ;;  %v7969_v44 = vld [vmem:[%s9771_s12 + $0x68] sm:$0xff]  }
 0xd27   : > { %v5548_v17 = vsel %vm3196_vm8, %v5546_v60, %v7855_v40  ;;  %v5547_v4 = vsel %vm3196_vm8, %v5545_v48, %v7854_v29 }
 0xd41   : > { %v7858_v24 = vpop.permute.xlu0 %7857 }
 0xd42   : > { %v7860_v52 = vunpack.i.h.bf16 %v7858_v24  ;;  %v7859_v9 = vunpack.i.l.bf16 %v7858_v24 }
 0xd44   : > { %v5550_v7 = vsel %vm3199_vm9, %v5548_v17, %v7860_v52  ;;  %v5549_v46 = vsel %vm3199_vm9, %v5547_v4, %v7859_v9  ;;  %v6605_v52 = vld [vmem:[%s5701_s11] ss:$0 sm:$0xff] }
 0xd45   : > { %v5551_v55 = vpack.c.bf16 %v5550_v7, %v5549_v46  ;;  %v7975_v46 = vld [vmem:[%s9771_s12 + $0x50] sm:$0xff]  }
 0xd47   : > { %7305 = vmatmul.mubr.bf16.vlgmr.msra.gmra.mxu0 %v5551_v55  ;;  %v7976_v55 = vld [vmem:[%s9771_s12 + $0x10] sm:$0xff]  }
 0xd48   : > { %6823 = vmatpush3.bf16.msra.mxu0 %v7966_v50 }
 0xd49   : > { %6824 = vmatprep.subr.bf16.mxu0 %v7967_v11 }
 0xd4c   : > { %6825 = vmatpush3.bf16.msra.mxu0 %v7968_v3 }
 0xd4d   : > { %6826 = vmatprep.subr.bf16.mxu0 %v7969_v44 }
 0xd50   : > { %6827 = vmatpush3.bf16.msra.mxu0 %v7970_v59 }
 0xd51   : > { %6828 = vmatprep.subr.bf16.mxu0 %v7971_v27 }
 0xd54   : > { %6829 = vmatpush3.bf16.msra.mxu0 %v7972_v47 }
 0xd55   : > { %6830 = vmatprep.subr.bf16.mxu0 %v7973_v15 }
 0xd58   : > { %6831 = vmatpush3.bf16.msra.mxu0 %v7974_v39 }
 0xd59   : > { %6832 = vmatprep.subr.bf16.mxu0 %v7975_v46 }
 0xd5c   : > { %6833 = vmatpush3.bf16.msra.mxu0 %v7976_v55 }
 0xe07   : > { %v5660_v51 = vpop.f32.mrf.mxu0 }
 0xe08   : > { %v5661_v38 = vadd.f32 %v6595_v49, %v5660_v51  ;;  %v7978_v51 = vld [vmem:[%s9771_s12 + $0x8] sm:$0xff]  }
 0xe09   : > { %v7306_v14 = vpop.f32.mrf.mxu0 }
 0xe0a   : > { %v5667_v53 = vadd.f32 %v5661_v38, %v9802_v42  ;;  %v7979_v38 = vld [vmem:[%s9771_s12 + $0x40] sm:$0xff]  }
 0xe0b   : > { %v5663_v62 = vpop.f32.mrf.mxu0  ;;  %v7980_v14 = vld [vmem:[%s9771_s12] sm:$0xff]  }
 0xe0c   : > { %v5664_v37 = vadd.f32 %v6595_v49, %v5663_v62  ;;  %5669 = vadd.xlane.f32.xlu1 %v5667_v53  ;;  %v7977_v49 = vld [vmem:[%s9771_s12 + $0x48] sm:$0xff]  }
 0xe0d   : > { %v7307_v8 = vpop.f32.mrf.mxu0  ;;  %6834 = vmatprep.subr.bf16.mxu0 %v7977_v49 }
 0xe0e   : > { %v5668_v34 = vadd.f32 %v5664_v37, %v9804_v28  ;;  %6835 = vmatpush3.bf16.msra.mxu0 %v7978_v51 }
 0xe0f   : > { %6836 = vmatprep.subr.bf16.mxu0 %v7979_v38 }
 0xe10   : > { %5671 = vadd.xlane.f32.xlu0 %v5668_v34 }
 0xe12   : > { %6837 = vmatpush3.bf16.msra.mxu0 %v7980_v14 }
 0xe95   : > { %v5670_v42 = vpop.xlane.xlu1 %5669 }
 0xe96   : > { %v5673_v5 = vmul.f32 0.0078125, %v5670_v42 }
 0xe98   : > { %v10228_v57 = vsub.f32 %v5667_v53, %v5673_v5  ;;  %v5731_v53 = vld [vmem:[%s5730_s26] sm:$0x3] }
 0xe99   : > { %v5672_v6 = vpop.xlane.xlu0 %5671  ;;  %v5740_v37 = vrot.slane %v5731_v53, %v9312_v33  ;;  %v5736_v8 = vrot.slane %v5731_v53, %v9314_v35  ;;  %v6624_v33 = vld [vmem:[%s5906_s29] ss:$0 sm:$0xff] }
 0xe9a   : > { %v5674_v28 = vmul.f32 0.0078125, %v5672_v6  ;;  %v5677_v16 = vmul.f32 %v10228_v57, %v10228_v57 }
 0xe9c   : > { %v10232_v23 = vsub.f32 %v5668_v34, %v5674_v28  ;;  %5679 = vadd.xlane.f32.xlu0 %v5677_v16 }
 0xe9e   : > { %v5678_v26 = vmul.f32 %v10232_v23, %v10232_v23 }
 0xea0   : > { %5681 = vadd.xlane.f32.xlu1 %v5678_v26 }
 0xf25   : > { %v5680_v45 = vpop.xlane.xlu0 %5679 }
 0xf26   : > { %v5683_v32 = vmul.f32 0.0078125, %v5680_v45 }
 0xf28   : > { %v5685_v56 = vadd.f32 1e-05, %v5683_v32 }
 0xf29   : > { %v5682_v40 = vpop.xlane.xlu1 %5681 }
 0xf2a   : > { %8113 = vrsqrt.f32 %v5685_v56  ;;  %v5684_v29 = vmul.f32 0.0078125, %v5682_v40  ;;  %v6641_v56 = vld [vmem:[%s6075_s16] ss:$0 sm:$0xff] }
 0xf2c   : > { %v5686_v19 = vadd.f32 1e-05, %v5684_v29  ;;  %v6642_v29 = vld [vmem:[%s6085_s15] ss:$0 sm:$0xff] }
 0xf2e   : > { %8115 = vrsqrt.f32 %v5686_v19 }
 0xf37   : > { %v8114_v43 = vpop.eup %8113 }
 0xf38   : > { %v5689_v22 = vmul.f32 %v8114_v43, %v10228_v57 }
 0xf3a   : > { %v5699_v48 = vmul.f32 %v6604_v63, %v5689_v22 }
 0xf3b   : > { %v8116_v24 = vpop.eup %8115 }
 0xf3c   : > { %v5690_v60 = vmul.f32 %v8116_v24, %v10232_v23  ;;  %v5709_v17 = vadd.f32 %v6605_v52, %v5699_v48 }
 0xf3e   : > { %v5700_v9 = vmul.f32 %v6604_v63, %v5690_v60 }
 0xf40   : > { %v5710_v4 = vadd.f32 %v6605_v52, %v5700_v9 }
 0xf42   : > { %v5711_v7 = vpack.c.bf16 %v5710_v4, %v5709_v17 }
 0xf44   : > { %5856 = vmatmul.mubr.bf16.vlgmr.msra.gmra.mxu1 %v5711_v7 }
0x1004   : > { %v5857_v62 = vpop.f32.mrf.mxu1 }
0x1005   : > { %v5858_v5 = vadd.f32 %v5857_v62, %v5736_v8 }
0x1006   : > { %v5859_v34 = vpop.f32.mrf.mxu1 }
0x1007   : > { %v5860_v41 = vadd.f32 %v5859_v34, %v5740_v37  ;;  %v5866_v26 = vmax.f32 %v5858_v5, 0.0 }
0x1008   : > { %v5861_v13 = vpop.f32.mrf.mxu1 }
0x1009   : > { %v5862_v42 = vadd.f32 %v5861_v13, %v5736_v8  ;;  %v5867_v16 = vmax.f32 %v5860_v41, 0.0 }
0x100a   : > { %v5863_v57 = vpop.f32.mrf.mxu1 }
0x100b   : > { %v5864_v6 = vadd.f32 %v5863_v57, %v5740_v37  ;;  %v5868_v28 = vmax.f32 %v5862_v42, 0.0 }
0x100d   : > { %v5869_v23 = vmax.f32 %v5864_v6, 0.0  ;;  %v5870_v36 = vpack.c.bf16 %v5868_v28, %v5866_v26 }
0x100f   : > { %v5871_v30 = vpack.c.bf16 %v5869_v23, %v5867_v16 }
0x1011   : > { %6042 = vmatprep.mubr.bf16.mxu0 %v5871_v30 }
0x1012   : > { %6043 = vmatmul.mubr.bf16.vlgmr.msra.gmra.mxu0 %v5870_v36 }
0x10d2   : > { %v6838_v0 = vpop.f32.mrf.mxu0 }
0x10d4   : > { %v6839_v35 = vpop.f32.mrf.mxu0 }
0x10d5   : > { %v6840_v10 = vadd.f32 %v6839_v35, %v6838_v0 }
0x10d6   : > { %v6841_v1 = vpop.f32.mrf.mxu0 }
0x10d7   : > { %v6045_v31 = vadd.f32 %v6840_v10, %v6624_v33 }
0x10d8   : > { %v6842_v54 = vpop.f32.mrf.mxu0 }
0x10d9   : > { %v6843_v25 = vadd.f32 %v6842_v54, %v6841_v1  ;;  %v6051_v61 = vadd.f32 %v6045_v31, %v5709_v17 }
0x10db   : > { %v6048_v2 = vadd.f32 %v6843_v25, %v6624_v33  ;;  %6053 = vadd.xlane.f32.xlu0 %v6051_v61 }
0x10dd   : > { %v6052_v12 = vadd.f32 %v6048_v2, %v5710_v4 }
0x10df   : > { %6055 = vadd.xlane.f32.xlu1 %v6052_v12 }
0x1164   : > { %v6054_v20 = vpop.xlane.xlu0 %6053 }
0x1165   : > { %v6057_v18 = vmul.f32 0.0078125, %v6054_v20 }
0x1167   : > { %v6059_v21 = vsub.f32 %v6051_v61, %v6057_v18 }
0x1168   : > { %v6056_v58 = vpop.xlane.xlu1 %6055 }
0x1169   : > { %v6058_v50 = vmul.f32 0.0078125, %v6056_v58  ;;  %v6061_v11 = vmul.f32 %v6059_v21, %v6059_v21 }
0x116b   : > { %v6060_v3 = vsub.f32 %v6052_v12, %v6058_v50  ;;  %6063 = vadd.xlane.f32.xlu0 %v6061_v11 }
0x116d   : > { %v6062_v44 = vmul.f32 %v6060_v3, %v6060_v3 }
0x116f   : > { %6065 = vadd.xlane.f32.xlu1 %v6062_v44 }
0x11f4   : > { %v6064_v59 = vpop.xlane.xlu0 %6063 }
0x11f5   : > { %v6067_v27 = vmul.f32 0.0078125, %v6064_v59 }
0x11f7   : > { %v6069_v47 = vadd.f32 1e-05, %v6067_v27 }
0x11f8   : > { %v6066_v15 = vpop.xlane.xlu1 %6065 }
0x11f9   : > { %8117 = vrsqrt.f32 %v6069_v47  ;;  %v6068_v39 = vmul.f32 0.0078125, %v6066_v15 }
0x11fb   : > { %v6070_v45 = vadd.f32 1e-05, %v6068_v39 }
0x11fd   : > { %8119 = vrsqrt.f32 %v6070_v45 }
0x1206   : > { %v8118_v32 = vpop.eup %8117 }
0x1207   : > { %v6073_v40 = vmul.f32 %v8118_v32, %v6059_v21 }
0x1209   : > { %v6083_v19 = vmul.f32 %v6641_v56, %v6073_v40 }
0x120a   : > { %v8120_v43 = vpop.eup %8119 }
0x120b   : > { %v6093_v22 = vadd.f32 %v6642_v29, %v6083_v19  ;;  %v6074_v63 = vmul.f32 %v8120_v43, %v6060_v3 }
0x120d   : > { %6095 = vst [vmem:[#allocation2] sm:$0xff] %v6093_v22  ;;  %v6084_v24 = vmul.f32 %v6641_v56, %v6074_v63  ;;  %6100 = sbr.rel (%p6643_p1) target bundleno = 4627 (0x1213), region = 192 }
0x120f   : > { %v6094_v60 = vadd.f32 %v6642_v29, %v6084_v24 }
0x1211   : > { %6096 = vst [vmem:[#allocation2 + $0x8] sm:$0xff] %v6094_v60 }
0x1212   : > { %6101 = vst [vmem:[%s9264_s2] sm:$0xff] %v6093_v22  ;;  %6102 = vst [vmem:[%s9264_s2 + $0x8] sm:$0xff] %v6094_v60 }
0x1213 PF: > { %s10451_s12 = sld [smem:[#allocation49_spill]]  ;;  %s6117_s3 = sshll.u32 %s9264_s2, 4  ;;  %s10287_s3 = int_to_ptr.vmem [resolvable:$true] %s6117_s3 }
0x1214   : > { %s10452_s9 = sld [smem:[#allocation69_spill]]  ;;  %s6104_s14 = scalar_lea.sflag [#allocation5], %s9214_s30 }
0x1215   : > { %s8619_s13 = scalar_lea.vmem %s10287_s3, 256  ;;  %s8794_s10 = smov [#allocation33]  }
0x1216   : > { %p8620_p11 = scmp.ne.s32.totalorder %s10287_s3, %s8619_s13  ;;  %s8623_s7 = sshll.u32 %s8794_s10, 4  ;;  %s8624_s7 = int_to_ptr.vmem [resolvable:$false] %s8623_s7 }
0x1217   : > { %s8625_s11 = scalar_lea.vmem %s8624_s7, 512  ;;  %p8626_p0 = scmp.lt.s32.totalorder %s10287_s3, %s8624_s7 }
0x1218   : > { %p8621_p12 = pnand %p8620_p11, %p9179_p7  ;;  %p8627_p2 = scmp.lt.s32.totalorder %s8625_s11, %s8619_s13 }
0x1219   : > { %s6657_s6 = sshll.u32 %s10451_s12, 8 }
0x121a   : > { %s10284_s24 = scalar_lea.hbm %s10452_s9, %s6657_s6  ;;  %p8622_p13 = pneg %p8621_p12 }
0x121b   : > { %p8628_p8 = por %p8627_p2, %p8626_p0 }
0x121d   : > { %p8629_p3 = pnand %p8628_p8, %p8622_p13 }
0x121f   : > { %8632 = shalt.err (!%p8629_p3)
}
0x1220   : > { %s8633_s2 = scalar_lea.hbm %s10284_s24, 256  ;;  %s8637_s16 = scalar_lea.hbm %s10452_s9, 512 }
0x1221   : > { %p8634_p5 = scmp.ne.s32.totalorder %s10284_s24, %s8633_s2  ;;  %p8638_p6 = scmp.lt.s32.totalorder %s10284_s24, %s10452_s9 }
0x1222   : > { %p8639_p1 = scmp.lt.s32.totalorder %s8637_s16, %s8633_s2 }
0x1223   : > { %p8635_p10 = pnand %p8634_p5, %p9179_p7 }
0x1224   : > { %p8640_p11 = por %p8639_p1, %p8638_p6 }
0x1225   : > { %p8636_p4 = pneg %p8635_p10 }
0x1227   : > { %p8641_p12 = pnand %p8640_p11, %p8636_p4 }
0x1229   : > { %8644 = shalt.err (!%p8641_p12)
}
0x122a   : > { %s8795_s6 = smov 128   ;;  %s8796_s5 = smov 8  }
0x122b   : > { %7382 = dma.vmem_to_hbm [thread:$0]  (%p9179_p7), %s10287_s3, 256, %s10284_s24, %s6104_s14, %s8795_s6, %s8795_s6, %s8796_s5  }
0x122c PF: > { %s10453_s22 = sld [smem:[#allocation45_spill]]  ;;  %p7484_p13 = scmp.ge.s32.totalorder %s8751_s1, 2 }
0x122e   : > { %p7444_p0 = pnand %p7484_p13, %p9186_p9 }
0x1230   : > { %p7445_p2 = pneg %p7444_p0 }
0x1232   : > { %s6132_s13 = sand.u32 1, %s10453_s22  }
0x1233   : > { %s6133_s10 = scalar_lea.sflag [#allocation5], %s6132_s13 }
0x1234   : > { %8718 = dma.done.wait (%p7445_p2), %s6133_s10, 256  }
0x1235   : > { %8720 = vsyncadd (%p7445_p2), %s6133_s10, 4294967040  ;;  %s47_s1 = sadd.s32 1, %s8751_s1   ;;  %s10454_s3 = sld [smem:[#allocation46_spill]] }
0x1236   : > { %p44_p8 = scmp.ge.s32.totalorder %s47_s1, 6   ;;  %s10455_s28 = sld [smem:[#allocation47_spill]] }
0x1237   : > { %s10456_s29 = smov %s10468_s27  ;;  %s10457_s30 = smov %s8743_s0 }
0x1238   : > { %s10458_s4 = smov %s8747_s23  ;;  %s10459_s0 = smov %s10462_s25 }
0x1239   : > { %s10460_s23 = smov %s10466_s8  ;;  %46 = sbr.rel (!%p44_p8) target bundleno = 35 (0x23), region = 256 }
0x123e   :  { %6138 = vsyncpa [#allocation4], 1 }
0x123f   :  { %6140 = vsyncpa [#allocation4 + $0x1], 1 }
0x1240   :  { %6141 = vsyncpa [#allocation7], 1 }
0x1241   :  { %6142 = vsyncpa [#allocation10], 1 }
0x1242   :  { %6143 = vsyncpa [#allocation13], 1 }
0x1243   :  { %6144 = vsyncpa [#allocation16], 1 }
0x1244   :  { %6145 = vsyncpa [#allocation19], 1 }
0x1245   :  { %6146 = vsyncpa [#allocation22], 1 }
0x1246   :  { %6147 = vsyncpa [#allocation25], 1 }
0x1247   :  { %6148 = vsyncpa [#allocation28], 1 }
0x1248   :  { %6149 = vsyncpa [#allocation31], 1 }
0x1249   :  { %6150 = vsyncpa [#allocation5], 1 }
0x124a   :  { %6152 = vsyncpa [#allocation5 + $0x1], 1 }

</bundles_post_ra>
